<compile_context>
chip_gen: v7x
topology: tpu7x:2x2x1
jax: 0.10.0
libtpu: 0.0.40
codegen_flags: <defaults>
</compile_context>

<pallas_src>
import functools

import jax
import jax.numpy as jnp
from jax.experimental import pallas as pl
from jax.experimental.pallas import tpu as pltpu


LANE = 128  # output-channel (N) padding so kernel stores are lane-dense


def _round_up(x, m):
    return (x + m - 1) // m * m


# ----------------------------------------------------------------------------
# Generation-aware knobs (queried once at import; conservative fallback)
# ----------------------------------------------------------------------------
def _tpu_vmem_capacity():
    try:
        return int(pltpu.get_tpu_info().vmem_capacity_bytes)
    except Exception:
        return 64 * 1024 * 1024  # assume the smallest (v7x-sized) VMEM


_VMEM_CAP = _tpu_vmem_capacity()
# ~38 MiB on v7x (64 MiB/TC), capped at 64 MiB on 128 MiB parts (v5e/v6e).
_VMEM_LIMIT = min(64 * 1024 * 1024, int(_VMEM_CAP * 0.6))
# Bigger M tiles on 128 MiB parts -> fewer grid steps at training batch sizes.
_CONV_TM_MAX = 2048 if _VMEM_CAP >= 96 * 1024 * 1024 else 1024
_MLP_TM_MAX = 512
# Keep >=2 grid steps when M allows it so v7x can use both TensorCores on the
# "parallel" axis; harmless on single-core chips.
_MIN_STEPS = 2


def _compiler_params():
    return pltpu.CompilerParams(
        dimension_semantics=("parallel",),
        vmem_limit_bytes=_VMEM_LIMIT,
    )


def _pick_tile(m, tm_max):
    """Row-tile size: multiple of 8, ~= ceil(M / steps), steps >= _MIN_STEPS."""
    steps = max(_MIN_STEPS, pl.cdiv(m, tm_max))
    return _round_up(pl.cdiv(m, steps), 8)


# ----------------------------------------------------------------------------
# Pallas kernels
# ----------------------------------------------------------------------------
def _mm_bias_kernel(x_ref, w_ref, b_ref, o_ref, *, relu):
    """One M-tile of relu(x @ w + b); bf16 operands, f32 accumulate."""
    acc = jnp.dot(x_ref[...], w_ref[...], preferred_element_type=jnp.float32)
    acc = acc + b_ref[...]                       # (1, N) broadcasts over rows
    if relu:
        acc = jnp.maximum(acc, 0.0)
    o_ref[...] = acc.astype(o_ref.dtype)


def _mlp_head_kernel(x_ref, w4_ref, b4_ref, wh_ref, bh_ref, o_ref):
    """Fused fc4 + head: (relu(x @ W4 + b4)) @ Wh + bh for one M-tile."""
    h = jnp.dot(x_ref[...], w4_ref[...], preferred_element_type=jnp.float32)
    h = jnp.maximum(h + b4_ref[...], 0.0)        # f32 epilogue on accumulator
    q = jnp.dot(h.astype(wh_ref.dtype), wh_ref[...],
                preferred_element_type=jnp.float32)
    o_ref[...] = (q + bh_ref[...]).astype(o_ref.dtype)


# ----------------------------------------------------------------------------
# pallas_call wrappers (M-tiled, pipelined, parallel grid axis, no M padding)
# ----------------------------------------------------------------------------
def matmul_bias(x, w, b, *, relu, out_dtype, tm_max=_CONV_TM_MAX):
    """x:(M,K) bf16, w:(K,N) bf16, b:(1,N) f32 -> (M,N) out_dtype.  N%128==0."""
    M, K = x.shape
    Kw, N = w.shape
    assert K == Kw and N % LANE == 0
    TM = _pick_tile(M, tm_max)
    return pl.pallas_call(
        functools.partial(_mm_bias_kernel, relu=relu),
        out_shape=jax.ShapeDtypeStruct((M, N), out_dtype),
        grid=(pl.cdiv(M, TM),),
        in_specs=[
            pl.BlockSpec((TM, K), lambda i: (i, 0)),
            pl.BlockSpec((K, N), lambda i: (0, 0)),
            pl.BlockSpec((1, N), lambda i: (0, 0)),
        ],
        out_specs=pl.BlockSpec((TM, N), lambda i: (i, 0)),
        compiler_params=_compiler_params(),
    )(x, w, b)


def mlp_head(x, w4, b4, wh, bh, *, tm_max=_MLP_TM_MAX):
    """Fused relu(x@W4+b4)@Wh+bh.  x:(M,K) bf16 -> (M, Npad) f32."""
    M, K = x.shape
    K4, N4 = w4.shape
    NP = wh.shape[1]
    assert K == K4 and N4 % LANE == 0 and NP % LANE == 0
    TM = _pick_tile(M, tm_max)
    return pl.pallas_call(
        _mlp_head_kernel,
        out_shape=jax.ShapeDtypeStruct((M, NP), jnp.float32),
        grid=(pl.cdiv(M, TM),),
        in_specs=[
            pl.BlockSpec((TM, K), lambda i: (i, 0)),
            pl.BlockSpec((K, N4), lambda i: (0, 0)),
            pl.BlockSpec((1, N4), lambda i: (0, 0)),
            pl.BlockSpec((N4, NP), lambda i: (0, 0)),
            pl.BlockSpec((1, NP), lambda i: (0, 0)),
        ],
        out_specs=pl.BlockSpec((TM, NP), lambda i: (i, 0)),
        compiler_params=_compiler_params(),
    )(x, w4, b4, wh, bh)


# ----------------------------------------------------------------------------
# NHWC im2col glue (pure data movement; K ordered (kh, kw, c), no transposes)
# ----------------------------------------------------------------------------
def _im2col_nhwc(x, k, s):
    B, H, W, C = x.shape
    OH = (H - k) // s + 1
    OW = (W - k) // s + 1
    cols = []
    for kh in range(k):
        for kw in range(k):
            cols.append(x[:, kh:kh + s * OH:s, kw:kw + s * OW:s, :])  # (B,OH,OW,C)
    p = jnp.concatenate(cols, axis=-1)                # (B, OH, OW, k*k*C)
    return p.reshape(B * OH * OW, k * k * C), OH, OW


def conv2d_pallas(x, w_ready, b_ready, *, ksize, stride):
    """NHWC conv, fused bias+ReLU.  w_ready: (k*k*Cin, Cout_pad) bf16."""
    B = x.shape[0]
    patches, OH, OW = _im2col_nhwc(x, ksize, stride)
    y = matmul_bias(patches, w_ready, b_ready, relu=True, out_dtype=jnp.bfloat16)
    return y.reshape(B, OH, OW, w_ready.shape[1])


# ----------------------------------------------------------------------------
# Parameters: PyTorch-style init, then one-time conversion to kernel layouts
# ----------------------------------------------------------------------------
def _uniform(key, shape, fan_in):
    bound = 1.0 / jnp.sqrt(jnp.float32(fan_in))
    return jax.random.uniform(key, shape, jnp.float32, -bound, bound)


def init_params(key, action_dim, in_channels=4):
    ks = jax.random.split(key, 10)
    p = {}
    p["w1"] = _uniform(ks[0], (32, in_channels, 8, 8), in_channels * 8 * 8)
    p["b1"] = _uniform(ks[1], (32,), in_channels * 8 * 8)
    p["w2"] = _uniform(ks[2], (64, 32, 4, 4), 32 * 4 * 4)
    p["b2"] = _uniform(ks[3], (64,), 32 * 4 * 4)
    p["w3"] = _uniform(ks[4], (64, 64, 3, 3), 64 * 3 * 3)
    p["b3"] = _uniform(ks[5], (64,), 64 * 3 * 3)
    p["w4"] = _uniform(ks[6], (512, 7 * 7 * 64), 7 * 7 * 64)   # torch Linear: (out, in)
    p["b4"] = _uniform(ks[7], (512,), 7 * 7 * 64)
    p["wh"] = _uniform(ks[8], (action_dim, 512), 512)
    p["bh"] = _uniform(ks[9], (action_dim,), 512)
    return p


def _conv_ready(w, b, *, scale=1.0):
    """(Cout,Cin,k,k) torch conv weight -> (k*k*Cin, Cout_pad) bf16; bias (1,Cout_pad) f32.

    Only the OUTPUT channel axis is padded (lane-dense stores); K = k*k*Cin stays real.
    """
    cout, cin, kh, kw = w.shape
    cout_p = _round_up(cout, LANE)
    wr = (w * scale).transpose(2, 3, 1, 0)                     # (kh, kw, Cin, Cout)
    wr = jnp.pad(wr, ((0, 0), (0, 0), (0, 0), (0, cout_p - cout)))
    wr = wr.reshape(kh * kw * cin, cout_p).astype(jnp.bfloat16)
    br = jnp.pad(b, (0, cout_p - cout)).reshape(1, cout_p).astype(jnp.float32)
    return wr, br


def prepare_params(p):
    """One-time conversion to matmul-ready, Cout-padded, bf16 layouts."""
    prep = {}
    # x/255 folded into conv1 weights (bias unaffected).
    prep["w1"], prep["b1"] = _conv_ready(p["w1"], p["b1"], scale=1.0 / 255.0)
    prep["w2"], prep["b2"] = _conv_ready(p["w2"], p["b2"])
    prep["w3"], prep["b3"] = _conv_ready(p["w3"], p["b3"])

    # fc4: torch (512, 64*7*7) with features ordered (C,H,W).  Reorder to the
    # NHWC flatten order (H,W,C), pre-transposed to (K=3136, 512).  No padding.
    w4 = p["w4"].reshape(512, 64, 7, 7).transpose(2, 3, 1, 0)   # (7,7,64,512)
    prep["w4"] = w4.reshape(7 * 7 * 64, 512).astype(jnp.bfloat16)
    prep["b4"] = p["b4"].reshape(1, 512).astype(jnp.float32)

    # head: (action_dim, 512) -> (512, 128) with zero-padded output columns.
    act = p["wh"].shape[0]
    np_ = _round_up(act, LANE)
    prep["wh"] = jnp.pad(p["wh"].T, ((0, 0), (0, np_ - act))).astype(jnp.bfloat16)
    prep["bh"] = jnp.pad(p["bh"], (0, np_ - act)).reshape(1, np_).astype(jnp.float32)
    return prep


# ----------------------------------------------------------------------------
# Forward pass (mirrors ConvolutionalQnet.forward)
# ----------------------------------------------------------------------------
@functools.partial(jax.jit, static_argnames=("action_dim",))
def convolutional_qnet_forward(prep, x, *, action_dim):
    """x: (B, C, H, W) NCHW float (PyTorch layout) -> (B, action_dim) f32."""
    B = x.shape[0]
    # Real input-channel counts of conv2 / conv3 / fc4 (static, from weight K).
    c2_in = prep["w2"].shape[0] // (4 * 4)        # 32
    c3_in = prep["w3"].shape[0] // (3 * 3)        # 64
    c4_in = prep["w4"].shape[0] // (7 * 7)        # 64

    h = jnp.transpose(x, (0, 2, 3, 1)).astype(jnp.bfloat16)             # NHWC, bf16
    h = conv2d_pallas(h, prep["w1"], prep["b1"], ksize=8, stride=4)     # (B,20,20,128)
    h = conv2d_pallas(h[..., :c2_in], prep["w2"], prep["b2"],
                      ksize=4, stride=2)                                 # (B, 9, 9,128)
    h = conv2d_pallas(h[..., :c3_in], prep["w3"], prep["b3"],
                      ksize=3, stride=1)                                 # (B, 7, 7,128)
    # TODO(synk): the original PyTorch forward omits the flatten before fc4
    # (it would raise a shape error); the intended DQN flatten is applied here.
    h = h[..., :c4_in].reshape(B, -1)                                    # (B, 3136)
    q = mlp_head(h, prep["w4"], prep["b4"], prep["wh"], prep["bh"])      # (B, 128)
    return q[:, :action_dim]


# ----------------------------------------------------------------------------
# Pure-JAX float32 reference (PyTorch semantics) for a loose numerical check
# ----------------------------------------------------------------------------
def reference_forward(params, x):
    x = x.astype(jnp.float32) / 255.0

    def conv(h, w, b, s):
        y = jax.lax.conv_general_dilated(
            h, w, window_strides=(s, s), padding="VALID",
            dimension_numbers=("NCHW", "OIHW", "NCHW"))
        return jax.nn.relu(y + b.reshape(1, -1, 1, 1))

    h = conv(x, params["w1"], params["b1"], 4)
    h = conv(h, params["w2"], params["b2"], 2)
    h = conv(h, params["w3"], params["b3"], 1)
    h = h.reshape(h.shape[0], -1)                                  # (B, 64*7*7)
    h = jax.nn.relu(h @ params["w4"].T + params["b4"])
    return h @ params["wh"].T + params["bh"]


if __name__ == "__main__":
    key = jax.random.PRNGKey(0)
    k_param, k_x = jax.random.split(key)

    action_dim = 6
    in_channels = 4
    batch = 2
    # fc4 expects 7*7*64 features, which pins the input spatial size to 84x84.
    x = jax.random.uniform(k_x, (batch, in_channels, 84, 84),
                           jnp.float32, 0.0, 255.0)

    params = init_params(k_param, action_dim, in_channels)
    prep = prepare_params(params)

    q = convolutional_qnet_forward(prep, x, action_dim=action_dim)
    q = jax.block_until_ready(q)
    assert q.shape == (batch, action_dim)
    assert q.dtype == jnp.float32

    # Loose check vs the f32 reference (kernel uses bf16 MXU operands).
    q_ref = reference_forward(params, x)
    rel_err = jnp.max(jnp.abs(q - q_ref)) / (jnp.max(jnp.abs(q_ref)) + 1e-6)
    assert float(rel_err) < 0.1, f"relative error too large: {float(rel_err)}"

    print("KERNEL_OK")
</pallas_src>

<mosaic_0001>
module attributes {stable_mosaic.version = 11 : i64} {
  func.func @_mm_bias_kernel(%arg0: i32, %arg1: memref<400x256xbf16, #tpu.memory_space<vmem>>, %arg2: memref<256x128xbf16, #tpu.memory_space<vmem>>, %arg3: memref<1x128xf32, #tpu.memory_space<vmem>>, %arg4: memref<400x128xbf16, #tpu.memory_space<vmem>>) attributes {dimension_semantics = [#tpu.dimension_semantics<parallel>], iteration_bounds = array<i64: 2>, scalar_prefetch = 0 : i64, scratch_operands = 0 : i64, tpu.core_type = #tpu.core_type<tc>, window_params = [{transform_indices = @transform_0, window_bounds = array<i64: 400, 256>}, {pipeline_mode = #tpu.pipeline_mode<synchronous>, transform_indices = @transform_1, window_bounds = array<i64: 256, 128>}, {pipeline_mode = #tpu.pipeline_mode<synchronous>, transform_indices = @transform_2, window_bounds = array<i64: 1, 128>}, {transform_indices = @transform_3, window_bounds = array<i64: 400, 128>}]} {
    %c0 = arith.constant 0 : index
    %c0_0 = arith.constant 0 : index
    %0 = vector.load %arg1[%c0, %c0_0] : memref<400x256xbf16, #tpu.memory_space<vmem>>, vector<400x256xbf16>
    %c0_1 = arith.constant 0 : index
    %c0_2 = arith.constant 0 : index
    %1 = vector.load %arg2[%c0_1, %c0_2] : memref<256x128xbf16, #tpu.memory_space<vmem>>, vector<256x128xbf16>
    %cst = arith.constant dense<0.000000e+00> : vector<400x128xf32>
    %2 = tpu.matmul %0, %1, %cst {dimension_numbers = #tpu.dot_dimension_numbers<[1], [0], [0], [1], [0, 0, 1, 1], [], []>} : vector<400x256xbf16>, vector<256x128xbf16>, vector<400x128xf32> -> vector<400x128xf32>
    %c0_3 = arith.constant 0 : index
    %c0_4 = arith.constant 0 : index
    %3 = vector.load %arg3[%c0_3, %c0_4] : memref<1x128xf32, #tpu.memory_space<vmem>>, vector<1x128xf32>
    %4 = vector.broadcast %3 : vector<1x128xf32> to vector<400x128xf32>
    %5 = arith.addf %2, %4 : vector<400x128xf32>
    %cst_5 = arith.constant 0.000000e+00 : f32
    %6 = vector.broadcast %cst_5 : f32 to vector<400x128xf32>
    %7 = arith.maximumf %5, %6 : vector<400x128xf32>
    %8 = arith.truncf %7 : vector<400x128xf32> to vector<400x128xbf16>
    %c0_6 = arith.constant 0 : index
    %c0_7 = arith.constant 0 : index
    %9 = vector.load %arg4[%c0_6, %c0_7] : memref<400x128xbf16, #tpu.memory_space<vmem>>, vector<400x128xbf16>
    tpu.vector_store %arg4[%c0_6, %c0_7], %8 {strides = array<i32>} : memref<400x128xbf16, #tpu.memory_space<vmem>>, vector<400x128xbf16>,
    return
  }
  func.func @transform_0(%arg0: i32) -> (i32, i32) {
    %c0_i32 = arith.constant 0 : i32
    %c0_i32_0 = arith.constant 0 : i32
    return %arg0, %c0_i32 : i32, i32
  }
  func.func @transform_1(%arg0: i32) -> (i32, i32) {
    %c0_i32 = arith.constant 0 : i32
    %c0_i32_0 = arith.constant 0 : i32
    %c0_i32_1 = arith.constant 0 : i32
    return %c0_i32, %c0_i32_0 : i32, i32
  }
  func.func @transform_2(%arg0: i32) -> (i32, i32) {
    %c0_i32 = arith.constant 0 : i32
    %c0_i32_0 = arith.constant 0 : i32
    %c0_i32_1 = arith.constant 0 : i32
    return %c0_i32, %c0_i32_0 : i32, i32
  }
  func.func @transform_3(%arg0: i32) -> (i32, i32) {
    %c0_i32 = arith.constant 0 : i32
    %c0_i32_0 = arith.constant 0 : i32
    return %arg0, %c0_i32 : i32, i32
  }
}

module attributes {stable_mosaic.version = 11 : i64} {
  func.func @_mm_bias_kernel(%arg0: i32, %arg1: memref<88x512xbf16, #tpu.memory_space<vmem>>, %arg2: memref<512x128xbf16, #tpu.memory_space<vmem>>, %arg3: memref<1x128xf32, #tpu.memory_space<vmem>>, %arg4: memref<88x128xbf16, #tpu.memory_space<vmem>>) attributes {dimension_semantics = [#tpu.dimension_semantics<parallel>], iteration_bounds = array<i64: 2>, scalar_prefetch = 0 : i64, scratch_operands = 0 : i64, tpu.core_type = #tpu.core_type<tc>, window_params = [{transform_indices = @transform_0, window_bounds = array<i64: 88, 512>}, {pipeline_mode = #tpu.pipeline_mode<synchronous>, transform_indices = @transform_1, window_bounds = array<i64: 512, 128>}, {pipeline_mode = #tpu.pipeline_mode<synchronous>, transform_indices = @transform_2, window_bounds = array<i64: 1, 128>}, {transform_indices = @transform_3, window_bounds = array<i64: 88, 128>}]} {
    %c0 = arith.constant 0 : index
    %c0_0 = arith.constant 0 : index
    %0 = vector.load %arg1[%c0, %c0_0] : memref<88x512xbf16, #tpu.memory_space<vmem>>, vector<88x512xbf16>
    %c0_1 = arith.constant 0 : index
    %c0_2 = arith.constant 0 : index
    %1 = vector.load %arg2[%c0_1, %c0_2] : memref<512x128xbf16, #tpu.memory_space<vmem>>, vector<512x128xbf16>
    %cst = arith.constant dense<0.000000e+00> : vector<88x128xf32>
    %2 = tpu.matmul %0, %1, %cst {dimension_numbers = #tpu.dot_dimension_numbers<[1], [0], [0], [1], [0, 0, 1, 1], [], []>} : vector<88x512xbf16>, vector<512x128xbf16>, vector<88x128xf32> -> vector<88x128xf32>
    %c0_3 = arith.constant 0 : index
    %c0_4 = arith.constant 0 : index
    %3 = vector.load %arg3[%c0_3, %c0_4] : memref<1x128xf32, #tpu.memory_space<vmem>>, vector<1x128xf32>
    %4 = vector.broadcast %3 : vector<1x128xf32> to vector<88x128xf32>
    %5 = arith.addf %2, %4 : vector<88x128xf32>
    %cst_5 = arith.constant 0.000000e+00 : f32
    %6 = vector.broadcast %cst_5 : f32 to vector<88x128xf32>
    %7 = arith.maximumf %5, %6 : vector<88x128xf32>
    %8 = arith.truncf %7 : vector<88x128xf32> to vector<88x128xbf16>
    %c0_6 = arith.constant 0 : index
    %c0_7 = arith.constant 0 : index
    %9 = vector.load %arg4[%c0_6, %c0_7] : memref<88x128xbf16, #tpu.memory_space<vmem>>, vector<88x128xbf16>
    tpu.vector_store %arg4[%c0_6, %c0_7], %8 {strides = array<i32>} : memref<88x128xbf16, #tpu.memory_space<vmem>>, vector<88x128xbf16>,
    return
  }
  func.func @transform_0(%arg0: i32) -> (i32, i32) {
    %c0_i32 = arith.constant 0 : i32
    %c0_i32_0 = arith.constant 0 : i32
    return %arg0, %c0_i32 : i32, i32
  }
  func.func @transform_1(%arg0: i32) -> (i32, i32) {
    %c0_i32 = arith.constant 0 : i32
    %c0_i32_0 = arith.constant 0 : i32
    %c0_i32_1 = arith.constant 0 : i32
    return %c0_i32, %c0_i32_0 : i32, i32
  }
  func.func @transform_2(%arg0: i32) -> (i32, i32) {
    %c0_i32 = arith.constant 0 : i32
    %c0_i32_0 = arith.constant 0 : i32
    %c0_i32_1 = arith.constant 0 : i32
    return %c0_i32, %c0_i32_0 : i32, i32
  }
  func.func @transform_3(%arg0: i32) -> (i32, i32) {
    %c0_i32 = arith.constant 0 : i32
    %c0_i32_0 = arith.constant 0 : i32
    return %arg0, %c0_i32 : i32, i32
  }
}

module attributes {stable_mosaic.version = 11 : i64} {
  func.func @_mm_bias_kernel(%arg0: i32, %arg1: memref<56x576xbf16, #tpu.memory_space<vmem>>, %arg2: memref<576x128xbf16, #tpu.memory_space<vmem>>, %arg3: memref<1x128xf32, #tpu.memory_space<vmem>>, %arg4: memref<56x128xbf16, #tpu.memory_space<vmem>>) attributes {dimension_semantics = [#tpu.dimension_semantics<parallel>], iteration_bounds = array<i64: 2>, scalar_prefetch = 0 : i64, scratch_operands = 0 : i64, tpu.core_type = #tpu.core_type<tc>, window_params = [{transform_indices = @transform_0, window_bounds = array<i64: 56, 576>}, {pipeline_mode = #tpu.pipeline_mode<synchronous>, transform_indices = @transform_1, window_bounds = array<i64: 576, 128>}, {pipeline_mode = #tpu.pipeline_mode<synchronous>, transform_indices = @transform_2, window_bounds = array<i64: 1, 128>}, {transform_indices = @transform_3, window_bounds = array<i64: 56, 128>}]} {
    %c0 = arith.constant 0 : index
    %c0_0 = arith.constant 0 : index
    %0 = vector.load %arg1[%c0, %c0_0] : memref<56x576xbf16, #tpu.memory_space<vmem>>, vector<56x576xbf16>
    %c0_1 = arith.constant 0 : index
    %c0_2 = arith.constant 0 : index
    %1 = vector.load %arg2[%c0_1, %c0_2] : memref<576x128xbf16, #tpu.memory_space<vmem>>, vector<576x128xbf16>
    %cst = arith.constant dense<0.000000e+00> : vector<56x128xf32>
    %2 = tpu.matmul %0, %1, %cst {dimension_numbers = #tpu.dot_dimension_numbers<[1], [0], [0], [1], [0, 0, 1, 1], [], []>} : vector<56x576xbf16>, vector<576x128xbf16>, vector<56x128xf32> -> vector<56x128xf32>
    %c0_3 = arith.constant 0 : index
    %c0_4 = arith.constant 0 : index
    %3 = vector.load %arg3[%c0_3, %c0_4] : memref<1x128xf32, #tpu.memory_space<vmem>>, vector<1x128xf32>
    %4 = vector.broadcast %3 : vector<1x128xf32> to vector<56x128xf32>
    %5 = arith.addf %2, %4 : vector<56x128xf32>
    %cst_5 = arith.constant 0.000000e+00 : f32
    %6 = vector.broadcast %cst_5 : f32 to vector<56x128xf32>
    %7 = arith.maximumf %5, %6 : vector<56x128xf32>
    %8 = arith.truncf %7 : vector<56x128xf32> to vector<56x128xbf16>
    %c0_6 = arith.constant 0 : index
    %c0_7 = arith.constant 0 : index
    %9 = vector.load %arg4[%c0_6, %c0_7] : memref<56x128xbf16, #tpu.memory_space<vmem>>, vector<56x128xbf16>
    tpu.vector_store %arg4[%c0_6, %c0_7], %8 {strides = array<i32>} : memref<56x128xbf16, #tpu.memory_space<vmem>>, vector<56x128xbf16>,
    return
  }
  func.func @transform_0(%arg0: i32) -> (i32, i32) {
    %c0_i32 = arith.constant 0 : i32
    %c0_i32_0 = arith.constant 0 : i32
    return %arg0, %c0_i32 : i32, i32
  }
  func.func @transform_1(%arg0: i32) -> (i32, i32) {
    %c0_i32 = arith.constant 0 : i32
    %c0_i32_0 = arith.constant 0 : i32
    %c0_i32_1 = arith.constant 0 : i32
    return %c0_i32, %c0_i32_0 : i32, i32
  }
  func.func @transform_2(%arg0: i32) -> (i32, i32) {
    %c0_i32 = arith.constant 0 : i32
    %c0_i32_0 = arith.constant 0 : i32
    %c0_i32_1 = arith.constant 0 : i32
    return %c0_i32, %c0_i32_0 : i32, i32
  }
  func.func @transform_3(%arg0: i32) -> (i32, i32) {
    %c0_i32 = arith.constant 0 : i32
    %c0_i32_0 = arith.constant 0 : i32
    return %arg0, %c0_i32 : i32, i32
  }
}

module attributes {stable_mosaic.version = 11 : i64} {
  func.func @_mlp_head_kernel(%arg0: i32, %arg1: memref<8x3136xbf16, #tpu.memory_space<vmem>>, %arg2: memref<3136x512xbf16, #tpu.memory_space<vmem>>, %arg3: memref<1x512xf32, #tpu.memory_space<vmem>>, %arg4: memref<512x128xbf16, #tpu.memory_space<vmem>>, %arg5: memref<1x128xf32, #tpu.memory_space<vmem>>, %arg6: memref<8x128xf32, #tpu.memory_space<vmem>>) attributes {dimension_semantics = [#tpu.dimension_semantics<parallel>], iteration_bounds = array<i64: 1>, scalar_prefetch = 0 : i64, scratch_operands = 0 : i64, tpu.core_type = #tpu.core_type<tc>, window_params = [{transform_indices = @transform_0, window_bounds = array<i64: 8, 3136>}, {pipeline_mode = #tpu.pipeline_mode<synchronous>, transform_indices = @transform_1, window_bounds = array<i64: 3136, 512>}, {pipeline_mode = #tpu.pipeline_mode<synchronous>, transform_indices = @transform_2, window_bounds = array<i64: 1, 512>}, {pipeline_mode = #tpu.pipeline_mode<synchronous>, transform_indices = @transform_3, window_bounds = array<i64: 512, 128>}, {pipeline_mode = #tpu.pipeline_mode<synchronous>, transform_indices = @transform_4, window_bounds = array<i64: 1, 128>}, {transform_indices = @transform_5, window_bounds = array<i64: 8, 128>}]} {
    %c0 = arith.constant 0 : index
    %c0_0 = arith.constant 0 : index
    %0 = vector.load %arg1[%c0, %c0_0] : memref<8x3136xbf16, #tpu.memory_space<vmem>>, vector<8x3136xbf16>
    %c0_1 = arith.constant 0 : index
    %c0_2 = arith.constant 0 : index
    %1 = vector.load %arg2[%c0_1, %c0_2] : memref<3136x512xbf16, #tpu.memory_space<vmem>>, vector<3136x512xbf16>
    %cst = arith.constant dense<0.000000e+00> : vector<8x512xf32>
    %2 = tpu.matmul %0, %1, %cst {dimension_numbers = #tpu.dot_dimension_numbers<[1], [0], [0], [1], [0, 0, 1, 1], [], []>} : vector<8x3136xbf16>, vector<3136x512xbf16>, vector<8x512xf32> -> vector<8x512xf32>
    %c0_3 = arith.constant 0 : index
    %c0_4 = arith.constant 0 : index
    %3 = vector.load %arg3[%c0_3, %c0_4] : memref<1x512xf32, #tpu.memory_space<vmem>>, vector<1x512xf32>
    %4 = vector.broadcast %3 : vector<1x512xf32> to vector<8x512xf32>
    %5 = arith.addf %2, %4 : vector<8x512xf32>
    %cst_5 = arith.constant 0.000000e+00 : f32
    %6 = vector.broadcast %cst_5 : f32 to vector<8x512xf32>
    %7 = arith.maximumf %5, %6 : vector<8x512xf32>
    %8 = arith.truncf %7 : vector<8x512xf32> to vector<8x512xbf16>
    %c0_6 = arith.constant 0 : index
    %c0_7 = arith.constant 0 : index
    %9 = vector.load %arg4[%c0_6, %c0_7] : memref<512x128xbf16, #tpu.memory_space<vmem>>, vector<512x128xbf16>
    %cst_8 = arith.constant dense<0.000000e+00> : vector<8x128xf32>
    %10 = tpu.matmul %8, %9, %cst_8 {dimension_numbers = #tpu.dot_dimension_numbers<[1], [0], [0], [1], [0, 0, 1, 1], [], []>} : vector<8x512xbf16>, vector<512x128xbf16>, vector<8x128xf32> -> vector<8x128xf32>
    %c0_9 = arith.constant 0 : index
    %c0_10 = arith.constant 0 : index
    %11 = vector.load %arg5[%c0_9, %c0_10] : memref<1x128xf32, #tpu.memory_space<vmem>>, vector<1x128xf32>
    %12 = vector.broadcast %11 : vector<1x128xf32> to vector<8x128xf32>
    %13 = arith.addf %10, %12 : vector<8x128xf32>
    %c0_11 = arith.constant 0 : index
    %c0_12 = arith.constant 0 : index
    %14 = vector.load %arg6[%c0_11, %c0_12] : memref<8x128xf32, #tpu.memory_space<vmem>>, vector<8x128xf32>
    tpu.vector_store %arg6[%c0_11, %c0_12], %13 {strides = array<i32>} : memref<8x128xf32, #tpu.memory_space<vmem>>, vector<8x128xf32>,
    return
  }
  func.func @transform_0(%arg0: i32) -> (i32, i32) {
    %c0_i32 = arith.constant 0 : i32
    %c0_i32_0 = arith.constant 0 : i32
    return %arg0, %c0_i32 : i32, i32
  }
  func.func @transform_1(%arg0: i32) -> (i32, i32) {
    %c0_i32 = arith.constant 0 : i32
    %c0_i32_0 = arith.constant 0 : i32
    %c0_i32_1 = arith.constant 0 : i32
    return %c0_i32, %c0_i32_0 : i32, i32
  }
  func.func @transform_2(%arg0: i32) -> (i32, i32) {
    %c0_i32 = arith.constant 0 : i32
    %c0_i32_0 = arith.constant 0 : i32
    %c0_i32_1 = arith.constant 0 : i32
    return %c0_i32, %c0_i32_0 : i32, i32
  }
  func.func @transform_3(%arg0: i32) -> (i32, i32) {
    %c0_i32 = arith.constant 0 : i32
    %c0_i32_0 = arith.constant 0 : i32
    %c0_i32_1 = arith.constant 0 : i32
    return %c0_i32, %c0_i32_0 : i32, i32
  }
  func.func @transform_4(%arg0: i32) -> (i32, i32) {
    %c0_i32 = arith.constant 0 : i32
    %c0_i32_0 = arith.constant 0 : i32
    %c0_i32_1 = arith.constant 0 : i32
    return %c0_i32, %c0_i32_0 : i32, i32
  }
  func.func @transform_5(%arg0: i32) -> (i32, i32) {
    %c0_i32 = arith.constant 0 : i32
    %c0_i32_0 = arith.constant 0 : i32
    return %arg0, %c0_i32 : i32, i32
  }
}

</mosaic_0001>

<bundles_post_ra>
// kernel: convolutional_qnet_forward.4
= control target key start
LH: loop header
LB: loop body
LE: loop exit
PB: predicated region body
PF: predicated region fallthrough
CT: control target
= control target key end

     0   :  { %s1690_s12 = smov 0   ;;  %s1925_s0 = inlined_call_operand.vmem [shape: bf16[800,256], index: 0, kind: input, shape index: {}]   ;;  %s1926_s1 = inlined_call_operand.vmem [shape: bf16[256,128], index: 1, kind: input, shape index: {}]   ;;  %s1927_s2 = inlined_call_operand.vmem [shape: f32[1,128], index: 2, kind: input, shape index: {}]   ;;  %s1928_s3 = inlined_call_operand.vmem [shape: bf16[800,128], index: 3, kind: output, shape index: {}]  }
   0x1 LB: > { %s1202_s13 = sadd.s32 4294967295, %s1667_s12   ;;  %p1206_p0 = scmp.ge.s32.totalorder %s1667_s12, 1  ;;  %s1667_s12 = sphi %s1690_s12, %s13_s12  }
   0x2   : > { %p139_p1 = scmp.lt.s32.totalorder %s1667_s12, 3 }
   0x4   : > { %p140_p2 = pnand %p1206_p0, %p139_p1 }
   0x5   : > { %v1570_v0 = vld [vmem:[%s1926_s1] sm:$0xff] (!%p140_p2)   ;;  %v1669_v1 = vmov (!%p140_p2), 0   ;;  %s164_s16 = smul.u32 (!%p140_p2), 50, %s1202_s13  ;;  %v1571_v2 = vld [vmem:[%s1926_s1 + $0x8] sm:$0xff] (!%p140_p2)   ;;  %v1572_v3 = vld [vmem:[%s1926_s1 + $0x10] sm:$0xff] (!%p140_p2)  }
   0x6   : > { %143 = sbr.rel (%p140_p2) target bundleno = 387 (0x183), region = 32  ;;  %613 = vmatprep.subr.bf16.mxu0 (!%p140_p2), %v1669_v1  ;;  %1529 = vmatprep.subr.bf16.mxu1 (!%p140_p2), %v1669_v1  ;;  %v1573_v4 = vld [vmem:[%s1926_s1 + $0x18] sm:$0xff] (!%p140_p2)   ;;  %v1574_v5 = vld [vmem:[%s1926_s1 + $0x20] sm:$0xff] (!%p140_p2)   ;;  %v1575_v7 = vld [vmem:[%s1926_s1 + $0x28] sm:$0xff] (!%p140_p2)  }
   0x7   : > { %614 = vmatpush1.bf16.msra.mxu0 (!%p140_p2), %v1570_v0  ;;  %1545 = vmatpush1.bf16.msra.mxu1 (!%p140_p2), %v1570_v0  ;;  %p165_p3 = scmp.lt.s32.totalorder (!%p140_p2), %s164_s16, 99  ;;  %v1576_v9 = vld [vmem:[%s1926_s1 + $0x30] sm:$0xff] (!%p140_p2)   ;;  %v1577_v10 = vld [vmem:[%s1926_s1 + $0x38] sm:$0xff] (!%p140_p2)   ;;  %v1578_v11 = vld [vmem:[%s1926_s1 + $0x40] sm:$0xff] (!%p140_p2)  }
   0x8   : > { %615 = vmatprep.subr.bf16.mxu0 (!%p140_p2), %v1669_v1  ;;  %1530 = vmatprep.subr.bf16.mxu1 (!%p140_p2), %v1669_v1  ;;  %v1579_v12 = vld [vmem:[%s1926_s1 + $0x48] sm:$0xff] (!%p140_p2)   ;;  %v1580_v13 = vld [vmem:[%s1926_s1 + $0x50] sm:$0xff] (!%p140_p2)   ;;  %v1581_v14 = vld [vmem:[%s1926_s1 + $0x58] sm:$0xff] (!%p140_p2)  }
   0x9   : > { %v1582_v15 = vld [vmem:[%s1926_s1 + $0x60] sm:$0xff] (!%p140_p2)   ;;  %v1583_v16 = vld [vmem:[%s1926_s1 + $0x68] sm:$0xff] (!%p140_p2)   ;;  %v1584_v17 = vld [vmem:[%s1926_s1 + $0x70] sm:$0xff] (!%p140_p2)  }
   0xa   : > { %v1585_v18 = vld [vmem:[%s1926_s1 + $0x78] sm:$0xff] (!%p140_p2)  }
   0xb   : > { %616 = vmatpush1.bf16.msra.mxu0 (!%p140_p2), %v1571_v2  ;;  %1546 = vmatpush1.bf16.msra.mxu1 (!%p140_p2), %v1571_v2 }
   0xc   : > { %617 = vmatprep.subr.bf16.mxu0 (!%p140_p2), %v1669_v1  ;;  %1531 = vmatprep.subr.bf16.mxu1 (!%p140_p2), %v1669_v1 }
   0xd   : > { %s1930_s16 = smov (!%p165_p3, %s164_s16), 99 }
   0xe   : > { %s1329_s23 = sshll.u32 %s1930_s16, 3  ;;  %s1209_s29 = sshll.u32 %s1930_s16, 2 }
   0xf   : > { %618 = vmatpush1.bf16.msra.mxu0 %v1572_v3  ;;  %1547 = vmatpush1.bf16.msra.mxu1 %v1572_v3  ;;  %s1727_s28 = scalar_lea.vmem %s1925_s0, %s1329_s23  ;;  %v1839_v3 = vld [vmem:[%s1927_s2] ss:$0 sm:$0xff]  ;;  %s1849_s4 = scalar_lea.vmem %s1928_s3, %s1209_s29 }
  0x10   : > { %619 = vmatprep.subr.bf16.mxu0 %v1669_v1  ;;  %1532 = vmatprep.subr.bf16.mxu1 %v1669_v1  ;;  %v1588_v6 = vld [vmem:[%s1727_s28 + $0x4] ss:$8 sps:$4 sm:$0xff]   ;;  %v1591_v8 = vld [vmem:[%s1727_s28 + $0xd4] ss:$8 sps:$4 sm:$0xff]   ;;  %v1586_v19 = vld [vmem:[%s1727_s28] ss:$8 sps:$4 sm:$0xff]  }
  0x11   : > { %645 = vmatprep.mubr.bf16.mxu0 %v1588_v6  ;;  %749 = vmatprep.mubr.bf16.mxu1 %v1591_v8  ;;  %v1589_v20 = vld [vmem:[%s1727_s28 + $0xd0] ss:$8 sps:$4 sm:$0xff]   ;;  %v1592_v21 = vld [vmem:[%s1727_s28 + $0x14] ss:$8 sps:$4 sm:$0xff]   ;;  %v1595_v22 = vld [vmem:[%s1727_s28 + $0xe4] ss:$8 sps:$4 sm:$0xff]  }
  0x12   : > { %v1594_v23 = vld [vmem:[%s1727_s28 + $0x10] ss:$8 sps:$4 sm:$0xff]   ;;  %v1597_v24 = vld [vmem:[%s1727_s28 + $0xe0] ss:$8 sps:$4 sm:$0xff]   ;;  %v1598_v25 = vld [vmem:[%s1727_s28 + $0x24] ss:$8 sps:$4 sm:$0xff]  }
  0x13   : > { %620 = vmatpush1.bf16.msra.mxu0 %v1573_v4  ;;  %1548 = vmatpush1.bf16.msra.mxu1 %v1573_v4  ;;  %v1601_v26 = vld [vmem:[%s1727_s28 + $0xf4] ss:$8 sps:$4 sm:$0xff]   ;;  %v1600_v27 = vld [vmem:[%s1727_s28 + $0x20] ss:$8 sps:$4 sm:$0xff]   ;;  %v1603_v28 = vld [vmem:[%s1727_s28 + $0xf0] ss:$8 sps:$4 sm:$0xff]  }
  0x14   : > { %621 = vmatprep.subr.bf16.mxu0 %v1669_v1  ;;  %1533 = vmatprep.subr.bf16.mxu1 %v1669_v1  ;;  %v1604_v29 = vld [vmem:[%s1727_s28 + $0x34] ss:$8 sps:$4 sm:$0xff]   ;;  %v1607_v30 = vld [vmem:[%s1727_s28 + $0x104] ss:$8 sps:$4 sm:$0xff]   ;;  %v1606_v31 = vld [vmem:[%s1727_s28 + $0x30] ss:$8 sps:$4 sm:$0xff]  }
  0x15   : > { %v1609_v32 = vld [vmem:[%s1727_s28 + $0x100] ss:$8 sps:$4 sm:$0xff]   ;;  %v1610_v33 = vld [vmem:[%s1727_s28 + $0x44] ss:$8 sps:$4 sm:$0xff]   ;;  %v1613_v34 = vld [vmem:[%s1727_s28 + $0x114] ss:$8 sps:$4 sm:$0xff]  }
  0x16   : > { %v1612_v35 = vld [vmem:[%s1727_s28 + $0x40] ss:$8 sps:$4 sm:$0xff]   ;;  %v1615_v36 = vld [vmem:[%s1727_s28 + $0x110] ss:$8 sps:$4 sm:$0xff]   ;;  %v1616_v37 = vld [vmem:[%s1727_s28 + $0x54] ss:$8 sps:$4 sm:$0xff]  }
  0x17   : > { %622 = vmatpush1.bf16.msra.mxu0 %v1574_v5  ;;  %1549 = vmatpush1.bf16.msra.mxu1 %v1574_v5  ;;  %v1619_v38 = vld [vmem:[%s1727_s28 + $0x124] ss:$8 sps:$4 sm:$0xff]   ;;  %v1618_v39 = vld [vmem:[%s1727_s28 + $0x50] ss:$8 sps:$4 sm:$0xff]   ;;  %v1621_v40 = vld [vmem:[%s1727_s28 + $0x120] ss:$8 sps:$4 sm:$0xff]  }
  0x18   : > { %623 = vmatprep.subr.bf16.mxu0 %v1669_v1  ;;  %1534 = vmatprep.subr.bf16.mxu1 %v1669_v1  ;;  %v1622_v41 = vld [vmem:[%s1727_s28 + $0x64] ss:$8 sps:$4 sm:$0xff]   ;;  %v1625_v42 = vld [vmem:[%s1727_s28 + $0x134] ss:$8 sps:$4 sm:$0xff]   ;;  %v1624_v43 = vld [vmem:[%s1727_s28 + $0x60] ss:$8 sps:$4 sm:$0xff]  }
  0x19   : > { %v1627_v44 = vld [vmem:[%s1727_s28 + $0x130] ss:$8 sps:$4 sm:$0xff]   ;;  %v1628_v45 = vld [vmem:[%s1727_s28 + $0x74] ss:$8 sps:$4 sm:$0xff]   ;;  %v1631_v46 = vld [vmem:[%s1727_s28 + $0x144] ss:$8 sps:$4 sm:$0xff]  }
  0x1a   : > { %v1630_v47 = vld [vmem:[%s1727_s28 + $0x70] ss:$8 sps:$4 sm:$0xff]   ;;  %v1633_v48 = vld [vmem:[%s1727_s28 + $0x140] ss:$8 sps:$4 sm:$0xff]   ;;  %v1634_v49 = vld [vmem:[%s1727_s28 + $0x84] ss:$8 sps:$4 sm:$0xff]  }
  0x1b   : > { %624 = vmatpush1.bf16.msra.mxu0 %v1575_v7  ;;  %1550 = vmatpush1.bf16.msra.mxu1 %v1575_v7  ;;  %v1637_v50 = vld [vmem:[%s1727_s28 + $0x154] ss:$8 sps:$4 sm:$0xff]   ;;  %v1636_v51 = vld [vmem:[%s1727_s28 + $0x80] ss:$8 sps:$4 sm:$0xff]   ;;  %v1639_v52 = vld [vmem:[%s1727_s28 + $0x150] ss:$8 sps:$4 sm:$0xff]  }
  0x1c   : > { %625 = vmatprep.subr.bf16.mxu0 %v1669_v1  ;;  %1535 = vmatprep.subr.bf16.mxu1 %v1669_v1  ;;  %v1640_v53 = vld [vmem:[%s1727_s28 + $0x94] ss:$8 sps:$4 sm:$0xff]   ;;  %v1643_v54 = vld [vmem:[%s1727_s28 + $0x164] ss:$8 sps:$4 sm:$0xff]   ;;  %v1642_v55 = vld [vmem:[%s1727_s28 + $0x90] ss:$8 sps:$4 sm:$0xff]  }
  0x1d   : > { %v1645_v56 = vld [vmem:[%s1727_s28 + $0x160] ss:$8 sps:$4 sm:$0xff]   ;;  %v1646_v57 = vld [vmem:[%s1727_s28 + $0xa4] ss:$8 sps:$4 sm:$0xff]   ;;  %v1649_v58 = vld [vmem:[%s1727_s28 + $0x174] ss:$8 sps:$4 sm:$0xff]  }
  0x1e   : > { %v1648_v59 = vld [vmem:[%s1727_s28 + $0xa0] ss:$8 sps:$4 sm:$0xff]   ;;  %v1651_v60 = vld [vmem:[%s1727_s28 + $0x170] ss:$8 sps:$4 sm:$0xff]   ;;  %v1652_v61 = vld [vmem:[%s1727_s28 + $0xb4] ss:$8 sps:$4 sm:$0xff]  }
  0x1f   : > { %626 = vmatpush1.bf16.msra.mxu0 %v1576_v9  ;;  %1551 = vmatpush1.bf16.msra.mxu1 %v1576_v9  ;;  %v1655_v62 = vld [vmem:[%s1727_s28 + $0x184] ss:$8 sps:$4 sm:$0xff]   ;;  %v1654_v63 = vld [vmem:[%s1727_s28 + $0xb0] ss:$8 sps:$4 sm:$0xff]   ;;  %v1657_v0 = vld [vmem:[%s1727_s28 + $0x180] ss:$8 sps:$4 sm:$0xff]  }
  0x20   : > { %627 = vmatprep.subr.bf16.mxu0 %v1669_v1  ;;  %1536 = vmatprep.subr.bf16.mxu1 %v1669_v1  ;;  %v1660_v2 = vld [vmem:[%s1727_s28 + $0xc0] ss:$8 sps:$4 sm:$0xff]  }
  0x23   : > { %628 = vmatpush1.bf16.msra.mxu0 %v1577_v10  ;;  %1552 = vmatpush1.bf16.msra.mxu1 %v1577_v10 }
  0x24   : > { %629 = vmatprep.subr.bf16.mxu0 %v1669_v1  ;;  %1537 = vmatprep.subr.bf16.mxu1 %v1669_v1 }
  0x27   : > { %630 = vmatpush1.bf16.msra.mxu0 %v1578_v11  ;;  %1553 = vmatpush1.bf16.msra.mxu1 %v1578_v11 }
  0x28   : > { %631 = vmatprep.subr.bf16.mxu0 %v1669_v1  ;;  %1538 = vmatprep.subr.bf16.mxu1 %v1669_v1 }
  0x2b   : > { %632 = vmatpush1.bf16.msra.mxu0 %v1579_v12  ;;  %1554 = vmatpush1.bf16.msra.mxu1 %v1579_v12 }
  0x2c   : > { %633 = vmatprep.subr.bf16.mxu0 %v1669_v1  ;;  %1539 = vmatprep.subr.bf16.mxu1 %v1669_v1 }
  0x2f   : > { %634 = vmatpush1.bf16.msra.mxu0 %v1580_v13  ;;  %1555 = vmatpush1.bf16.msra.mxu1 %v1580_v13 }
  0x30   : > { %635 = vmatprep.subr.bf16.mxu0 %v1669_v1  ;;  %1540 = vmatprep.subr.bf16.mxu1 %v1669_v1 }
  0x33   : > { %636 = vmatpush1.bf16.msra.mxu0 %v1581_v14  ;;  %1556 = vmatpush1.bf16.msra.mxu1 %v1581_v14 }
  0x34   : > { %637 = vmatprep.subr.bf16.mxu0 %v1669_v1  ;;  %1541 = vmatprep.subr.bf16.mxu1 %v1669_v1 }
  0x37   : > { %638 = vmatpush1.bf16.msra.mxu0 %v1582_v15  ;;  %1557 = vmatpush1.bf16.msra.mxu1 %v1582_v15 }
  0x38   : > { %639 = vmatprep.subr.bf16.mxu0 %v1669_v1  ;;  %1542 = vmatprep.subr.bf16.mxu1 %v1669_v1 }
  0x3b   : > { %640 = vmatpush1.bf16.msra.mxu0 %v1583_v16  ;;  %1558 = vmatpush1.bf16.msra.mxu1 %v1583_v16 }
  0x3c   : > { %641 = vmatprep.subr.bf16.mxu0 %v1669_v1  ;;  %1543 = vmatprep.subr.bf16.mxu1 %v1669_v1 }
  0x3f   : > { %642 = vmatpush1.bf16.msra.mxu0 %v1584_v17  ;;  %1559 = vmatpush1.bf16.msra.mxu1 %v1584_v17 }
  0x40   : > { %643 = vmatprep.subr.bf16.mxu0 %v1669_v1  ;;  %1544 = vmatprep.subr.bf16.mxu1 %v1669_v1  ;;  %v1658_v1 = vld [vmem:[%s1727_s28 + $0xc4] ss:$8 sps:$4 sm:$0xff]  }
  0x43   : > { %644 = vmatpush1.bf16.msra.mxu0 %v1585_v18  ;;  %1560 = vmatpush1.bf16.msra.mxu1 %v1585_v18 }
  0x46   : > { %646 = vmatmul.mubr.bf16.vlgmr.msra.gmra.mrb[0].mxu0 %v1586_v19  ;;  %750 = vmatmul.mubr.bf16.vlgmr.msra.gmra.mrb[0].mxu1 %v1589_v20 }
  0x47   : > { %653 = vmatprep.mubr.bf16.mxu0 %v1592_v21  ;;  %757 = vmatprep.mubr.bf16.mxu1 %v1595_v22 }
  0x4e   : > { %654 = vmatmul.mubr.bf16.gmra.mrb[4].mxu0 %v1594_v23  ;;  %758 = vmatmul.mubr.bf16.gmra.mrb[4].mxu1 %v1597_v24 }
  0x4f   : > { %661 = vmatprep.mubr.bf16.mxu0 %v1598_v25  ;;  %765 = vmatprep.mubr.bf16.mxu1 %v1601_v26 }
  0x56   : > { %662 = vmatmul.mubr.bf16.gmra.mrb[8].mxu0 %v1600_v27  ;;  %766 = vmatmul.mubr.bf16.gmra.mrb[8].mxu1 %v1603_v28 }
  0x57   : > { %669 = vmatprep.mubr.bf16.mxu0 %v1604_v29  ;;  %773 = vmatprep.mubr.bf16.mxu1 %v1607_v30 }
  0x5e   : > { %670 = vmatmul.mubr.bf16.gmra.mrb[12].mxu0 %v1606_v31  ;;  %774 = vmatmul.mubr.bf16.gmra.mrb[12].mxu1 %v1609_v32 }
  0x5f   : > { %677 = vmatprep.mubr.bf16.mxu0 %v1610_v33  ;;  %781 = vmatprep.mubr.bf16.mxu1 %v1613_v34 }
  0x66   : > { %678 = vmatmul.mubr.bf16.gmra.mrb[16].mxu0 %v1612_v35  ;;  %782 = vmatmul.mubr.bf16.gmra.mrb[16].mxu1 %v1615_v36 }
  0x67   : > { %685 = vmatprep.mubr.bf16.mxu0 %v1616_v37  ;;  %789 = vmatprep.mubr.bf16.mxu1 %v1619_v38 }
  0x6e   : > { %686 = vmatmul.mubr.bf16.gmra.mrb[20].mxu0 %v1618_v39  ;;  %790 = vmatmul.mubr.bf16.gmra.mrb[20].mxu1 %v1621_v40 }
  0x6f   : > { %693 = vmatprep.mubr.bf16.mxu0 %v1622_v41  ;;  %797 = vmatprep.mubr.bf16.mxu1 %v1625_v42 }
  0x76   : > { %694 = vmatmul.mubr.bf16.gmra.mrb[24].mxu0 %v1624_v43  ;;  %798 = vmatmul.mubr.bf16.gmra.mrb[24].mxu1 %v1627_v44 }
  0x77   : > { %701 = vmatprep.mubr.bf16.mxu0 %v1628_v45  ;;  %805 = vmatprep.mubr.bf16.mxu1 %v1631_v46 }
  0x7e   : > { %702 = vmatmul.mubr.bf16.gmra.mrb[28].mxu0 %v1630_v47  ;;  %806 = vmatmul.mubr.bf16.gmra.mrb[28].mxu1 %v1633_v48 }
  0x7f   : > { %709 = vmatprep.mubr.bf16.mxu0 %v1634_v49  ;;  %813 = vmatprep.mubr.bf16.mxu1 %v1637_v50 }
  0x86   : > { %710 = vmatmul.mubr.bf16.gmra.mrb[32].mxu0 %v1636_v51  ;;  %814 = vmatmul.mubr.bf16.gmra.mrb[32].mxu1 %v1639_v52 }
  0x87   : > { %717 = vmatprep.mubr.bf16.mxu0 %v1640_v53  ;;  %821 = vmatprep.mubr.bf16.mxu1 %v1643_v54 }
  0x8e   : > { %718 = vmatmul.mubr.bf16.gmra.mrb[36].mxu0 %v1642_v55  ;;  %822 = vmatmul.mubr.bf16.gmra.mrb[36].mxu1 %v1645_v56 }
  0x8f   : > { %725 = vmatprep.mubr.bf16.mxu0 %v1646_v57  ;;  %829 = vmatprep.mubr.bf16.mxu1 %v1649_v58 }
  0x96   : > { %726 = vmatmul.mubr.bf16.gmra.mrb[40].mxu0 %v1648_v59  ;;  %830 = vmatmul.mubr.bf16.gmra.mrb[40].mxu1 %v1651_v60 }
  0x97   : > { %733 = vmatprep.mubr.bf16.mxu0 %v1652_v61  ;;  %837 = vmatprep.mubr.bf16.mxu1 %v1655_v62 }
  0x9e   : > { %734 = vmatmul.mubr.bf16.gmra.mrb[44].mxu0 %v1654_v63  ;;  %838 = vmatmul.mubr.bf16.gmra.mrb[44].mxu1 %v1657_v0 }
  0x9f   : > { %741 = vmatprep.mubr.bf16.mxu0 %v1658_v1 }
  0xa6   : > { %742 = vmatmul.mubr.bf16.gmra.mrb[48].mxu0 %v1660_v2 }
 0x119   : > { %v647_v4 = vpop.f32.mrb[0].mxu0  ;;  %v751_v5 = vpop.f32.mrb[0].mxu1 }
 0x11a   : > { %v648_v6 = vadd.f32 %v1839_v3, %v647_v4  ;;  %v649_v7 = vpop.f32.mrb[1].mxu0  ;;  %v752_v8 = vadd.f32 %v1839_v3, %v751_v5  ;;  %v753_v9 = vpop.f32.mrb[1].mxu1 }
 0x11b   : > { %v650_v10 = vpop.f32.mrb[2].mxu0  ;;  %v754_v11 = vpop.f32.mrb[2].mxu1 }
 0x11c   : > { %v651_v12 = vadd.f32 %v1839_v3, %v650_v10  ;;  %v652_v13 = vpop.f32.mrb[3].mxu0  ;;  %v872_v14 = vmax.f32 %v752_v8, 0.0  ;;  %v755_v15 = vadd.f32 %v1839_v3, %v754_v11  ;;  %v756_v16 = vpop.f32.mrb[3].mxu1  ;;  %v846_v17 = vmax.f32 %v648_v6, 0.0 }
 0x11e   : > { %v847_v18 = vmax.f32 %v651_v12, 0.0  ;;  %v873_v19 = vmax.f32 %v755_v15, 0.0 }
 0x120   : > { %v1383_v20 = vpack.c.bf16 %v847_v18, %v846_v17  ;;  %v1448_v21 = vpack.c.bf16 %v873_v19, %v872_v14 }
 0x121   : > { %v655_v22 = vpop.f32.mrb[4].mxu0  ;;  %v759_v23 = vpop.f32.mrb[4].mxu1 }
 0x122   : > { %1384 = vst [vmem:[%s1849_s4] sm:$0xff] %v1383_v20   ;;  %1517 = vst [vmem:[%s1849_s4 + $0x68] sm:$0xff] %v1448_v21   ;;  %v656_v24 = vadd.f32 %v1839_v3, %v655_v22  ;;  %v657_v25 = vpop.f32.mrb[5].mxu0  ;;  %v760_v26 = vadd.f32 %v1839_v3, %v759_v23  ;;  %v761_v27 = vpop.f32.mrb[5].mxu1 }
 0x123   : > { %v658_v28 = vpop.f32.mrb[6].mxu0  ;;  %v762_v29 = vpop.f32.mrb[6].mxu1 }
 0x124   : > { %v659_v30 = vadd.f32 %v1839_v3, %v658_v28  ;;  %v660_v31 = vpop.f32.mrb[7].mxu0  ;;  %v874_v32 = vmax.f32 %v760_v26, 0.0  ;;  %v763_v33 = vadd.f32 %v1839_v3, %v762_v29  ;;  %v764_v34 = vpop.f32.mrb[7].mxu1  ;;  %v848_v35 = vmax.f32 %v656_v24, 0.0 }
 0x126   : > { %v849_v36 = vmax.f32 %v659_v30, 0.0  ;;  %v875_v37 = vmax.f32 %v763_v33, 0.0 }
 0x128   : > { %v1388_v38 = vpack.c.bf16 %v849_v36, %v848_v35  ;;  %v1453_v39 = vpack.c.bf16 %v875_v37, %v874_v32 }
 0x129   : > { %v663_v40 = vpop.f32.mrb[8].mxu0  ;;  %v767_v41 = vpop.f32.mrb[8].mxu1 }
 0x12a   : > { %1505 = vst [vmem:[%s1849_s4 + $0x8] sm:$0xff] %v1388_v38   ;;  %1518 = vst [vmem:[%s1849_s4 + $0x70] sm:$0xff] %v1453_v39   ;;  %v664_v42 = vadd.f32 %v1839_v3, %v663_v40  ;;  %v665_v43 = vpop.f32.mrb[9].mxu0  ;;  %v768_v44 = vadd.f32 %v1839_v3, %v767_v41  ;;  %v769_v45 = vpop.f32.mrb[9].mxu1 }
 0x12b   : > { %v666_v46 = vpop.f32.mrb[10].mxu0  ;;  %v770_v47 = vpop.f32.mrb[10].mxu1 }
 0x12c   : > { %v667_v48 = vadd.f32 %v1839_v3, %v666_v46  ;;  %v668_v49 = vpop.f32.mrb[11].mxu0  ;;  %v876_v50 = vmax.f32 %v768_v44, 0.0  ;;  %v771_v51 = vadd.f32 %v1839_v3, %v770_v47  ;;  %v772_v52 = vpop.f32.mrb[11].mxu1  ;;  %v850_v53 = vmax.f32 %v664_v42, 0.0 }
 0x12e   : > { %v851_v54 = vmax.f32 %v667_v48, 0.0  ;;  %v877_v55 = vmax.f32 %v771_v51, 0.0 }
 0x130   : > { %v1393_v56 = vpack.c.bf16 %v851_v54, %v850_v53  ;;  %v1458_v57 = vpack.c.bf16 %v877_v55, %v876_v50 }
 0x131   : > { %v671_v58 = vpop.f32.mrb[12].mxu0  ;;  %v775_v59 = vpop.f32.mrb[12].mxu1 }
 0x132   : > { %1506 = vst [vmem:[%s1849_s4 + $0x10] sm:$0xff] %v1393_v56   ;;  %1519 = vst [vmem:[%s1849_s4 + $0x78] sm:$0xff] %v1458_v57   ;;  %v672_v60 = vadd.f32 %v1839_v3, %v671_v58  ;;  %v673_v61 = vpop.f32.mrb[13].mxu0  ;;  %v776_v62 = vadd.f32 %v1839_v3, %v775_v59  ;;  %v777_v63 = vpop.f32.mrb[13].mxu1 }
 0x133   : > { %v674_v0 = vpop.f32.mrb[14].mxu0  ;;  %v778_v1 = vpop.f32.mrb[14].mxu1 }
 0x134   : > { %v675_v2 = vadd.f32 %v1839_v3, %v674_v0  ;;  %v676_v4 = vpop.f32.mrb[15].mxu0  ;;  %v878_v5 = vmax.f32 %v776_v62, 0.0  ;;  %v779_v6 = vadd.f32 %v1839_v3, %v778_v1  ;;  %v780_v7 = vpop.f32.mrb[15].mxu1  ;;  %v852_v8 = vmax.f32 %v672_v60, 0.0 }
 0x136   : > { %v853_v9 = vmax.f32 %v675_v2, 0.0  ;;  %v879_v10 = vmax.f32 %v779_v6, 0.0 }
 0x138   : > { %v1398_v11 = vpack.c.bf16 %v853_v9, %v852_v8  ;;  %v1463_v12 = vpack.c.bf16 %v879_v10, %v878_v5 }
 0x139   : > { %v679_v13 = vpop.f32.mrb[16].mxu0  ;;  %v783_v14 = vpop.f32.mrb[16].mxu1 }
 0x13a   : > { %1507 = vst [vmem:[%s1849_s4 + $0x18] sm:$0xff] %v1398_v11   ;;  %1520 = vst [vmem:[%s1849_s4 + $0x80] sm:$0xff] %v1463_v12   ;;  %v680_v15 = vadd.f32 %v1839_v3, %v679_v13  ;;  %v681_v16 = vpop.f32.mrb[17].mxu0  ;;  %v784_v17 = vadd.f32 %v1839_v3, %v783_v14  ;;  %v785_v18 = vpop.f32.mrb[17].mxu1 }
 0x13b   : > { %v682_v19 = vpop.f32.mrb[18].mxu0  ;;  %v786_v20 = vpop.f32.mrb[18].mxu1 }
 0x13c   : > { %v683_v21 = vadd.f32 %v1839_v3, %v682_v19  ;;  %v684_v22 = vpop.f32.mrb[19].mxu0  ;;  %v880_v23 = vmax.f32 %v784_v17, 0.0  ;;  %v787_v24 = vadd.f32 %v1839_v3, %v786_v20  ;;  %v788_v25 = vpop.f32.mrb[19].mxu1  ;;  %v854_v26 = vmax.f32 %v680_v15, 0.0 }
 0x13e   : > { %v855_v27 = vmax.f32 %v683_v21, 0.0  ;;  %v881_v28 = vmax.f32 %v787_v24, 0.0 }
 0x140   : > { %v1403_v29 = vpack.c.bf16 %v855_v27, %v854_v26  ;;  %v1468_v30 = vpack.c.bf16 %v881_v28, %v880_v23 }
 0x141   : > { %v687_v31 = vpop.f32.mrb[20].mxu0  ;;  %v791_v32 = vpop.f32.mrb[20].mxu1 }
 0x142   : > { %1508 = vst [vmem:[%s1849_s4 + $0x20] sm:$0xff] %v1403_v29   ;;  %1521 = vst [vmem:[%s1849_s4 + $0x88] sm:$0xff] %v1468_v30   ;;  %v688_v33 = vadd.f32 %v1839_v3, %v687_v31  ;;  %v689_v34 = vpop.f32.mrb[21].mxu0  ;;  %v792_v35 = vadd.f32 %v1839_v3, %v791_v32  ;;  %v793_v36 = vpop.f32.mrb[21].mxu1 }
 0x143   : > { %v690_v37 = vpop.f32.mrb[22].mxu0  ;;  %v794_v38 = vpop.f32.mrb[22].mxu1 }
 0x144   : > { %v691_v39 = vadd.f32 %v1839_v3, %v690_v37  ;;  %v692_v40 = vpop.f32.mrb[23].mxu0  ;;  %v882_v41 = vmax.f32 %v792_v35, 0.0  ;;  %v795_v42 = vadd.f32 %v1839_v3, %v794_v38  ;;  %v796_v43 = vpop.f32.mrb[23].mxu1  ;;  %v856_v44 = vmax.f32 %v688_v33, 0.0 }
 0x146   : > { %v857_v45 = vmax.f32 %v691_v39, 0.0  ;;  %v883_v46 = vmax.f32 %v795_v42, 0.0 }
 0x148   : > { %v1408_v47 = vpack.c.bf16 %v857_v45, %v856_v44  ;;  %v1473_v48 = vpack.c.bf16 %v883_v46, %v882_v41 }
 0x149   : > { %v695_v49 = vpop.f32.mrb[24].mxu0  ;;  %v799_v50 = vpop.f32.mrb[24].mxu1 }
 0x14a   : > { %1509 = vst [vmem:[%s1849_s4 + $0x28] sm:$0xff] %v1408_v47   ;;  %1522 = vst [vmem:[%s1849_s4 + $0x90] sm:$0xff] %v1473_v48   ;;  %v696_v51 = vadd.f32 %v1839_v3, %v695_v49  ;;  %v697_v52 = vpop.f32.mrb[25].mxu0  ;;  %v800_v53 = vadd.f32 %v1839_v3, %v799_v50  ;;  %v801_v54 = vpop.f32.mrb[25].mxu1 }
 0x14b   : > { %v698_v55 = vpop.f32.mrb[26].mxu0  ;;  %v802_v56 = vpop.f32.mrb[26].mxu1 }
 0x14c   : > { %v699_v57 = vadd.f32 %v1839_v3, %v698_v55  ;;  %v700_v58 = vpop.f32.mrb[27].mxu0  ;;  %v884_v59 = vmax.f32 %v800_v53, 0.0  ;;  %v803_v60 = vadd.f32 %v1839_v3, %v802_v56  ;;  %v804_v61 = vpop.f32.mrb[27].mxu1  ;;  %v858_v62 = vmax.f32 %v696_v51, 0.0 }
 0x14e   : > { %v859_v63 = vmax.f32 %v699_v57, 0.0  ;;  %v885_v0 = vmax.f32 %v803_v60, 0.0 }
 0x150   : > { %v1413_v1 = vpack.c.bf16 %v859_v63, %v858_v62  ;;  %v1478_v2 = vpack.c.bf16 %v885_v0, %v884_v59 }
 0x151   : > { %v703_v4 = vpop.f32.mrb[28].mxu0  ;;  %v807_v5 = vpop.f32.mrb[28].mxu1 }
 0x152   : > { %1510 = vst [vmem:[%s1849_s4 + $0x30] sm:$0xff] %v1413_v1   ;;  %1523 = vst [vmem:[%s1849_s4 + $0x98] sm:$0xff] %v1478_v2   ;;  %v704_v6 = vadd.f32 %v1839_v3, %v703_v4  ;;  %v705_v7 = vpop.f32.mrb[29].mxu0  ;;  %v808_v8 = vadd.f32 %v1839_v3, %v807_v5  ;;  %v809_v9 = vpop.f32.mrb[29].mxu1 }
 0x153   : > { %v706_v10 = vpop.f32.mrb[30].mxu0  ;;  %v810_v11 = vpop.f32.mrb[30].mxu1 }
 0x154   : > { %v707_v12 = vadd.f32 %v1839_v3, %v706_v10  ;;  %v708_v13 = vpop.f32.mrb[31].mxu0  ;;  %v886_v14 = vmax.f32 %v808_v8, 0.0  ;;  %v811_v15 = vadd.f32 %v1839_v3, %v810_v11  ;;  %v812_v16 = vpop.f32.mrb[31].mxu1  ;;  %v860_v17 = vmax.f32 %v704_v6, 0.0 }
 0x156   : > { %v861_v18 = vmax.f32 %v707_v12, 0.0  ;;  %v887_v19 = vmax.f32 %v811_v15, 0.0 }
 0x158   : > { %v1418_v20 = vpack.c.bf16 %v861_v18, %v860_v17  ;;  %v1483_v21 = vpack.c.bf16 %v887_v19, %v886_v14 }
 0x159   : > { %v711_v22 = vpop.f32.mrb[32].mxu0  ;;  %v815_v23 = vpop.f32.mrb[32].mxu1 }
 0x15a   : > { %1511 = vst [vmem:[%s1849_s4 + $0x38] sm:$0xff] %v1418_v20   ;;  %1524 = vst [vmem:[%s1849_s4 + $0xa0] sm:$0xff] %v1483_v21   ;;  %v712_v24 = vadd.f32 %v1839_v3, %v711_v22  ;;  %v713_v25 = vpop.f32.mrb[33].mxu0  ;;  %v816_v26 = vadd.f32 %v1839_v3, %v815_v23  ;;  %v817_v27 = vpop.f32.mrb[33].mxu1 }
 0x15b   : > { %v714_v28 = vpop.f32.mrb[34].mxu0  ;;  %v818_v29 = vpop.f32.mrb[34].mxu1 }
 0x15c   : > { %v715_v30 = vadd.f32 %v1839_v3, %v714_v28  ;;  %v716_v31 = vpop.f32.mrb[35].mxu0  ;;  %v888_v32 = vmax.f32 %v816_v26, 0.0  ;;  %v819_v33 = vadd.f32 %v1839_v3, %v818_v29  ;;  %v820_v34 = vpop.f32.mrb[35].mxu1  ;;  %v862_v35 = vmax.f32 %v712_v24, 0.0 }
 0x15e   : > { %v863_v36 = vmax.f32 %v715_v30, 0.0  ;;  %v889_v37 = vmax.f32 %v819_v33, 0.0 }
 0x160   : > { %v1423_v38 = vpack.c.bf16 %v863_v36, %v862_v35  ;;  %v1488_v39 = vpack.c.bf16 %v889_v37, %v888_v32 }
 0x161   : > { %v719_v40 = vpop.f32.mrb[36].mxu0  ;;  %v823_v41 = vpop.f32.mrb[36].mxu1 }
 0x162   : > { %1512 = vst [vmem:[%s1849_s4 + $0x40] sm:$0xff] %v1423_v38   ;;  %1525 = vst [vmem:[%s1849_s4 + $0xa8] sm:$0xff] %v1488_v39   ;;  %v720_v42 = vadd.f32 %v1839_v3, %v719_v40  ;;  %v721_v43 = vpop.f32.mrb[37].mxu0  ;;  %v824_v44 = vadd.f32 %v1839_v3, %v823_v41  ;;  %v825_v45 = vpop.f32.mrb[37].mxu1 }
 0x163   : > { %v722_v46 = vpop.f32.mrb[38].mxu0  ;;  %v826_v47 = vpop.f32.mrb[38].mxu1 }
 0x164   : > { %v723_v48 = vadd.f32 %v1839_v3, %v722_v46  ;;  %v724_v49 = vpop.f32.mrb[39].mxu0  ;;  %v890_v50 = vmax.f32 %v824_v44, 0.0  ;;  %v827_v51 = vadd.f32 %v1839_v3, %v826_v47  ;;  %v828_v52 = vpop.f32.mrb[39].mxu1  ;;  %v864_v53 = vmax.f32 %v720_v42, 0.0 }
 0x166   : > { %v865_v54 = vmax.f32 %v723_v48, 0.0  ;;  %v891_v55 = vmax.f32 %v827_v51, 0.0 }
 0x168   : > { %v1428_v56 = vpack.c.bf16 %v865_v54, %v864_v53  ;;  %v1493_v57 = vpack.c.bf16 %v891_v55, %v890_v50 }
 0x169   : > { %v727_v58 = vpop.f32.mrb[40].mxu0  ;;  %v831_v59 = vpop.f32.mrb[40].mxu1 }
 0x16a   : > { %1513 = vst [vmem:[%s1849_s4 + $0x48] sm:$0xff] %v1428_v56   ;;  %1526 = vst [vmem:[%s1849_s4 + $0xb0] sm:$0xff] %v1493_v57   ;;  %v728_v60 = vadd.f32 %v1839_v3, %v727_v58  ;;  %v729_v61 = vpop.f32.mrb[41].mxu0  ;;  %v832_v62 = vadd.f32 %v1839_v3, %v831_v59  ;;  %v833_v63 = vpop.f32.mrb[41].mxu1 }
 0x16b   : > { %v730_v0 = vpop.f32.mrb[42].mxu0  ;;  %v834_v1 = vpop.f32.mrb[42].mxu1 }
 0x16c   : > { %v731_v2 = vadd.f32 %v1839_v3, %v730_v0  ;;  %v732_v4 = vpop.f32.mrb[43].mxu0  ;;  %v892_v5 = vmax.f32 %v832_v62, 0.0  ;;  %v835_v6 = vadd.f32 %v1839_v3, %v834_v1  ;;  %v836_v7 = vpop.f32.mrb[43].mxu1  ;;  %v866_v8 = vmax.f32 %v728_v60, 0.0 }
 0x16e   : > { %v867_v9 = vmax.f32 %v731_v2, 0.0  ;;  %v893_v10 = vmax.f32 %v835_v6, 0.0 }
 0x170   : > { %v1433_v11 = vpack.c.bf16 %v867_v9, %v866_v8  ;;  %v1498_v12 = vpack.c.bf16 %v893_v10, %v892_v5 }
 0x171   : > { %v735_v13 = vpop.f32.mrb[44].mxu0  ;;  %v839_v14 = vpop.f32.mrb[44].mxu1 }
 0x172   : > { %1514 = vst [vmem:[%s1849_s4 + $0x50] sm:$0xff] %v1433_v11   ;;  %1527 = vst [vmem:[%s1849_s4 + $0xb8] sm:$0xff] %v1498_v12   ;;  %v736_v15 = vadd.f32 %v1839_v3, %v735_v13  ;;  %v737_v16 = vpop.f32.mrb[45].mxu0  ;;  %v840_v17 = vadd.f32 %v1839_v3, %v839_v14  ;;  %v841_v18 = vpop.f32.mrb[45].mxu1 }
 0x173   : > { %v738_v19 = vpop.f32.mrb[46].mxu0  ;;  %v842_v20 = vpop.f32.mrb[46].mxu1 }
 0x174   : > { %v739_v21 = vadd.f32 %v1839_v3, %v738_v19  ;;  %v740_v22 = vpop.f32.mrb[47].mxu0  ;;  %v894_v23 = vmax.f32 %v840_v17, 0.0  ;;  %v843_v24 = vadd.f32 %v1839_v3, %v842_v20  ;;  %v844_v25 = vpop.f32.mrb[47].mxu1  ;;  %v868_v26 = vmax.f32 %v736_v15, 0.0 }
 0x176   : > { %v869_v27 = vmax.f32 %v739_v21, 0.0  ;;  %v895_v28 = vmax.f32 %v843_v24, 0.0 }
 0x178   : > { %v1438_v29 = vpack.c.bf16 %v869_v27, %v868_v26  ;;  %v1503_v30 = vpack.c.bf16 %v895_v28, %v894_v23 }
 0x179   : > { %v743_v31 = vpop.f32.mrb[48].mxu0 }
 0x17a   : > { %1515 = vst [vmem:[%s1849_s4 + $0x58] sm:$0xff] %v1438_v29   ;;  %1528 = vst [vmem:[%s1849_s4 + $0xc0] sm:$0xff] %v1503_v30   ;;  %v744_v32 = vadd.f32 %v1839_v3, %v743_v31  ;;  %v745_v33 = vpop.f32.mrb[49].mxu0 }
 0x17b   : > { %v746_v34 = vpop.f32.mrb[50].mxu0 }
 0x17c   : > { %v747_v35 = vadd.f32 %v1839_v3, %v746_v34  ;;  %v748_v36 = vpop.f32.mrb[51].mxu0  ;;  %v870_v37 = vmax.f32 %v744_v32, 0.0 }
 0x17e   : > { %v871_v38 = vmax.f32 %v747_v35, 0.0 }
 0x180   : > { %v1443_v39 = vpack.c.bf16 %v871_v38, %v870_v37 }
 0x182   : > { %1516 = vst [vmem:[%s1849_s4 + $0x60] sm:$0xff] %v1443_v39  }
 0x183 PF: > { %s13_s12 = sadd.s32 1, %s1667_s12  }
 0x184   : > { %p10_p4 = scmp.ge.s32.totalorder %s13_s12, 4  }
 0x186   :  { %12 = sbr.rel (!%p10_p4) target bundleno = 1 (0x1), region = 62 }

// kernel: convolutional_qnet_forward.5
= control target key start
LH: loop header
LB: loop body
LE: loop exit
PB: predicated region body
PF: predicated region fallthrough
CT: control target
= control target key end

     0   :  { %s1583_s12 = smov 0   ;;  %s1585_s13 = smov 0   ;;  %s1824_s0 = inlined_call_operand.vmem [shape: bf16[162,512], index: 0, kind: input, shape index: {}]   ;;  %s1825_s1 = inlined_call_operand.vmem [shape: bf16[512,128], index: 1, kind: input, shape index: {}]   ;;  %s1826_s2 = inlined_call_operand.vmem [shape: f32[1,128], index: 2, kind: input, shape index: {}]   ;;  %s1827_s3 = inlined_call_operand.vmem [shape: bf16[162,128], index: 3, kind: output, shape index: {}]  }
   0x1   :  { %s1587_s14 = smov 0  }
   0x2 LB: > { %s1596_s15 = sadd.s32 4294967295, %s1529_s14   ;;  %s1598_s16 = sadd.s32 1, %s1529_s14   ;;  %s1529_s14 = sphi %s1587_s14, %s1834_s14   ;;  %s1525_s13 = sphi %s1585_s13, %s1833_s13   ;;  %s1521_s12 = sphi %s1583_s12, %s1832_s12  }
   0x3   : > { %s85_s17 = ssub.s32 %s1529_s14, %s1598_s16  ;;  %s88_s18 = sadd.s32 1, %s1525_s13 }
   0x4   : > { %p86_p0 = scmp.eq.s32.totalorder %s85_s17, 0  ;;  %p98_p1 = scmp.ne.s32.totalorder %s1525_s13, %s1521_s12 }
   0x5   : > { %p99_p2 = scmp.eq.s32.totalorder %s1596_s15, 1  ;;  %p1086_p3 = scmp.ge.s32.totalorder %s1529_s14, 1 }
   0x6   : > { %s1606_s19 = scalar_select %p86_p0, %s1525_s13, %s88_s18  }
   0x7   : > { %p1608_p4 = por %p99_p2, %p98_p1  ;;  %p149_p5 = scmp.lt.s32.totalorder %s1529_s14, 3 }
   0x9   : > { %p150_p6 = pnand %p1086_p3, %p149_p5 }
   0xa   : > { %v1405_v0 = vld [vmem:[%s1825_s1 + $0x40] sm:$0xff] (!%p150_p6)   ;;  %v1409_v4 = vld [vmem:[%s1825_s1 + $0x48] sm:$0xff] (!%p150_p6)   ;;  %v1413_v8 = vld [vmem:[%s1825_s1 + $0x50] sm:$0xff] (!%p150_p6)   ;;  %s1658_s30 = smul.u32 (!%p150_p6), 11, %s1596_s15  ;;  %s175_s5 = sand.u32 (!%p150_p6), 1, %s1521_s12  }
   0xb   : > { %153 = sbr.rel (%p150_p6) target bundleno = 377 (0x179), region = 32  ;;  %v1406_v1 = vld [vmem:[%s1825_s1 + $0xc0] sm:$0xff] (!%p150_p6)   ;;  %1211 = vmatprep.subr.bf16.mxu0 (!%p150_p6), %v1405_v0  ;;  %v1410_v5 = vld [vmem:[%s1825_s1 + $0xc8] sm:$0xff] (!%p150_p6)   ;;  %v1414_v9 = vld [vmem:[%s1825_s1 + $0xd0] sm:$0xff] (!%p150_p6)  }
   0xc   : > { %v1407_v2 = vld [vmem:[%s1825_s1] sm:$0xff] (!%p150_p6)   ;;  %1263 = vmatprep.subr.bf16.mxu1 (!%p150_p6), %v1406_v1  ;;  %v1411_v6 = vld [vmem:[%s1825_s1 + $0x8] sm:$0xff] (!%p150_p6)   ;;  %v1415_v10 = vld [vmem:[%s1825_s1 + $0x10] sm:$0xff] (!%p150_p6)   ;;  %p184_p7 = scmp.lt.s32.totalorder (!%p150_p6), %s1658_s30, 20  ;;  %s1315_s6 = smul.u32 (!%p150_p6), 44, %s175_s5 }
   0xd   : > { %v1408_v3 = vld [vmem:[%s1825_s1 + $0x80] sm:$0xff] (!%p150_p6)   ;;  %1212 = vmatpush3.bf16.msra.mxu0 (!%p150_p6), %v1407_v2  ;;  %v1412_v7 = vld [vmem:[%s1825_s1 + $0x88] sm:$0xff] (!%p150_p6)   ;;  %v1416_v11 = vld [vmem:[%s1825_s1 + $0x90] sm:$0xff] (!%p150_p6)  }
   0xe   : > { %1264 = vmatpush3.bf16.msra.mxu1 (!%p150_p6), %v1408_v3  ;;  %1213 = vmatprep.subr.bf16.mxu0 (!%p150_p6), %v1409_v4  ;;  %v1417_v12 = vld [vmem:[%s1825_s1 + $0x58] sm:$0xff] (!%p150_p6)   ;;  %v1421_v16 = vld [vmem:[%s1825_s1 + $0x60] sm:$0xff] (!%p150_p6)   ;;  %v1425_v20 = vld [vmem:[%s1825_s1 + $0x68] sm:$0xff] (!%p150_p6)   ;;  %s1749_s12 = scalar_lea.vmem (!%p150_p6), [#allocation2], %s1315_s6  }
   0xf   : > { %1265 = vmatprep.subr.bf16.mxu1 (!%p150_p6), %v1410_v5  ;;  %v1418_v13 = vld [vmem:[%s1825_s1 + $0xd8] sm:$0xff] (!%p150_p6)   ;;  %v1422_v17 = vld [vmem:[%s1825_s1 + $0xe0] sm:$0xff] (!%p150_p6)   ;;  %v1426_v21 = vld [vmem:[%s1825_s1 + $0xe8] sm:$0xff] (!%p150_p6)  }
  0x10   : > { %v1419_v14 = vld [vmem:[%s1825_s1 + $0x18] sm:$0xff] (!%p150_p6)   ;;  %v1423_v18 = vld [vmem:[%s1825_s1 + $0x20] sm:$0xff] (!%p150_p6)   ;;  %v1427_v22 = vld [vmem:[%s1825_s1 + $0x28] sm:$0xff] (!%p150_p6)  }
  0x11   : > { %1214 = vmatpush3.bf16.msra.mxu0 (!%p150_p6), %v1411_v6  ;;  %v1420_v15 = vld [vmem:[%s1825_s1 + $0x98] sm:$0xff] (!%p150_p6)   ;;  %v1424_v19 = vld [vmem:[%s1825_s1 + $0xa0] sm:$0xff] (!%p150_p6)   ;;  %v1428_v23 = vld [vmem:[%s1825_s1 + $0xa8] sm:$0xff] (!%p150_p6)  }
  0x12   : > { %1266 = vmatpush3.bf16.msra.mxu1 %v1412_v7  ;;  %1215 = vmatprep.subr.bf16.mxu0 %v1413_v8  ;;  %s185_s26 = scalar_select %p184_p7, %s1658_s30, 20  ;;  %v1429_v24 = vld [vmem:[%s1825_s1 + $0x70] sm:$0xff]   ;;  %v1433_v28 = vld [vmem:[%s1825_s1 + $0x78] sm:$0xff]   ;;  %v1743_v60 = vld [vmem:[%s1826_s2] ss:$0 sm:$0xff] }
  0x13   : > { %1267 = vmatprep.subr.bf16.mxu1 %v1414_v9  ;;  %v1430_v25 = vld [vmem:[%s1825_s1 + $0xf0] sm:$0xff]   ;;  %v1434_v29 = vld [vmem:[%s1825_s1 + $0xf8] sm:$0xff]   ;;  %s835_s7 = ssub.s32 (%p1608_p4), 21, %s1658_s30  ;;  %s1181_s8 = smul.u32 (%p1608_p4), 44, %s1596_s15 }
  0x14   : > { %v1431_v26 = vld [vmem:[%s1825_s1 + $0x30] sm:$0xff]   ;;  %s1169_s9 = sshll.u32 %s185_s26, 4  ;;  %v1435_v30 = vld [vmem:[%s1825_s1 + $0x38] sm:$0xff]   ;;  %p836_p8 = scmp.lt.s32.totalorder (%p1608_p4), %s835_s7, 11 }
  0x15   : > { %1216 = vmatpush3.bf16.msra.mxu0 %v1415_v10  ;;  %v1432_v27 = vld [vmem:[%s1825_s1 + $0xb0] sm:$0xff]   ;;  %s1710_s24 = scalar_lea.vmem %s1824_s0, %s1169_s9  ;;  %v1436_v31 = vld [vmem:[%s1825_s1 + $0xb8] sm:$0xff]   ;;  %s1772_s11 = scalar_lea.vmem (%p1608_p4), %s1827_s3, %s1181_s8  }
  0x16   : > { %1268 = vmatpush3.bf16.msra.mxu1 %v1416_v11  ;;  %1217 = vmatprep.subr.bf16.mxu0 %v1417_v12  ;;  %v1437_v32 = vld [vmem:[%s1710_s24] ss:$16 sps:$4 sm:$0xff]   ;;  %v1439_v33 = vld [vmem:[%s1710_s24 + $0x4] ss:$16 sps:$4 sm:$0xff]   ;;  %v1440_v34 = vld [vmem:[%s1710_s24 + $0x8] ss:$16 sps:$4 sm:$0xff]  }
  0x17   : > { %1269 = vmatprep.subr.bf16.mxu1 %v1418_v13  ;;  %v1442_v35 = vld [vmem:[%s1710_s24 + $0xc] ss:$16 sps:$4 sm:$0xff]   ;;  %632 = vmatprep.mubr.bf16.mxu0 %v1439_v33  ;;  %v1443_v36 = vld [vmem:[%s1710_s24 + $0x24] ss:$16 sps:$4 sm:$0xff]   ;;  %v1447_v38 = vld [vmem:[%s1710_s24 + $0x20] ss:$16 sps:$4 sm:$0xff]  }
  0x18   : > { %712 = vmatprep.mubr.bf16.mxu1 %v1442_v35  ;;  %v1445_v37 = vld [vmem:[%s1710_s24 + $0x2c] ss:$16 sps:$4 sm:$0xff]   ;;  %v1448_v39 = vld [vmem:[%s1710_s24 + $0x28] ss:$16 sps:$4 sm:$0xff]   ;;  %v1449_v40 = vld [vmem:[%s1710_s24 + $0x44] ss:$16 sps:$4 sm:$0xff]  }
  0x19   : > { %1218 = vmatpush3.bf16.msra.mxu0 %v1419_v14  ;;  %v1451_v41 = vld [vmem:[%s1710_s24 + $0x4c] ss:$16 sps:$4 sm:$0xff]   ;;  %v1453_v42 = vld [vmem:[%s1710_s24 + $0x40] ss:$16 sps:$4 sm:$0xff]   ;;  %v1454_v43 = vld [vmem:[%s1710_s24 + $0x48] ss:$16 sps:$4 sm:$0xff]  }
  0x1a   : > { %1270 = vmatpush3.bf16.msra.mxu1 %v1420_v15  ;;  %1219 = vmatprep.subr.bf16.mxu0 %v1421_v16  ;;  %v1455_v44 = vld [vmem:[%s1710_s24 + $0x64] ss:$16 sps:$4 sm:$0xff]   ;;  %v1457_v45 = vld [vmem:[%s1710_s24 + $0x6c] ss:$16 sps:$4 sm:$0xff]   ;;  %v1459_v46 = vld [vmem:[%s1710_s24 + $0x60] ss:$16 sps:$4 sm:$0xff]  }
  0x1b   : > { %1271 = vmatprep.subr.bf16.mxu1 %v1422_v17  ;;  %v1460_v47 = vld [vmem:[%s1710_s24 + $0x68] ss:$16 sps:$4 sm:$0xff]   ;;  %v1461_v48 = vld [vmem:[%s1710_s24 + $0x84] ss:$16 sps:$4 sm:$0xff]   ;;  %v1463_v49 = vld [vmem:[%s1710_s24 + $0x8c] ss:$16 sps:$4 sm:$0xff]  }
  0x1c   : > { %v221_v50 = vld [vmem:[%s1710_s24 + $0xa0] sm:$0xff]  ;;  %v222_v51 = vld [vmem:[%s1710_s24 + $0xa8] sm:$0xff] }
  0x1d   : > { %1220 = vmatpush3.bf16.msra.mxu0 %v1423_v18  ;;  %v1465_v52 = vld [vmem:[%s1710_s24 + $0x80] ss:$16 sps:$4 sm:$0xff]   ;;  %v1466_v53 = vld [vmem:[%s1710_s24 + $0x88] ss:$16 sps:$4 sm:$0xff]   ;;  %v1111_v54 = vcombine.high %v221_v50, %v221_v50  ;;  %v1113_v55 = vcombine.high %v222_v51, %v222_v51  ;;  %v1110_v56 = vcombine.low %v221_v50, %v221_v50  ;;  %v1112_v57 = vcombine.low %v222_v51, %v222_v51 }
  0x1e   : > { %1272 = vmatpush3.bf16.msra.mxu1 %v1424_v19  ;;  %1221 = vmatprep.subr.bf16.mxu0 %v1425_v20 }
  0x1f   : > { %1273 = vmatprep.subr.bf16.mxu1 %v1426_v21 }
  0x21   : > { %1222 = vmatpush3.bf16.msra.mxu0 %v1427_v22 }
  0x22   : > { %1274 = vmatpush3.bf16.msra.mxu1 %v1428_v23  ;;  %1223 = vmatprep.subr.bf16.mxu0 %v1429_v24 }
  0x23   : > { %1275 = vmatprep.subr.bf16.mxu1 %v1430_v25 }
  0x25   : > { %1224 = vmatpush3.bf16.msra.mxu0 %v1431_v26 }
  0x26   : > { %1276 = vmatpush3.bf16.msra.mxu1 %v1432_v27  ;;  %1225 = vmatprep.subr.bf16.mxu0 %v1433_v28 }
  0x27   : > { %1277 = vmatprep.subr.bf16.mxu1 %v1434_v29 }
  0x29   : > { %1226 = vmatpush3.bf16.msra.mxu0 %v1435_v30 }
  0x2a   : > { %1278 = vmatpush3.bf16.msra.mxu1 %v1436_v31 }
  0x2c   : > { %633 = vmatmul.mubr.bf16.vlgmr.msra.gmra.mrb[0].mxu0 %v1437_v32 }
  0x2d   : > { %713 = vmatmul.mubr.bf16.vlgmr.msra.gmra.mrb[0].mxu1 %v1440_v34  ;;  %640 = vmatprep.mubr.bf16.mxu0 %v1443_v36 }
  0x2e   : > { %720 = vmatprep.mubr.bf16.mxu1 %v1445_v37 }
  0x34   : > { %641 = vmatmul.mubr.bf16.gmra.mrb[4].mxu0 %v1447_v38 }
  0x35   : > { %721 = vmatmul.mubr.bf16.gmra.mrb[4].mxu1 %v1448_v39  ;;  %648 = vmatprep.mubr.bf16.mxu0 %v1449_v40 }
  0x36   : > { %728 = vmatprep.mubr.bf16.mxu1 %v1451_v41 }
  0x3c   : > { %649 = vmatmul.mubr.bf16.gmra.mrb[8].mxu0 %v1453_v42 }
  0x3d   : > { %729 = vmatmul.mubr.bf16.gmra.mrb[8].mxu1 %v1454_v43  ;;  %656 = vmatprep.mubr.bf16.mxu0 %v1455_v44 }
  0x3e   : > { %736 = vmatprep.mubr.bf16.mxu1 %v1457_v45 }
  0x44   : > { %657 = vmatmul.mubr.bf16.gmra.mrb[12].mxu0 %v1459_v46 }
  0x45   : > { %737 = vmatmul.mubr.bf16.gmra.mrb[12].mxu1 %v1460_v47  ;;  %664 = vmatprep.mubr.bf16.mxu0 %v1461_v48 }
  0x46   : > { %744 = vmatprep.mubr.bf16.mxu1 %v1463_v49 }
  0x4c   : > { %665 = vmatmul.mubr.bf16.gmra.mrb[16].mxu0 %v1465_v52 }
  0x4d   : > { %745 = vmatmul.mubr.bf16.gmra.mrb[16].mxu1 %v1466_v53  ;;  %672 = vmatprep.mubr.bf16.mxu0 %v1111_v54 }
  0x4e   : > { %752 = vmatprep.mubr.bf16.mxu1 %v1113_v55 }
  0x54   : > { %673 = vmatmul.mubr.bf16.gmra.mrb[20].mxu0 %v1110_v56 }
  0x55   : > { %753 = vmatmul.mubr.bf16.gmra.mrb[20].mxu1 %v1112_v57 }
  0xff   : > { %v1227_v58 = vpop.f32.mrb[0].mxu0 }
 0x100   : > { %v1279_v59 = vpop.f32.mrb[0].mxu1  ;;  %v1228_v61 = vpop.f32.mrb[1].mxu0 }
 0x101   : > { %v1229_v62 = vadd.f32 %v1228_v61, %v1227_v58  ;;  %v1280_v63 = vpop.f32.mrb[1].mxu1  ;;  %v1230_v0 = vpop.f32.mrb[2].mxu0 }
 0x102   : > { %v1281_v1 = vadd.f32 %v1280_v63, %v1279_v59  ;;  %v1282_v2 = vpop.f32.mrb[2].mxu1  ;;  %v1231_v3 = vpop.f32.mrb[3].mxu0 }
 0x103   : > { %v635_v4 = vadd.f32 %v1229_v62, %v1743_v60  ;;  %v1232_v5 = vadd.f32 %v1231_v3, %v1230_v0  ;;  %v1283_v6 = vpop.f32.mrb[3].mxu1 }
 0x104   : > { %v1284_v7 = vadd.f32 %v1283_v6, %v1282_v2 }
 0x105   : > { %v715_v8 = vadd.f32 %v1281_v1, %v635_v4  ;;  %v638_v9 = vadd.f32 %v1232_v5, %v1743_v60 }
 0x107   : > { %v718_v10 = vadd.f32 %v1284_v7, %v638_v9  ;;  %v1233_v11 = vpop.f32.mrb[4].mxu0  ;;  %v760_v14 = vmax.f32 %v715_v8, 0.0 }
 0x108   : > { %v1285_v12 = vpop.f32.mrb[4].mxu1  ;;  %v1234_v13 = vpop.f32.mrb[5].mxu0 }
 0x109   : > { %v761_v15 = vmax.f32 %v718_v10, 0.0  ;;  %v1235_v16 = vadd.f32 %v1234_v13, %v1233_v11  ;;  %v1286_v17 = vpop.f32.mrb[5].mxu1  ;;  %v1236_v18 = vpop.f32.mrb[6].mxu0 }
 0x10a   : > { %v1287_v19 = vadd.f32 %v1286_v17, %v1285_v12  ;;  %v1288_v20 = vpop.f32.mrb[6].mxu1  ;;  %v1237_v21 = vpop.f32.mrb[7].mxu0 }
 0x10b   : > { %v1185_v22 = vpack.c.bf16 %v761_v15, %v760_v14  ;;  %v643_v23 = vadd.f32 %v1235_v16, %v1743_v60  ;;  %v1238_v24 = vadd.f32 %v1237_v21, %v1236_v18  ;;  %v1289_v25 = vpop.f32.mrb[7].mxu1 }
 0x10c   : > { %v1290_v26 = vadd.f32 %v1289_v25, %v1288_v20 }
 0x10d   : > { %1186 = vst [vmem:[%s1749_s12] sm:$0xff] %v1185_v22   ;;  %v723_v27 = vadd.f32 %v1287_v19, %v643_v23  ;;  %v646_v28 = vadd.f32 %v1238_v24, %v1743_v60 }
 0x10f   : > { %v726_v29 = vadd.f32 %v1290_v26, %v646_v28  ;;  %v1239_v30 = vpop.f32.mrb[8].mxu0  ;;  %v762_v33 = vmax.f32 %v723_v27, 0.0 }
 0x110   : > { %v1291_v31 = vpop.f32.mrb[8].mxu1  ;;  %v1240_v32 = vpop.f32.mrb[9].mxu0 }
 0x111   : > { %v763_v34 = vmax.f32 %v726_v29, 0.0  ;;  %v1241_v35 = vadd.f32 %v1240_v32, %v1239_v30  ;;  %v1292_v36 = vpop.f32.mrb[9].mxu1  ;;  %v1242_v37 = vpop.f32.mrb[10].mxu0 }
 0x112   : > { %v1293_v38 = vadd.f32 %v1292_v36, %v1291_v31  ;;  %v1294_v39 = vpop.f32.mrb[10].mxu1  ;;  %v1243_v40 = vpop.f32.mrb[11].mxu0 }
 0x113   : > { %v1190_v41 = vpack.c.bf16 %v763_v34, %v762_v33  ;;  %v651_v42 = vadd.f32 %v1241_v35, %v1743_v60  ;;  %v1244_v43 = vadd.f32 %v1243_v40, %v1242_v37  ;;  %v1295_v44 = vpop.f32.mrb[11].mxu1 }
 0x114   : > { %v1296_v45 = vadd.f32 %v1295_v44, %v1294_v39 }
 0x115   : > { %1207 = vst [vmem:[%s1749_s12 + $0x8] sm:$0xff] %v1190_v41   ;;  %v731_v46 = vadd.f32 %v1293_v38, %v651_v42  ;;  %v654_v47 = vadd.f32 %v1244_v43, %v1743_v60 }
 0x117   : > { %v734_v48 = vadd.f32 %v1296_v45, %v654_v47  ;;  %v1245_v49 = vpop.f32.mrb[12].mxu0  ;;  %v764_v52 = vmax.f32 %v731_v46, 0.0 }
 0x118   : > { %v1297_v50 = vpop.f32.mrb[12].mxu1  ;;  %v1246_v51 = vpop.f32.mrb[13].mxu0 }
 0x119   : > { %v765_v53 = vmax.f32 %v734_v48, 0.0  ;;  %v1247_v54 = vadd.f32 %v1246_v51, %v1245_v49  ;;  %v1298_v55 = vpop.f32.mrb[13].mxu1  ;;  %v1248_v56 = vpop.f32.mrb[14].mxu0 }
 0x11a   : > { %v1299_v57 = vadd.f32 %v1298_v55, %v1297_v50  ;;  %v1300_v58 = vpop.f32.mrb[14].mxu1  ;;  %v1249_v59 = vpop.f32.mrb[15].mxu0 }
 0x11b   : > { %v1195_v61 = vpack.c.bf16 %v765_v53, %v764_v52  ;;  %v659_v62 = vadd.f32 %v1247_v54, %v1743_v60  ;;  %v1250_v63 = vadd.f32 %v1249_v59, %v1248_v56  ;;  %v1301_v0 = vpop.f32.mrb[15].mxu1 }
 0x11c   : > { %v1302_v1 = vadd.f32 %v1301_v0, %v1300_v58 }
 0x11d   : > { %1208 = vst [vmem:[%s1749_s12 + $0x10] sm:$0xff] %v1195_v61   ;;  %v739_v2 = vadd.f32 %v1299_v57, %v659_v62  ;;  %v662_v3 = vadd.f32 %v1250_v63, %v1743_v60 }
 0x11f   : > { %v742_v4 = vadd.f32 %v1302_v1, %v662_v3  ;;  %v1251_v5 = vpop.f32.mrb[16].mxu0  ;;  %v766_v8 = vmax.f32 %v739_v2, 0.0 }
 0x120   : > { %v1303_v6 = vpop.f32.mrb[16].mxu1  ;;  %v1252_v7 = vpop.f32.mrb[17].mxu0 }
 0x121   : > { %v767_v9 = vmax.f32 %v742_v4, 0.0  ;;  %v1253_v10 = vadd.f32 %v1252_v7, %v1251_v5  ;;  %v1304_v11 = vpop.f32.mrb[17].mxu1  ;;  %v1254_v12 = vpop.f32.mrb[18].mxu0 }
 0x122   : > { %v1305_v13 = vadd.f32 %v1304_v11, %v1303_v6  ;;  %v1306_v14 = vpop.f32.mrb[18].mxu1  ;;  %v1255_v15 = vpop.f32.mrb[19].mxu0 }
 0x123   : > { %v1200_v16 = vpack.c.bf16 %v767_v9, %v766_v8  ;;  %v667_v17 = vadd.f32 %v1253_v10, %v1743_v60  ;;  %v1256_v18 = vadd.f32 %v1255_v15, %v1254_v12  ;;  %v1307_v19 = vpop.f32.mrb[19].mxu1 }
 0x124   : > { %v1308_v20 = vadd.f32 %v1307_v19, %v1306_v14 }
 0x125   : > { %1209 = vst [vmem:[%s1749_s12 + $0x18] sm:$0xff] %v1200_v16   ;;  %v747_v21 = vadd.f32 %v1305_v13, %v667_v17  ;;  %v670_v22 = vadd.f32 %v1256_v18, %v1743_v60 }
 0x127   : > { %v750_v23 = vadd.f32 %v1308_v20, %v670_v22  ;;  %v1257_v24 = vpop.f32.mrb[20].mxu0  ;;  %v768_v27 = vmax.f32 %v747_v21, 0.0 }
 0x128   : > { %v1309_v25 = vpop.f32.mrb[20].mxu1  ;;  %v1258_v26 = vpop.f32.mrb[21].mxu0 }
 0x129   : > { %v769_v28 = vmax.f32 %v750_v23, 0.0  ;;  %v1259_v29 = vadd.f32 %v1258_v26, %v1257_v24  ;;  %v1310_v30 = vpop.f32.mrb[21].mxu1  ;;  %v1260_v31 = vpop.f32.mrb[22].mxu0 }
 0x12a   : > { %v1311_v32 = vadd.f32 %v1310_v30, %v1309_v25  ;;  %v1312_v33 = vpop.f32.mrb[22].mxu1  ;;  %v1261_v34 = vpop.f32.mrb[23].mxu0 }
 0x12b   : > { %v1205_v35 = vpack.c.bf16 %v769_v28, %v768_v27  ;;  %v675_v36 = vadd.f32 %v1259_v29, %v1743_v60  ;;  %v1313_v37 = vpop.f32.mrb[23].mxu1 }
 0x12d   : > { %1210 = vst [vmem:[%s1749_s12 + $0x20] sm:$0xff] %v1205_v35   ;;  %v755_v38 = vadd.f32 %v1311_v32, %v675_v36  ;;  %833 = sbr.rel (!%p1608_p4) target bundleno = 377 (0x179), region = 36 }
 0x12f   : > { %v770_v39 = vmax.f32 %v755_v38, 0.0 }
 0x131   : > { %v1180_v40 = vpack.c.bf16 %v770_v39, %v770_v39 }
 0x133   : > { %826 = vst [vmem:[%s1749_s12 + $0x28] sm:$0xf] %v1180_v40 }
 0x134   : > { %s1836_s7 = smov (!%p836_p8, %s835_s7), 11 }
 0x135   : > { %s1157_s14 = sshll.u32 %s1836_s7, 6 }
 0x136   : > { %p1160_p9 = scmp.eq.s32.totalorder %s1157_s14, 0 }
 0x137   : > { %1471 = sdivrem.u32 (!%p1160_p9), %s1836_s7, 11 }
 0x138   : > { %844 = sbr.rel (%p1160_p9) target bundleno = 377 (0x179), region = 40 }
 0x140   : > { %s1778_s20 = spop.drf %1471 }
 0x141   : > { %p1161_p10 = scmp.le.s32.totalorder %s1778_s20, 0 }
 0x142   : > { %s1829_s15 = smov (!%p1161_p10), %s1772_s11  ;;  %s1830_s30 = smov (!%p1161_p10), %s1749_s12 }
 0x143   : > { %1039 = sbr.rel (%p1161_p10) target bundleno = 348 (0x15c), region = 112  ;;  %s1787_s17 = smov (!%p1161_p10), 0  }
 0x144   : > { %s1789_s18 = smov (!%p1161_p10), 0  }
 0x14a LB: >> { %v861_v60 = vld [vmem:[%s1537_s30] sm:$0xf]  ;;  %v863_v41 = vld [vmem:[%s1537_s30 + $0x4] sm:$0xf]  ;;  %v865_v42 = vld [vmem:[%s1537_s30 + $0x8] sm:$0xf]  ;;  %s1545_s18 = sphi %s1789_s18, %s855_s18   ;;  %s1541_s17 = sphi %s1787_s17, %s1831_s17   ;;  %s1537_s30 = sphi %s1830_s30, %s888_s30   ;;  %s1533_s15 = sphi %s1829_s15, %s889_s15  }
 0x14b   : >> { %862 = vst [vmem:[%s1533_s15] sm:$0xf] %v861_v60  ;;  %864 = vst [vmem:[%s1533_s15 + $0x4] sm:$0xf] %v863_v41  ;;  %v867_v43 = vld [vmem:[%s1537_s30 + $0xc] sm:$0xf]  ;;  %s883_s21 = sadd.s32 1, %s1541_s17 }
 0x14c   : >> { %866 = vst [vmem:[%s1533_s15 + $0x8] sm:$0xf] %v865_v42  ;;  %v869_v44 = vld [vmem:[%s1537_s30 + $0x10] sm:$0xf]  ;;  %v871_v45 = vld [vmem:[%s1537_s30 + $0x14] sm:$0xf]  ;;  %p884_p11 = scmp.ge.s32.totalorder %s883_s21, %s1778_s20 }
 0x14d   : >> { %868 = vst [vmem:[%s1533_s15 + $0xc] sm:$0xf] %v867_v43  ;;  %870 = vst [vmem:[%s1533_s15 + $0x10] sm:$0xf] %v869_v44  ;;  %v873_v46 = vld [vmem:[%s1537_s30 + $0x18] sm:$0xf] }
 0x14e   : >> { %872 = vst [vmem:[%s1533_s15 + $0x14] sm:$0xf] %v871_v45  ;;  %v875_v47 = vld [vmem:[%s1537_s30 + $0x1c] sm:$0xf]  ;;  %v877_v48 = vld [vmem:[%s1537_s30 + $0x20] sm:$0xf] }
 0x14f   : >> { %874 = vst [vmem:[%s1533_s15 + $0x18] sm:$0xf] %v873_v46  ;;  %876 = vst [vmem:[%s1533_s15 + $0x1c] sm:$0xf] %v875_v47  ;;  %v879_v49 = vld [vmem:[%s1537_s30 + $0x24] sm:$0xf] }
 0x150   : >> { %878 = vst [vmem:[%s1533_s15 + $0x20] sm:$0xf] %v877_v48  ;;  %v881_v50 = vld [vmem:[%s1537_s30 + $0x28] sm:$0xf]  ;;  %880 = vst [vmem:[%s1533_s15 + $0x24] sm:$0xf] %v879_v49 }
 0x151   : >> { %882 = vst [vmem:[%s1533_s15 + $0x28] sm:$0xf] %v881_v50  ;;  %s1838_s21 = smov (%p884_p11, %s883_s21), 0  ;;  %s855_s18 = sadd.s32 1, %s1545_s18  }
 0x152   : >> { %s886_s22 = smul.u32 44, %s1838_s21  ;;  %p854_p12 = scmp.ge.s32.totalorder %s855_s18, %s1778_s20 }
 0x153   : >> { %s1831_s17 = smov %s1838_s21 }
 0x154   : >> { %s888_s30 = scalar_lea.vmem %s1749_s12, %s886_s22 [#allocation2]   ;;  %s889_s15 = scalar_lea.vmem %s1772_s11, %s886_s22  }
 0x155   : > { %857 = sbr.rel (!%p854_p12) target bundleno = 330 (0x14a), region = 118 }
 0x15c PF: > { %1473 = sdivrem.u32 %s1836_s7, 11 }
 0x15d   : > { %s1162_s23 = smul.u32 44, %s1778_s20 }
 0x15f   : > { %s894_s24 = scalar_lea.vmem %s1749_s12, %s1162_s23 [#allocation2]   ;;  %s896_s25 = scalar_lea.vmem %s1772_s11, %s1162_s23  }
 0x165   : > { %s1474_s26 = spop.drf %1473 }
 0x166   : > { %p1164_p13 = scmp.le.s32.totalorder %s1474_s26, 0 }
 0x167   : > { %s1547_s27 = smov (!%p1164_p13), %s896_s25   ;;  %s1551_s28 = smov (!%p1164_p13), %s894_s24  }
 0x168   : > { %1053 = sbr.rel (%p1164_p13) target bundleno = 377 (0x179), region = 123  ;;  %s1555_s29 = smov (!%p1164_p13), 0  }
 0x169   : > { %s1559_s4 = smov (!%p1164_p13), 0  }
 0x16f LB: >> { %v906_v51 = vld [vmem:[%s1553_s28] sm:$0xf]  ;;  %s908_s5 = sadd.s32 1, %s1557_s29  ;;  %s900_s4 = sadd.s32 1, %s1561_s4   ;;  %s1561_s4 = sphi %s1559_s4, %s900_s4   ;;  %s1557_s29 = sphi %s1555_s29, %s1556_s29   ;;  %s1553_s28 = sphi %s1551_s28, %s913_s28   ;;  %s1549_s27 = sphi %s1547_s27, %s914_s27  }
 0x170   : >> { %907 = vst [vmem:[%s1549_s27] sm:$0xf] %v906_v51  ;;  %p909_p0 = scmp.ge.s32.totalorder %s908_s5, %s1474_s26  ;;  %p899_p1 = scmp.ge.s32.totalorder %s900_s4, %s1474_s26 }
 0x172   : >> { %s1840_s5 = smov (%p909_p0, %s908_s5), 0  ;;  %902 = sbr.rel (!%p899_p1) target bundleno = 367 (0x16f), region = 129 }
 0x173   : >> { %s1165_s6 = sshll.u32 %s1840_s5, 2  ;;  %s1556_s29 = smov %s1840_s5  }
 0x174   : >> { %s913_s28 = scalar_lea.vmem %s894_s24, %s1165_s6 [#allocation2]   ;;  %s914_s27 = scalar_lea.vmem %s896_s25, %s1165_s6  }
 0x179 PF: > { %p10_p2 = scmp.ge.s32.totalorder %s1598_s16, 4   ;;  %s1832_s12 = smov %s1525_s13 }
 0x17a   : > { %s1833_s13 = smov %s1606_s19  ;;  %s1834_s14 = smov %s1598_s16 }
 0x17b   :  { %12 = sbr.rel (!%p10_p2) target bundleno = 2 (0x2), region = 140 }

// kernel: convolutional_qnet_forward.6
= control target key start
LH: loop header
LB: loop body
LE: loop exit
PB: predicated region body
PF: predicated region fallthrough
CT: control target
= control target key end

     0   :  { %s1584_s12 = smov 0   ;;  %s1586_s13 = smov 0   ;;  %s1815_s0 = inlined_call_operand.vmem [shape: bf16[98,576], index: 0, kind: input, shape index: {}]   ;;  %s1816_s1 = inlined_call_operand.vmem [shape: bf16[576,128], index: 1, kind: input, shape index: {}]   ;;  %s1817_s2 = inlined_call_operand.vmem [shape: f32[1,128], index: 2, kind: input, shape index: {}]   ;;  %s1818_s3 = inlined_call_operand.vmem [shape: bf16[98,128], index: 3, kind: output, shape index: {}]  }
   0x1   :  { %s1588_s14 = smov 0  }
   0x2 LB: > { %s1597_s15 = sadd.s32 4294967295, %s1530_s14   ;;  %s1599_s16 = sadd.s32 1, %s1530_s14   ;;  %s1530_s14 = sphi %s1588_s14, %s1825_s14   ;;  %s1526_s13 = sphi %s1586_s13, %s1824_s13   ;;  %s1522_s12 = sphi %s1584_s12, %s1823_s12  }
   0x3   : > { %s85_s17 = ssub.s32 %s1530_s14, %s1599_s16  ;;  %s88_s18 = sadd.s32 1, %s1526_s13 }
   0x4   : > { %p86_p0 = scmp.eq.s32.totalorder %s85_s17, 0  ;;  %p98_p1 = scmp.ne.s32.totalorder %s1526_s13, %s1522_s12 }
   0x5   : > { %p99_p2 = scmp.eq.s32.totalorder %s1597_s15, 1  ;;  %p1100_p3 = scmp.ge.s32.totalorder %s1530_s14, 1 }
   0x6   : > { %s1607_s19 = scalar_select %p86_p0, %s1526_s13, %s88_s18  }
   0x7   : > { %p1609_p4 = por %p99_p2, %p98_p1  ;;  %p149_p5 = scmp.lt.s32.totalorder %s1530_s14, 3 }
   0x9   : > { %p150_p6 = pnand %p1100_p3, %p149_p5 }
   0xa   : > { %v1410_v0 = vld [vmem:[%s1816_s1 + $0x40] sm:$0xff] (!%p150_p6)   ;;  %v1414_v4 = vld [vmem:[%s1816_s1 + $0x48] sm:$0xff] (!%p150_p6)   ;;  %v1418_v8 = vld [vmem:[%s1816_s1 + $0x50] sm:$0xff] (!%p150_p6)   ;;  %s1656_s28 = smul.u32 (!%p150_p6), 7, %s1597_s15  ;;  %vm609_vm0 = vcmask (!%p150_p6), 523264   ;;  %s175_s17 = sand.u32 (!%p150_p6), 1, %s1522_s12  }
   0xb   : > { %153 = sbr.rel (%p150_p6) target bundleno = 365 (0x16d), region = 32  ;;  %v1411_v1 = vld [vmem:[%s1816_s1 + $0xc0] sm:$0xff] (!%p150_p6)   ;;  %1207 = vmatprep.subr.bf16.mxu0 (!%p150_p6), %v1410_v0  ;;  %v1415_v5 = vld [vmem:[%s1816_s1 + $0xc8] sm:$0xff] (!%p150_p6)   ;;  %v1419_v9 = vld [vmem:[%s1816_s1 + $0xd0] sm:$0xff] (!%p150_p6)  }
   0xc   : > { %v1412_v2 = vld [vmem:[%s1816_s1] sm:$0xff] (!%p150_p6)   ;;  %1247 = vmatprep.subr.bf16.mxu1 (!%p150_p6), %v1411_v1  ;;  %v1416_v6 = vld [vmem:[%s1816_s1 + $0x8] sm:$0xff] (!%p150_p6)   ;;  %v1420_v10 = vld [vmem:[%s1816_s1 + $0x10] sm:$0xff] (!%p150_p6)   ;;  %p184_p7 = scmp.lt.s32.totalorder (!%p150_p6), %s1656_s28, 12  ;;  %s1319_s18 = smul.u32 (!%p150_p6), 28, %s175_s17 }
   0xd   : > { %v1413_v3 = vld [vmem:[%s1816_s1 + $0x80] sm:$0xff] (!%p150_p6)   ;;  %1208 = vmatpush3.bf16.msra.mxu0 (!%p150_p6), %v1412_v2  ;;  %v1417_v7 = vld [vmem:[%s1816_s1 + $0x88] sm:$0xff] (!%p150_p6)   ;;  %v1421_v11 = vld [vmem:[%s1816_s1 + $0x90] sm:$0xff] (!%p150_p6)  }
   0xe   : > { %1248 = vmatpush3.bf16.msra.mxu1 (!%p150_p6), %v1413_v3  ;;  %1209 = vmatprep.subr.bf16.mxu0 (!%p150_p6), %v1414_v4  ;;  %v1422_v12 = vld [vmem:[%s1816_s1 + $0x58] sm:$0xff] (!%p150_p6)   ;;  %v1426_v16 = vld [vmem:[%s1816_s1 + $0x60] sm:$0xff] (!%p150_p6)   ;;  %v1430_v20 = vld [vmem:[%s1816_s1 + $0x68] sm:$0xff] (!%p150_p6)   ;;  %s1753_s12 = scalar_lea.vmem (!%p150_p6), [#allocation2], %s1319_s18  }
   0xf   : > { %1249 = vmatprep.subr.bf16.mxu1 (!%p150_p6), %v1415_v5  ;;  %v1423_v13 = vld [vmem:[%s1816_s1 + $0xd8] sm:$0xff] (!%p150_p6)   ;;  %v1427_v17 = vld [vmem:[%s1816_s1 + $0xe0] sm:$0xff] (!%p150_p6)   ;;  %v1431_v21 = vld [vmem:[%s1816_s1 + $0xe8] sm:$0xff] (!%p150_p6)  }
  0x10   : > { %v1424_v14 = vld [vmem:[%s1816_s1 + $0x18] sm:$0xff] (!%p150_p6)   ;;  %v1428_v18 = vld [vmem:[%s1816_s1 + $0x20] sm:$0xff] (!%p150_p6)   ;;  %v1432_v22 = vld [vmem:[%s1816_s1 + $0x28] sm:$0xff] (!%p150_p6)  }
  0x11   : > { %1210 = vmatpush3.bf16.msra.mxu0 (!%p150_p6), %v1416_v6  ;;  %v1425_v15 = vld [vmem:[%s1816_s1 + $0x98] sm:$0xff] (!%p150_p6)   ;;  %v1429_v19 = vld [vmem:[%s1816_s1 + $0xa0] sm:$0xff] (!%p150_p6)   ;;  %v1433_v23 = vld [vmem:[%s1816_s1 + $0xa8] sm:$0xff] (!%p150_p6)  }
  0x12   : > { %1250 = vmatpush3.bf16.msra.mxu1 %v1417_v7  ;;  %1211 = vmatprep.subr.bf16.mxu0 %v1418_v8  ;;  %s185_s24 = scalar_select %p184_p7, %s1656_s28, 12  ;;  %v1434_v24 = vld [vmem:[%s1816_s1 + $0x70] sm:$0xff]   ;;  %v1438_v28 = vld [vmem:[%s1816_s1 + $0x78] sm:$0xff]   ;;  %v1448_v36 = vld [vmem:[%s1816_s1 + $0x100] sm:$0xff]  }
  0x13   : > { %1251 = vmatprep.subr.bf16.mxu1 %v1419_v9  ;;  %v1435_v25 = vld [vmem:[%s1816_s1 + $0xf0] sm:$0xff]   ;;  %v1439_v29 = vld [vmem:[%s1816_s1 + $0xf8] sm:$0xff]   ;;  %v1455_v39 = vld [vmem:[%s1816_s1 + $0x108] sm:$0xff]   ;;  %s865_s21 = ssub.s32 (%p1609_p4), 13, %s1656_s28  ;;  %s1189_s22 = smul.u32 (%p1609_p4), 28, %s1597_s15 }
  0x14   : > { %s1320_s7 = smul.u32 20, %s185_s24  ;;  %v1436_v26 = vld [vmem:[%s1816_s1 + $0x30] sm:$0xff]   ;;  %v1440_v30 = vld [vmem:[%s1816_s1 + $0x38] sm:$0xff]   ;;  %v1102_v60 = vld [vmem:[%s1817_s2] ss:$0 sm:$0xff]  ;;  %p866_p8 = scmp.lt.s32.totalorder (%p1609_p4), %s865_s21, 7 }
  0x15   : > { %1212 = vmatpush3.bf16.msra.mxu0 %v1420_v10  ;;  %v1437_v27 = vld [vmem:[%s1816_s1 + $0xb0] sm:$0xff]   ;;  %v1441_v31 = vld [vmem:[%s1816_s1 + $0xb8] sm:$0xff]   ;;  %s1766_s25 = scalar_lea.vmem (%p1609_p4), %s1818_s3, %s1189_s22  }
  0x16   : > { %1252 = vmatpush3.bf16.msra.mxu1 %v1421_v11  ;;  %1213 = vmatprep.subr.bf16.mxu0 %v1422_v12  ;;  %s1711_s24 = scalar_lea.vmem %s1815_s0, %s1320_s7  ;;  %v1462_v44 = vld [vmem:[%s1816_s1 + $0x110] sm:$0xff]   ;;  %v1467_v45 = vld [vmem:[%s1816_s1 + $0x118] sm:$0xff]  }
  0x17   : > { %1253 = vmatprep.subr.bf16.mxu1 %v1423_v13  ;;  %v1442_v32 = vld [vmem:[%s1711_s24] ss:$20 sps:$4 sm:$0xff]   ;;  %v1444_v33 = vld [vmem:[%s1711_s24 + $0x4] ss:$20 sps:$4 sm:$0xff]   ;;  %v1445_v34 = vld [vmem:[%s1711_s24 + $0x8] ss:$20 sps:$4 sm:$0xff]  }
  0x18   : > { %v1447_v35 = vld [vmem:[%s1711_s24 + $0xc] ss:$20 sps:$4 sm:$0xff]   ;;  %654 = vmatprep.mubr.bf16.mxu0 %v1444_v33  ;;  %v1451_v38 = vld [vmem:[%s1711_s24 + $0x34] ss:$20 sps:$4 sm:$0xff]   ;;  %v1454_v41 = vld [vmem:[%s1711_s24 + $0x30] ss:$20 sps:$4 sm:$0xff]  }
  0x19   : > { %1214 = vmatpush3.bf16.msra.mxu0 %v1424_v14  ;;  %718 = vmatprep.mubr.bf16.mxu1 %v1447_v35  ;;  %v1449_v37 = vld [vmem:[%s1711_s24 + $0x2c] ss:$20 sps:$4 sm:$0xff]   ;;  %v1453_v40 = vld [vmem:[%s1711_s24 + $0x28] ss:$20 sps:$4 sm:$0xff]   ;;  %v1460_v48 = vld [vmem:[%s1711_s24 + $0x50] ss:$20 sps:$4 sm:$0xff]  }
  0x1a   : > { %1254 = vmatpush3.bf16.msra.mxu1 %v1425_v15  ;;  %1215 = vmatprep.subr.bf16.mxu0 %v1426_v16  ;;  %v1456_v42 = vld [vmem:[%s1711_s24 + $0x54] ss:$20 sps:$4 sm:$0xff]   ;;  %v1458_v43 = vld [vmem:[%s1711_s24 + $0x5c] ss:$20 sps:$4 sm:$0xff]   ;;  %v220_v47 = vld [vmem:[%s1711_s24 + $0x80] sm:$0xff] }
  0x1b   : > { %1255 = vmatprep.subr.bf16.mxu1 %v1427_v17  ;;  %v219_v46 = vld [vmem:[%s1711_s24 + $0x78] sm:$0xff]  ;;  %v1121_v51 = vcombine.high %v220_v47, %v220_v47  ;;  %v1120_v53 = vcombine.low %v220_v47, %v220_v47  ;;  %v1468_v54 = vld [vmem:[%s1711_s24 + $0x10] ss:$20 sps:$4 sm:$0xff]   ;;  %v1469_v55 = vld [vmem:[%s1711_s24 + $0x60] ss:$20 sps:$4 sm:$0xff]  }
  0x1c   : > { %v1461_v49 = vld [vmem:[%s1711_s24 + $0x58] ss:$20 sps:$4 sm:$0xff]   ;;  %v1119_v50 = vcombine.high %v219_v46, %v219_v46  ;;  %v1118_v52 = vcombine.low %v219_v46, %v219_v46  ;;  %v1471_v57 = vld [vmem:[%s1711_s24 + $0x88] ss:$0 sps:$4 sm:$0xff]  }
  0x1d   : > { %1216 = vmatpush3.bf16.msra.mxu0 %v1428_v18  ;;  %v1470_v56 = vld [vmem:[%s1711_s24 + $0x38] ss:$20 sps:$4 sm:$0xff]  }
  0x1e   : > { %1256 = vmatpush3.bf16.msra.mxu1 %v1429_v19  ;;  %1217 = vmatprep.subr.bf16.mxu0 %v1430_v20 }
  0x1f   : > { %1257 = vmatprep.subr.bf16.mxu1 %v1431_v21 }
  0x21   : > { %1218 = vmatpush3.bf16.msra.mxu0 %v1432_v22 }
  0x22   : > { %1258 = vmatpush3.bf16.msra.mxu1 %v1433_v23  ;;  %1219 = vmatprep.subr.bf16.mxu0 %v1434_v24 }
  0x23   : > { %1259 = vmatprep.subr.bf16.mxu1 %v1435_v25 }
  0x25   : > { %1220 = vmatpush3.bf16.msra.mxu0 %v1436_v26 }
  0x26   : > { %1260 = vmatpush3.bf16.msra.mxu1 %v1437_v27  ;;  %1221 = vmatprep.subr.bf16.mxu0 %v1438_v28 }
  0x27   : > { %1261 = vmatprep.subr.bf16.mxu1 %v1439_v29 }
  0x29   : > { %1222 = vmatpush3.bf16.msra.mxu0 %v1440_v30 }
  0x2a   : > { %1262 = vmatpush3.bf16.msra.mxu1 %v1441_v31  ;;  %1295 = vmatprep.subr.bf16.mxu0 %v1448_v36 }
  0x2b   : > { %1311 = vmatprep.subr.bf16.mxu1 %v1448_v36 }
  0x2c   : > { %655 = vmatmul.mubr.bf16.vlgmr.msra.gmra.mrb[0].mxu0 %v1442_v32 }
  0x2d   : > { %719 = vmatmul.mubr.bf16.vlgmr.msra.gmra.mrb[0].mxu1 %v1445_v34  ;;  %1296 = vmatpush3.bf16.msra.mxu0 %v1448_v36 }
  0x2e   : > { %1315 = vmatpush3.bf16.msra.mxu1 %v1448_v36  ;;  %662 = vmatprep.mubr.bf16.mxu0 %v1449_v37 }
  0x2f   : > { %726 = vmatprep.mubr.bf16.mxu1 %v1451_v38  ;;  %1297 = vmatprep.subr.bf16.mxu0 %v1455_v39 }
  0x30   : > { %1312 = vmatprep.subr.bf16.mxu1 %v1455_v39 }
  0x31   : > { %1298 = vmatpush3.bf16.msra.mxu0 %v1455_v39 }
  0x32   : > { %1316 = vmatpush3.bf16.msra.mxu1 %v1455_v39  ;;  %1299 = vmatprep.subr.bf16.mxu0 %v1462_v44 }
  0x33   : > { %1313 = vmatprep.subr.bf16.mxu1 %v1462_v44 }
  0x34   : > { %663 = vmatmul.mubr.bf16.gmra.mrb[4].mxu0 %v1453_v40 }
  0x35   : > { %727 = vmatmul.mubr.bf16.gmra.mrb[4].mxu1 %v1454_v41  ;;  %670 = vmatprep.mubr.bf16.mxu0 %v1456_v42 }
  0x36   : > { %734 = vmatprep.mubr.bf16.mxu1 %v1458_v43  ;;  %1300 = vmatpush3.bf16.msra.mxu0 %v1462_v44 }
  0x37   : > { %1317 = vmatpush3.bf16.msra.mxu1 %v1462_v44  ;;  %1301 = vmatprep.subr.bf16.mxu0 %v1467_v45 }
  0x38   : > { %1314 = vmatprep.subr.bf16.mxu1 %v1467_v45 }
  0x3a   : > { %1302 = vmatpush3.bf16.msra.mxu0 %v1467_v45 }
  0x3b   : > { %1318 = vmatpush3.bf16.msra.mxu1 %v1467_v45 }
  0x3c   : > { %671 = vmatmul.mubr.bf16.gmra.mrb[8].mxu0 %v1460_v48 }
  0x3d   : > { %735 = vmatmul.mubr.bf16.gmra.mrb[8].mxu1 %v1461_v49  ;;  %678 = vmatprep.mubr.bf16.mxu0 %v1119_v50 }
  0x3e   : > { %742 = vmatprep.mubr.bf16.mxu1 %v1121_v51 }
  0x44   : > { %679 = vmatmul.mubr.bf16.gmra.mrb[12].mxu0 %v1118_v52 }
  0x45   : > { %743 = vmatmul.mubr.bf16.gmra.mrb[12].mxu1 %v1120_v53  ;;  %1303 = vmatprep.mubr.msk.bf16.mxu0 %vm609_vm0, %v1468_v54 }
  0x46   : > { %1307 = vmatprep.mubr.msk.bf16.mxu1 %vm609_vm0, %v1469_v55 }
  0x4c   : > { %1304 = vmatmul.mubr.msk.bf16.vlgmr.msra.gmra.mrb[16].mxu0 %vm609_vm0, %v1470_v56 }
  0x4d   : > { %1308 = vmatmul.mubr.msk.bf16.vlgmr.msra.gmra.mrb[16].mxu1 %vm609_vm0, %v1471_v57 }
  0xff   : > { %v1223_v58 = vpop.f32.mrb[0].mxu0 }
 0x100   : > { %v1263_v59 = vpop.f32.mrb[0].mxu1  ;;  %v1224_v61 = vpop.f32.mrb[1].mxu0 }
 0x101   : > { %v1225_v62 = vadd.f32 %v1224_v61, %v1223_v58  ;;  %v1264_v63 = vpop.f32.mrb[1].mxu1  ;;  %v1226_v0 = vpop.f32.mrb[2].mxu0 }
 0x102   : > { %v1265_v1 = vadd.f32 %v1264_v63, %v1263_v59  ;;  %v1266_v2 = vpop.f32.mrb[2].mxu1  ;;  %v1227_v3 = vpop.f32.mrb[3].mxu0 }
 0x103   : > { %v657_v4 = vadd.f32 %v1225_v62, %v1102_v60  ;;  %v1228_v5 = vadd.f32 %v1227_v3, %v1226_v0  ;;  %v1267_v6 = vpop.f32.mrb[3].mxu1 }
 0x104   : > { %v1268_v7 = vadd.f32 %v1267_v6, %v1266_v2 }
 0x105   : > { %v660_v8 = vadd.f32 %v1228_v5, %v1102_v60  ;;  %v721_v9 = vadd.f32 %v1265_v1, %v657_v4 }
 0x107   : > { %v1229_v10 = vpop.f32.mrb[4].mxu0  ;;  %v724_v11 = vadd.f32 %v1268_v7, %v660_v8 }
 0x108   : > { %v1269_v12 = vpop.f32.mrb[4].mxu1  ;;  %v1230_v13 = vpop.f32.mrb[5].mxu0 }
 0x109   : > { %v1231_v14 = vadd.f32 %v1230_v13, %v1229_v10  ;;  %v1270_v15 = vpop.f32.mrb[5].mxu1  ;;  %v1232_v16 = vpop.f32.mrb[6].mxu0 }
 0x10a   : > { %v1271_v17 = vadd.f32 %v1270_v15, %v1269_v12  ;;  %v1272_v18 = vpop.f32.mrb[6].mxu1  ;;  %v1233_v19 = vpop.f32.mrb[7].mxu0 }
 0x10b   : > { %v665_v20 = vadd.f32 %v1231_v14, %v1102_v60  ;;  %v1234_v21 = vadd.f32 %v1233_v19, %v1232_v16  ;;  %v1273_v22 = vpop.f32.mrb[7].mxu1 }
 0x10c   : > { %v1274_v23 = vadd.f32 %v1273_v22, %v1272_v18 }
 0x10d   : > { %v668_v24 = vadd.f32 %v1234_v21, %v1102_v60  ;;  %v729_v25 = vadd.f32 %v1271_v17, %v665_v20 }
 0x10f   : > { %v1235_v26 = vpop.f32.mrb[8].mxu0  ;;  %v732_v27 = vadd.f32 %v1274_v23, %v668_v24 }
 0x110   : > { %v1275_v28 = vpop.f32.mrb[8].mxu1  ;;  %v1236_v29 = vpop.f32.mrb[9].mxu0 }
 0x111   : > { %v1237_v30 = vadd.f32 %v1236_v29, %v1235_v26  ;;  %v1276_v31 = vpop.f32.mrb[9].mxu1  ;;  %v1238_v32 = vpop.f32.mrb[10].mxu0 }
 0x112   : > { %v1277_v33 = vadd.f32 %v1276_v31, %v1275_v28  ;;  %v1278_v34 = vpop.f32.mrb[10].mxu1  ;;  %v1239_v35 = vpop.f32.mrb[11].mxu0 }
 0x113   : > { %v673_v36 = vadd.f32 %v1237_v30, %v1102_v60  ;;  %v1240_v37 = vadd.f32 %v1239_v35, %v1238_v32  ;;  %v1279_v38 = vpop.f32.mrb[11].mxu1 }
 0x114   : > { %v1280_v39 = vadd.f32 %v1279_v38, %v1278_v34 }
 0x115   : > { %v676_v40 = vadd.f32 %v1240_v37, %v1102_v60  ;;  %v737_v41 = vadd.f32 %v1277_v33, %v673_v36 }
 0x117   : > { %v1241_v42 = vpop.f32.mrb[12].mxu0  ;;  %v740_v43 = vadd.f32 %v1280_v39, %v676_v40 }
 0x118   : > { %v1281_v44 = vpop.f32.mrb[12].mxu1  ;;  %v1242_v45 = vpop.f32.mrb[13].mxu0 }
 0x119   : > { %v1243_v46 = vadd.f32 %v1242_v45, %v1241_v42  ;;  %v1282_v47 = vpop.f32.mrb[13].mxu1  ;;  %v1244_v48 = vpop.f32.mrb[14].mxu0 }
 0x11a   : > { %v1283_v49 = vadd.f32 %v1282_v47, %v1281_v44  ;;  %v1284_v50 = vpop.f32.mrb[14].mxu1  ;;  %v1245_v51 = vpop.f32.mrb[15].mxu0 }
 0x11b   : > { %v681_v52 = vadd.f32 %v1243_v46, %v1102_v60  ;;  %v1285_v53 = vpop.f32.mrb[15].mxu1 }
 0x11d   : > { %v745_v54 = vadd.f32 %v1283_v49, %v681_v52 }
 0x11f   : > { %v1305_v55 = vpop.f32.mrb[16].mxu0 }
 0x120   : > { %v793_v56 = vadd.f32 %v1305_v55, %v729_v25  ;;  %v1309_v57 = vpop.f32.mrb[16].mxu1  ;;  %v784_v58 = vpop.f32.mrb[17].mxu0 }
 0x121   : > { %v809_v59 = vadd.f32 %v1309_v57, %v745_v54  ;;  %v785_v61 = vadd.f32 %v784_v58, %v721_v9  ;;  %v800_v62 = vpop.f32.mrb[17].mxu1  ;;  %v1306_v63 = vpop.f32.mrb[18].mxu0 }
 0x122   : > { %v801_v0 = vadd.f32 %v800_v62, %v737_v41  ;;  %v796_v1 = vadd.f32 %v1306_v63, %v732_v27  ;;  %v1310_v2 = vpop.f32.mrb[18].mxu1  ;;  %v787_v3 = vpop.f32.mrb[19].mxu0  ;;  %v816_v60 = vmax.f32 %v793_v56, 0.0 }
 0x123   : > { %v820_v4 = vmax.f32 %v809_v59, 0.0  ;;  %v788_v5 = vadd.f32 %v787_v3, %v724_v11  ;;  %v803_v6 = vpop.f32.mrb[19].mxu1  ;;  %v814_v12 = vmax.f32 %v785_v61, 0.0 }
 0x124   : > { %v817_v7 = vmax.f32 %v796_v1, 0.0  ;;  %v804_v8 = vadd.f32 %v803_v6, %v740_v43  ;;  %v818_v14 = vmax.f32 %v801_v0, 0.0  ;;  %863 = sbr.rel (!%p1609_p4) target bundleno = 365 (0x16d), region = 36 }
 0x125   : > { %v1188_v10 = vpack.c.bf16 %v820_v4, %v820_v4  ;;  %v815_v13 = vmax.f32 %v788_v5, 0.0 }
 0x126   : > { %v1198_v15 = vpack.c.bf16 %v817_v7, %v816_v60  ;;  %v819_v16 = vmax.f32 %v804_v8, 0.0 }
 0x127   : > { %856 = vst [vmem:[%s1753_s12 + $0x18] sm:$0xf] %v1188_v10  ;;  %v1193_v9 = vpack.c.bf16 %v815_v13, %v814_v12 }
 0x128   : > { %1205 = vst [vmem:[%s1753_s12 + $0x8] sm:$0xff] %v1198_v15   ;;  %v1203_v11 = vpack.c.bf16 %v819_v16, %v818_v14 }
 0x129   : > { %1194 = vst [vmem:[%s1753_s12] sm:$0xff] %v1193_v9  }
 0x12a   : > { %1206 = vst [vmem:[%s1753_s12 + $0x10] sm:$0xff] %v1203_v11  }
 0x12b   : > { %s1827_s21 = smov (!%p866_p8, %s865_s21), 7 }
 0x12c   : > { %s1170_s26 = sshll.u32 %s1827_s21, 6 }
 0x12d   : > { %p1173_p9 = scmp.eq.s32.totalorder %s1170_s26, 0 }
 0x12e   : > { %1472 = sdivrem.u32 (!%p1173_p9), %s1827_s21, 7 }
 0x12f   : > { %874 = sbr.rel (%p1173_p9) target bundleno = 365 (0x16d), region = 40 }
 0x137   : > { %s1772_s20 = spop.drf %1472 }
 0x138   : > { %p1174_p10 = scmp.le.s32.totalorder %s1772_s20, 0 }
 0x139   : > { %s1820_s15 = smov (!%p1174_p10), %s1766_s25  ;;  %s1821_s28 = smov (!%p1174_p10), %s1753_s12 }
 0x13a   : > { %1053 = sbr.rel (%p1174_p10) target bundleno = 336 (0x150), region = 112  ;;  %s1781_s27 = smov (!%p1174_p10), 0  }
 0x13b   : > { %s1783_s29 = smov (!%p1174_p10), 0  }
 0x141 LB: >> { %v891_v17 = vld [vmem:[%s1538_s28] sm:$0xf]  ;;  %v893_v18 = vld [vmem:[%s1538_s28 + $0x4] sm:$0xf]  ;;  %v895_v19 = vld [vmem:[%s1538_s28 + $0x8] sm:$0xf]  ;;  %s1546_s29 = sphi %s1783_s29, %s885_s29   ;;  %s1542_s27 = sphi %s1781_s27, %s1822_s27   ;;  %s1538_s28 = sphi %s1821_s28, %s910_s28   ;;  %s1534_s15 = sphi %s1820_s15, %s911_s15  }
 0x142   : >> { %892 = vst [vmem:[%s1534_s15] sm:$0xf] %v891_v17  ;;  %894 = vst [vmem:[%s1534_s15 + $0x4] sm:$0xf] %v893_v18  ;;  %v897_v20 = vld [vmem:[%s1538_s28 + $0xc] sm:$0xf]  ;;  %s905_s30 = sadd.s32 1, %s1542_s27 }
 0x143   : >> { %896 = vst [vmem:[%s1534_s15 + $0x8] sm:$0xf] %v895_v19  ;;  %v899_v21 = vld [vmem:[%s1538_s28 + $0x10] sm:$0xf]  ;;  %v901_v22 = vld [vmem:[%s1538_s28 + $0x14] sm:$0xf]  ;;  %p906_p11 = scmp.ge.s32.totalorder %s905_s30, %s1772_s20 }
 0x144   : >> { %898 = vst [vmem:[%s1534_s15 + $0xc] sm:$0xf] %v897_v20  ;;  %900 = vst [vmem:[%s1534_s15 + $0x10] sm:$0xf] %v899_v21  ;;  %v903_v23 = vld [vmem:[%s1538_s28 + $0x18] sm:$0xf] }
 0x145   : >> { %902 = vst [vmem:[%s1534_s15 + $0x14] sm:$0xf] %v901_v22  ;;  %904 = vst [vmem:[%s1534_s15 + $0x18] sm:$0xf] %v903_v23  ;;  %s1829_s30 = smov (%p906_p11, %s905_s30), 0  ;;  %s885_s29 = sadd.s32 1, %s1546_s29  }
 0x146   : >> { %s908_s4 = smul.u32 28, %s1829_s30  ;;  %p884_p12 = scmp.ge.s32.totalorder %s885_s29, %s1772_s20 }
 0x147   : >> { %s1822_s27 = smov %s1829_s30 }
 0x148   : >> { %s910_s28 = scalar_lea.vmem %s1753_s12, %s908_s4 [#allocation2]   ;;  %s911_s15 = scalar_lea.vmem %s1766_s25, %s908_s4  }
 0x149   : > { %887 = sbr.rel (!%p884_p12) target bundleno = 321 (0x141), region = 118 }
 0x150 PF: > { %1474 = sdivrem.u32 %s1827_s21, 7 }
 0x151   : > { %s1175_s5 = smul.u32 28, %s1772_s20 }
 0x153   : > { %s916_s6 = scalar_lea.vmem %s1753_s12, %s1175_s5 [#allocation2]   ;;  %s918_s7 = scalar_lea.vmem %s1766_s25, %s1175_s5  }
 0x159   : > { %s1475_s8 = spop.drf %1474 }
 0x15a   : > { %p1177_p13 = scmp.le.s32.totalorder %s1475_s8, 0 }
 0x15b   : > { %s1548_s9 = smov (!%p1177_p13), %s918_s7   ;;  %s1552_s10 = smov (!%p1177_p13), %s916_s6  }
 0x15c   : > { %1067 = sbr.rel (%p1177_p13) target bundleno = 365 (0x16d), region = 123  ;;  %s1556_s11 = smov (!%p1177_p13), 0  }
 0x15d   : > { %s1560_s14 = smov (!%p1177_p13), 0  }
 0x163 LB: >> { %v928_v24 = vld [vmem:[%s1554_s10] sm:$0xf]  ;;  %s930_s17 = sadd.s32 1, %s1558_s11  ;;  %s922_s14 = sadd.s32 1, %s1562_s14   ;;  %s1562_s14 = sphi %s1560_s14, %s922_s14   ;;  %s1558_s11 = sphi %s1556_s11, %s1557_s11   ;;  %s1554_s10 = sphi %s1552_s10, %s935_s10   ;;  %s1550_s9 = sphi %s1548_s9, %s936_s9  }
 0x164   : >> { %929 = vst [vmem:[%s1550_s9] sm:$0xf] %v928_v24  ;;  %p931_p0 = scmp.ge.s32.totalorder %s930_s17, %s1475_s8  ;;  %p921_p1 = scmp.ge.s32.totalorder %s922_s14, %s1475_s8 }
 0x166   : >> { %s1831_s17 = smov (%p931_p0, %s930_s17), 0  ;;  %924 = sbr.rel (!%p921_p1) target bundleno = 355 (0x163), region = 129 }
 0x167   : >> { %s1178_s18 = sshll.u32 %s1831_s17, 2  ;;  %s1557_s11 = smov %s1831_s17  }
 0x168   : >> { %s935_s10 = scalar_lea.vmem %s916_s6, %s1178_s18 [#allocation2]   ;;  %s936_s9 = scalar_lea.vmem %s918_s7, %s1178_s18  }
 0x16d PF: > { %p10_p2 = scmp.ge.s32.totalorder %s1599_s16, 4   ;;  %s1823_s12 = smov %s1526_s13 }
 0x16e   : > { %s1824_s13 = smov %s1607_s19  ;;  %s1825_s14 = smov %s1599_s16 }
 0x16f   :  { %12 = sbr.rel (!%p10_p2) target bundleno = 2 (0x2), region = 140 }

// kernel: convolutional_qnet_forward.7
= control target key start
LH: loop header
LB: loop body
LE: loop exit
PB: predicated region body
PF: predicated region fallthrough
CT: control target
= control target key end

     0   :  { %10 = vsyncpa [#allocation3], 0  ;;  %v824_v38 = vlaneseq  ;;  %v8690_v39 = vmov 1966171168   ;;  %vm5032_vm0 = vcmask 523264   ;;  %s11375_s0 = inlined_call_operand.vmem [shape: bf16[2,3136], index: 0, kind: input, shape index: {}]   ;;  %s11376_s1 = inlined_call_operand.vmem [shape: bf16[3136,512], index: 1, kind: input, shape index: {}]   ;;  %s11377_s2 = inlined_call_operand.vmem [shape: f32[1,512], index: 2, kind: input, shape index: {}]   ;;  %s11378_s3 = inlined_call_operand.vmem [shape: bf16[512,128], index: 3, kind: input, shape index: {}]   ;;  %s11379_s4 = inlined_call_operand.vmem [shape: f32[1,128], index: 4, kind: input, shape index: {}]   ;;  %s11380_s5 = inlined_call_operand.hbm [shape: f32[2,128], index: 5, kind: output, shape index: {}]  }
   0x1   :  { %v7438_v0 = vld [vmem:[%s11376_s1 + $0x4] ss:$16 sps:$4 sm:$0xff]   ;;  %v7440_v1 = vld [vmem:[%s11376_s1 + $0xc] ss:$16 sps:$4 sm:$0xff]   ;;  %v7442_v2 = vld [vmem:[%s11376_s1] ss:$16 sps:$4 sm:$0xff]   ;;  %v865_v40 = vunpack.c.l.s4 %v8690_v39 }
   0x2   :  { %v7443_v3 = vld [vmem:[%s11376_s1 + $0x8] ss:$16 sps:$4 sm:$0xff]   ;;  %5036 = vmatprep.subr.bf16.mxu0 %v7438_v0  ;;  %v7444_v4 = vld [vmem:[%s11376_s1 + $0x24] ss:$16 sps:$4 sm:$0xff]   ;;  %5569 = vmatprep.subr.bf16.mxu1 %v7440_v1  ;;  %v7446_v5 = vld [vmem:[%s11376_s1 + $0x2c] ss:$16 sps:$4 sm:$0xff]  }
   0x3   :  { %5037 = vmatpush1.bf16.msra.mxu0 %v7442_v2  ;;  %5570 = vmatpush1.bf16.msra.mxu1 %v7443_v3  ;;  %v7448_v6 = vld [vmem:[%s11376_s1 + $0x20] ss:$16 sps:$4 sm:$0xff]   ;;  %v7449_v7 = vld [vmem:[%s11376_s1 + $0x28] ss:$16 sps:$4 sm:$0xff]   ;;  %v7450_v8 = vld [vmem:[%s11376_s1 + $0x44] ss:$16 sps:$4 sm:$0xff]   ;;  %v866_v46 = vunpack.c.0.s8 %v865_v40 }
   0x4   :  { %5038 = vmatprep.subr.bf16.mxu0 %v7444_v4  ;;  %5571 = vmatprep.subr.bf16.mxu1 %v7446_v5  ;;  %v7452_v9 = vld [vmem:[%s11376_s1 + $0x4c] ss:$16 sps:$4 sm:$0xff]   ;;  %v7454_v10 = vld [vmem:[%s11376_s1 + $0x40] ss:$16 sps:$4 sm:$0xff]   ;;  %v7455_v11 = vld [vmem:[%s11376_s1 + $0x48] ss:$16 sps:$4 sm:$0xff]  }
   0x5   :  { %v7456_v12 = vld [vmem:[%s11376_s1 + $0x64] ss:$16 sps:$4 sm:$0xff]   ;;  %v7458_v13 = vld [vmem:[%s11376_s1 + $0x6c] ss:$16 sps:$4 sm:$0xff]   ;;  %v7460_v14 = vld [vmem:[%s11376_s1 + $0x60] ss:$16 sps:$4 sm:$0xff]  }
   0x6   :  { %v7461_v15 = vld [vmem:[%s11376_s1 + $0x68] ss:$16 sps:$4 sm:$0xff]   ;;  %v7462_v16 = vld [vmem:[%s11376_s1 + $0x84] ss:$16 sps:$4 sm:$0xff]   ;;  %v7464_v17 = vld [vmem:[%s11376_s1 + $0x8c] ss:$16 sps:$4 sm:$0xff]  }
   0x7   :  { %5039 = vmatpush1.bf16.msra.mxu0 %v7448_v6  ;;  %5572 = vmatpush1.bf16.msra.mxu1 %v7449_v7  ;;  %v7466_v18 = vld [vmem:[%s11376_s1 + $0x80] ss:$16 sps:$4 sm:$0xff]   ;;  %v7467_v19 = vld [vmem:[%s11376_s1 + $0x88] ss:$16 sps:$4 sm:$0xff]   ;;  %v7468_v20 = vld [vmem:[%s11376_s1 + $0xa4] ss:$16 sps:$4 sm:$0xff]  }
   0x8   :  { %5040 = vmatprep.subr.bf16.mxu0 %v7450_v8  ;;  %5573 = vmatprep.subr.bf16.mxu1 %v7452_v9  ;;  %v7470_v21 = vld [vmem:[%s11376_s1 + $0xac] ss:$16 sps:$4 sm:$0xff]   ;;  %v7472_v22 = vld [vmem:[%s11376_s1 + $0xa0] ss:$16 sps:$4 sm:$0xff]   ;;  %v7473_v23 = vld [vmem:[%s11376_s1 + $0xa8] ss:$16 sps:$4 sm:$0xff]  }
   0x9   :  { %v7474_v24 = vld [vmem:[%s11376_s1 + $0xc4] ss:$16 sps:$4 sm:$0xff]   ;;  %v7476_v25 = vld [vmem:[%s11376_s1 + $0xcc] ss:$16 sps:$4 sm:$0xff]   ;;  %v7478_v26 = vld [vmem:[%s11376_s1 + $0xc0] ss:$16 sps:$4 sm:$0xff]  }
   0xa   :  { %v7479_v27 = vld [vmem:[%s11376_s1 + $0xc8] ss:$16 sps:$4 sm:$0xff]   ;;  %v7480_v28 = vld [vmem:[%s11376_s1 + $0xe4] ss:$16 sps:$4 sm:$0xff]   ;;  %v7482_v29 = vld [vmem:[%s11376_s1 + $0xec] ss:$16 sps:$4 sm:$0xff]  }
   0xb   :  { %5041 = vmatpush1.bf16.msra.mxu0 %v7454_v10  ;;  %5574 = vmatpush1.bf16.msra.mxu1 %v7455_v11  ;;  %v7484_v30 = vld [vmem:[%s11376_s1 + $0xe0] ss:$16 sps:$4 sm:$0xff]   ;;  %v7485_v31 = vld [vmem:[%s11376_s1 + $0xe8] ss:$16 sps:$4 sm:$0xff]   ;;  %v7486_v32 = vld [vmem:[%s11376_s1 + $0x104] ss:$16 sps:$4 sm:$0xff]  }
   0xc   :  { %5042 = vmatprep.subr.bf16.mxu0 %v7456_v12  ;;  %5575 = vmatprep.subr.bf16.mxu1 %v7458_v13  ;;  %v7488_v33 = vld [vmem:[%s11376_s1 + $0x10c] ss:$16 sps:$4 sm:$0xff]   ;;  %v7490_v34 = vld [vmem:[%s11376_s1 + $0x100] ss:$16 sps:$4 sm:$0xff]   ;;  %v7491_v35 = vld [vmem:[%s11376_s1 + $0x108] ss:$16 sps:$4 sm:$0xff]  }
   0xd   :  { %v7492_v36 = vld [vmem:[%s11376_s1 + $0x124] ss:$16 sps:$4 sm:$0xff]   ;;  %v7494_v37 = vld [vmem:[%s11376_s1 + $0x12c] ss:$16 sps:$4 sm:$0xff]   ;;  %v7496_v41 = vld [vmem:[%s11376_s1 + $0x120] ss:$16 sps:$4 sm:$0xff]  }
   0xe   :  { %v7497_v42 = vld [vmem:[%s11376_s1 + $0x128] ss:$16 sps:$4 sm:$0xff]   ;;  %v7498_v43 = vld [vmem:[%s11376_s1 + $0x144] ss:$16 sps:$4 sm:$0xff]   ;;  %v7500_v44 = vld [vmem:[%s11376_s1 + $0x14c] ss:$16 sps:$4 sm:$0xff]  }
   0xf   :  { %5043 = vmatpush1.bf16.msra.mxu0 %v7460_v14  ;;  %5576 = vmatpush1.bf16.msra.mxu1 %v7461_v15  ;;  %v8851_v45 = vshrl.u32 %v824_v38, 7  ;;  %v7502_v47 = vld [vmem:[%s11376_s1 + $0x140] ss:$16 sps:$4 sm:$0xff]   ;;  %v7503_v48 = vld [vmem:[%s11376_s1 + $0x148] ss:$16 sps:$4 sm:$0xff]  }
  0x10   :  { %5044 = vmatprep.subr.bf16.mxu0 %v7462_v16  ;;  %5577 = vmatprep.subr.bf16.mxu1 %v7464_v17  ;;  %v7504_v49 = vld [vmem:[%s11376_s1 + $0x164] ss:$16 sps:$4 sm:$0xff]   ;;  %v7506_v50 = vld [vmem:[%s11376_s1 + $0x16c] ss:$16 sps:$4 sm:$0xff]   ;;  %v7508_v51 = vld [vmem:[%s11376_s1 + $0x160] ss:$16 sps:$4 sm:$0xff]  }
  0x11   :  { %v8869_v52 = vsub.s32 %v866_v46, %v8851_v45  ;;  %v7509_v53 = vld [vmem:[%s11376_s1 + $0x168] ss:$16 sps:$4 sm:$0xff]   ;;  %v7510_v56 = vld [vmem:[%s11376_s1 + $0x184] ss:$16 sps:$4 sm:$0xff]   ;;  %v7512_v57 = vld [vmem:[%s11376_s1 + $0x18c] ss:$16 sps:$4 sm:$0xff]  }
  0x12   :  { %v7534_v54 = vld [vmem:[%s11375_s0] ss:$25 sps:$4 sm:$0xff]   ;;  %v7536_v55 = vld [vmem:[%s11375_s0 + $0x32] ss:$25 sps:$4 sm:$0xff]  }
  0x13   :  { %5045 = vmatpush1.bf16.msra.mxu0 %v7466_v18  ;;  %5578 = vmatpush1.bf16.msra.mxu1 %v7467_v19  ;;  %v870_v58 = vrot.slane %v7534_v54, %v8869_v52  ;;  %v884_v59 = vrot.slane %v7536_v55, %v8869_v52  ;;  %v7514_v60 = vld [vmem:[%s11376_s1 + $0x180] ss:$16 sps:$4 sm:$0xff]   ;;  %v7515_v61 = vld [vmem:[%s11376_s1 + $0x188] ss:$16 sps:$4 sm:$0xff]   ;;  %v7516_v63 = vld [vmem:[%s11376_s1 + $0x1a4] ss:$16 sps:$4 sm:$0xff]  }
  0x14   :  { %5046 = vmatprep.subr.bf16.mxu0 %v7468_v20  ;;  %5579 = vmatprep.subr.bf16.mxu1 %v7470_v21  ;;  %v7518_v0 = vld [vmem:[%s11376_s1 + $0x1ac] ss:$16 sps:$4 sm:$0xff]   ;;  %v7520_v2 = vld [vmem:[%s11376_s1 + $0x1a0] ss:$16 sps:$4 sm:$0xff]   ;;  %v7521_v3 = vld [vmem:[%s11376_s1 + $0x1a8] ss:$16 sps:$4 sm:$0xff]  }
  0x15   :  { %v893_v62 = vcombine.high %v870_v58, %v884_v59  ;;  %v7522_v4 = vld [vmem:[%s11376_s1 + $0x1c4] ss:$16 sps:$4 sm:$0xff]   ;;  %v7524_v5 = vld [vmem:[%s11376_s1 + $0x1cc] ss:$16 sps:$4 sm:$0xff]   ;;  %v7526_v6 = vld [vmem:[%s11376_s1 + $0x1c0] ss:$16 sps:$4 sm:$0xff]   ;;  %v892_v10 = vcombine.low %v870_v58, %v884_v59 }
  0x16   :  { %v7527_v7 = vld [vmem:[%s11376_s1 + $0x1c8] ss:$16 sps:$4 sm:$0xff]   ;;  %v7528_v8 = vld [vmem:[%s11376_s1 + $0x1e4] ss:$16 sps:$4 sm:$0xff]   ;;  %v7530_v9 = vld [vmem:[%s11376_s1 + $0x1ec] ss:$16 sps:$4 sm:$0xff]  }
  0x17   :  { %5047 = vmatpush1.bf16.msra.mxu0 %v7472_v22  ;;  %5580 = vmatpush1.bf16.msra.mxu1 %v7473_v23  ;;  %v916_v1 = vrot.slane %v893_v62, %v8869_v52  ;;  %v7532_v11 = vld [vmem:[%s11376_s1 + $0x1e0] ss:$16 sps:$4 sm:$0xff]   ;;  %v7533_v12 = vld [vmem:[%s11376_s1 + $0x1e8] ss:$16 sps:$4 sm:$0xff]   ;;  %v7540_v13 = vld [vmem:[%s11376_s1 + $0x204] ss:$16 sps:$4 sm:$0xff]   ;;  %v8938_v15 = vrot.slane %v892_v10, %v8869_v52 }
  0x18   :  { %5048 = vmatprep.subr.bf16.mxu0 %v7474_v24  ;;  %5581 = vmatprep.subr.bf16.mxu1 %v7476_v25  ;;  %v7543_v14 = vld [vmem:[%s11376_s1 + $0x20c] ss:$16 sps:$4 sm:$0xff]   ;;  %v7538_v16 = vld [vmem:[%s11376_s1 + $0x200] ss:$16 sps:$4 sm:$0xff]   ;;  %v7541_v17 = vld [vmem:[%s11376_s1 + $0x208] ss:$16 sps:$4 sm:$0xff]  }
  0x19   :  { %5068 = vmatprep.mubr.bf16.mxu0 %v916_v1  ;;  %5601 = vmatprep.mubr.bf16.mxu1 %v916_v1  ;;  %v7546_v18 = vld [vmem:[%s11376_s1 + $0x224] ss:$16 sps:$4 sm:$0xff]   ;;  %v7549_v19 = vld [vmem:[%s11376_s1 + $0x22c] ss:$16 sps:$4 sm:$0xff]   ;;  %v926_v20 = vcombine.high %v916_v1, %v916_v1  ;;  %v7544_v21 = vld [vmem:[%s11376_s1 + $0x220] ss:$16 sps:$4 sm:$0xff]  }
  0x1a   :  { %v7547_v22 = vld [vmem:[%s11376_s1 + $0x228] ss:$16 sps:$4 sm:$0xff]   ;;  %v7552_v23 = vld [vmem:[%s11376_s1 + $0x244] ss:$16 sps:$4 sm:$0xff]   ;;  %v7555_v24 = vld [vmem:[%s11376_s1 + $0x24c] ss:$16 sps:$4 sm:$0xff]  }
  0x1b   :  { %5049 = vmatpush1.bf16.msra.mxu0 %v7478_v26  ;;  %5582 = vmatpush1.bf16.msra.mxu1 %v7479_v27  ;;  %v7550_v25 = vld [vmem:[%s11376_s1 + $0x240] ss:$16 sps:$4 sm:$0xff]   ;;  %v7553_v26 = vld [vmem:[%s11376_s1 + $0x248] ss:$16 sps:$4 sm:$0xff]   ;;  %v7558_v27 = vld [vmem:[%s11376_s1 + $0x264] ss:$16 sps:$4 sm:$0xff]  }
  0x1c   :  { %5050 = vmatprep.subr.bf16.mxu0 %v7480_v28  ;;  %5583 = vmatprep.subr.bf16.mxu1 %v7482_v29  ;;  %v7561_v28 = vld [vmem:[%s11376_s1 + $0x26c] ss:$16 sps:$4 sm:$0xff]   ;;  %v7556_v29 = vld [vmem:[%s11376_s1 + $0x260] ss:$16 sps:$4 sm:$0xff]   ;;  %v7571_v38 = vld [vmem:[%s11376_s1 + $0x2a8] ss:$16 sps:$4 sm:$0xff]  }
  0x1d   :  { %v7576_v39 = vld [vmem:[%s11376_s1 + $0x2c4] ss:$16 sps:$4 sm:$0xff]   ;;  %v7579_v40 = vld [vmem:[%s11376_s1 + $0x2cc] ss:$16 sps:$4 sm:$0xff]   ;;  %v7580_v46 = vld [vmem:[%s11376_s1 + $0x2e0] ss:$16 sps:$4 sm:$0xff]  }
  0x1e   :  { %v7597_v54 = vld [vmem:[%s11376_s1 + $0x32c] ss:$16 sps:$4 sm:$0xff]   ;;  %v7592_v55 = vld [vmem:[%s11376_s1 + $0x320] ss:$16 sps:$4 sm:$0xff]   ;;  %v7612_v1 = vld [vmem:[%s11376_s1 + $0x384] ss:$16 sps:$4 sm:$0xff]  }
  0x1f   :  { %5051 = vmatpush1.bf16.msra.mxu0 %v7484_v30  ;;  %5584 = vmatpush1.bf16.msra.mxu1 %v7485_v31  ;;  %v7559_v30 = vld [vmem:[%s11376_s1 + $0x268] ss:$16 sps:$4 sm:$0xff]   ;;  %v7564_v31 = vld [vmem:[%s11376_s1 + $0x284] ss:$16 sps:$4 sm:$0xff]   ;;  %v7603_v58 = vld [vmem:[%s11376_s1 + $0x34c] ss:$16 sps:$4 sm:$0xff]  }
  0x20   :  { %5052 = vmatprep.subr.bf16.mxu0 %v7486_v32  ;;  %5585 = vmatprep.subr.bf16.mxu1 %v7488_v33  ;;  %v7567_v32 = vld [vmem:[%s11376_s1 + $0x28c] ss:$16 sps:$4 sm:$0xff]   ;;  %v7562_v33 = vld [vmem:[%s11376_s1 + $0x280] ss:$16 sps:$4 sm:$0xff]  }
  0x21   :  { %v7598_v59 = vld [vmem:[%s11376_s1 + $0x340] ss:$16 sps:$4 sm:$0xff]   ;;  %v7609_v62 = vld [vmem:[%s11376_s1 + $0x36c] ss:$16 sps:$4 sm:$0xff]  }
  0x22   :  { %v7627_v10 = vld [vmem:[%s11376_s1 + $0x3cc] ss:$16 sps:$4 sm:$0xff]  }
  0x23   :  { %5053 = vmatpush1.bf16.msra.mxu0 %v7490_v34  ;;  %5586 = vmatpush1.bf16.msra.mxu1 %v7491_v35  ;;  %v7565_v34 = vld [vmem:[%s11376_s1 + $0x288] ss:$16 sps:$4 sm:$0xff]   ;;  %v7570_v35 = vld [vmem:[%s11376_s1 + $0x2a4] ss:$16 sps:$4 sm:$0xff]  }
  0x24   :  { %5054 = vmatprep.subr.bf16.mxu0 %v7492_v36  ;;  %5587 = vmatprep.subr.bf16.mxu1 %v7494_v37  ;;  %v7573_v36 = vld [vmem:[%s11376_s1 + $0x2ac] ss:$16 sps:$4 sm:$0xff]   ;;  %v7568_v37 = vld [vmem:[%s11376_s1 + $0x2a0] ss:$16 sps:$4 sm:$0xff]  }
  0x27   :  { %5055 = vmatpush1.bf16.msra.mxu0 %v7496_v41  ;;  %5588 = vmatpush1.bf16.msra.mxu1 %v7497_v42  ;;  %v7574_v41 = vld [vmem:[%s11376_s1 + $0x2c0] ss:$16 sps:$4 sm:$0xff]   ;;  %v7577_v42 = vld [vmem:[%s11376_s1 + $0x2c8] ss:$16 sps:$4 sm:$0xff]  }
  0x28   :  { %5056 = vmatprep.subr.bf16.mxu0 %v7498_v43  ;;  %5589 = vmatprep.subr.bf16.mxu1 %v7500_v44  ;;  %v7582_v43 = vld [vmem:[%s11376_s1 + $0x2e4] ss:$16 sps:$4 sm:$0xff]   ;;  %v7585_v44 = vld [vmem:[%s11376_s1 + $0x2ec] ss:$16 sps:$4 sm:$0xff]  }
  0x2b   :  { %5057 = vmatpush1.bf16.msra.mxu0 %v7502_v47  ;;  %5590 = vmatpush1.bf16.msra.mxu1 %v7503_v48  ;;  %v7583_v47 = vld [vmem:[%s11376_s1 + $0x2e8] ss:$16 sps:$4 sm:$0xff]   ;;  %v7588_v48 = vld [vmem:[%s11376_s1 + $0x304] ss:$16 sps:$4 sm:$0xff]  }
  0x2c   :  { %5058 = vmatprep.subr.bf16.mxu0 %v7504_v49  ;;  %5591 = vmatprep.subr.bf16.mxu1 %v7506_v50  ;;  %v7591_v49 = vld [vmem:[%s11376_s1 + $0x30c] ss:$16 sps:$4 sm:$0xff]   ;;  %v7586_v50 = vld [vmem:[%s11376_s1 + $0x300] ss:$16 sps:$4 sm:$0xff]  }
  0x2f   :  { %5059 = vmatpush1.bf16.msra.mxu0 %v7508_v51  ;;  %5592 = vmatpush1.bf16.msra.mxu1 %v7509_v53  ;;  %v7589_v51 = vld [vmem:[%s11376_s1 + $0x308] ss:$16 sps:$4 sm:$0xff]   ;;  %v7594_v53 = vld [vmem:[%s11376_s1 + $0x324] ss:$16 sps:$4 sm:$0xff]  }
  0x30   :  { %5060 = vmatprep.subr.bf16.mxu0 %v7510_v56  ;;  %5593 = vmatprep.subr.bf16.mxu1 %v7512_v57  ;;  %v7595_v56 = vld [vmem:[%s11376_s1 + $0x328] ss:$16 sps:$4 sm:$0xff]   ;;  %v7600_v57 = vld [vmem:[%s11376_s1 + $0x344] ss:$16 sps:$4 sm:$0xff]  }
  0x33   :  { %5061 = vmatpush1.bf16.msra.mxu0 %v7514_v60  ;;  %5594 = vmatpush1.bf16.msra.mxu1 %v7515_v61  ;;  %v7601_v60 = vld [vmem:[%s11376_s1 + $0x348] ss:$16 sps:$4 sm:$0xff]   ;;  %v7606_v61 = vld [vmem:[%s11376_s1 + $0x364] ss:$16 sps:$4 sm:$0xff]  }
  0x34   :  { %5062 = vmatprep.subr.bf16.mxu0 %v7516_v63  ;;  %5595 = vmatprep.subr.bf16.mxu1 %v7518_v0  ;;  %v7604_v63 = vld [vmem:[%s11376_s1 + $0x360] ss:$16 sps:$4 sm:$0xff]   ;;  %v7607_v0 = vld [vmem:[%s11376_s1 + $0x368] ss:$16 sps:$4 sm:$0xff]  }
  0x37   :  { %5063 = vmatpush1.bf16.msra.mxu0 %v7520_v2  ;;  %5596 = vmatpush1.bf16.msra.mxu1 %v7521_v3  ;;  %v7615_v2 = vld [vmem:[%s11376_s1 + $0x38c] ss:$16 sps:$4 sm:$0xff]   ;;  %v7610_v3 = vld [vmem:[%s11376_s1 + $0x380] ss:$16 sps:$4 sm:$0xff]  }
  0x38   :  { %5064 = vmatprep.subr.bf16.mxu0 %v7522_v4  ;;  %5597 = vmatprep.subr.bf16.mxu1 %v7524_v5  ;;  %v7613_v4 = vld [vmem:[%s11376_s1 + $0x388] ss:$16 sps:$4 sm:$0xff]   ;;  %v7618_v5 = vld [vmem:[%s11376_s1 + $0x3a4] ss:$16 sps:$4 sm:$0xff]  }
  0x3b   :  { %5065 = vmatpush1.bf16.msra.mxu0 %v7526_v6  ;;  %5598 = vmatpush1.bf16.msra.mxu1 %v7527_v7  ;;  %v7621_v6 = vld [vmem:[%s11376_s1 + $0x3ac] ss:$16 sps:$4 sm:$0xff]   ;;  %v7616_v7 = vld [vmem:[%s11376_s1 + $0x3a0] ss:$16 sps:$4 sm:$0xff]  }
  0x3c   :  { %5066 = vmatprep.subr.bf16.mxu0 %v7528_v8  ;;  %5599 = vmatprep.subr.bf16.mxu1 %v7530_v9  ;;  %v7619_v8 = vld [vmem:[%s11376_s1 + $0x3a8] ss:$16 sps:$4 sm:$0xff]   ;;  %v7624_v9 = vld [vmem:[%s11376_s1 + $0x3c4] ss:$16 sps:$4 sm:$0xff]  }
  0x3f   :  { %5067 = vmatpush1.bf16.msra.mxu0 %v7532_v11  ;;  %5600 = vmatpush1.bf16.msra.mxu1 %v7533_v12  ;;  %v7622_v11 = vld [vmem:[%s11376_s1 + $0x3c0] ss:$16 sps:$4 sm:$0xff]   ;;  %v7625_v12 = vld [vmem:[%s11376_s1 + $0x3c8] ss:$16 sps:$4 sm:$0xff]  }
  0x40   :  { %5077 = vmatprep.subr.bf16.mxu0 %v7540_v13  ;;  %5610 = vmatprep.subr.bf16.mxu1 %v7543_v14  ;;  %v7630_v13 = vld [vmem:[%s11376_s1 + $0x3e4] ss:$16 sps:$4 sm:$0xff]   ;;  %v7633_v14 = vld [vmem:[%s11376_s1 + $0x3ec] ss:$16 sps:$4 sm:$0xff]  }
  0x42   :  { %5069 = vmatmul.mubr.bf16.vlgmr.msra.gmra.mrb[0].mxu0 %v8938_v15  ;;  %5602 = vmatmul.mubr.bf16.vlgmr.msra.gmra.mrb[0].mxu1 %v8938_v15 }
  0x43   :  { %5078 = vmatpush1.bf16.msra.mxu0 %v7538_v16  ;;  %5611 = vmatpush1.bf16.msra.mxu1 %v7541_v17  ;;  %v7628_v16 = vld [vmem:[%s11376_s1 + $0x3e0] ss:$16 sps:$4 sm:$0xff]   ;;  %v7631_v17 = vld [vmem:[%s11376_s1 + $0x3e8] ss:$16 sps:$4 sm:$0xff]  }
  0x44   :  { %5079 = vmatprep.subr.bf16.mxu0 %v7546_v18  ;;  %5612 = vmatprep.subr.bf16.mxu1 %v7549_v19  ;;  %v7636_v18 = vld [vmem:[%s11376_s1 + $0x404] ss:$16 sps:$4 sm:$0xff]   ;;  %v7639_v19 = vld [vmem:[%s11376_s1 + $0x40c] ss:$16 sps:$4 sm:$0xff]  }
  0x45   :  { %5109 = vmatprep.mubr.bf16.mxu0 %v926_v20  ;;  %5642 = vmatprep.mubr.bf16.mxu1 %v926_v20  ;;  %v924_v20 = vcombine.high %v8938_v15, %v8938_v15  ;;  %v7645_v15 = vld [vmem:[%s11376_s1 + $0x42c] ss:$16 sps:$4 sm:$0xff]  }
  0x47   :  { %5080 = vmatpush1.bf16.msra.mxu0 %v7544_v21  ;;  %5613 = vmatpush1.bf16.msra.mxu1 %v7547_v22  ;;  %v7634_v21 = vld [vmem:[%s11376_s1 + $0x400] ss:$16 sps:$4 sm:$0xff]   ;;  %v7637_v22 = vld [vmem:[%s11376_s1 + $0x408] ss:$16 sps:$4 sm:$0xff]  }
  0x48   :  { %5081 = vmatprep.subr.bf16.mxu0 %v7552_v23  ;;  %5614 = vmatprep.subr.bf16.mxu1 %v7555_v24  ;;  %v7642_v23 = vld [vmem:[%s11376_s1 + $0x424] ss:$16 sps:$4 sm:$0xff]  }
  0x49   :  { %v7730_v24 = vld [vmem:[%s11375_s0 + $0x4] ss:$25 sps:$4 sm:$0xff]  }
  0x4b   :  { %5082 = vmatpush1.bf16.msra.mxu0 %v7550_v25  ;;  %5615 = vmatpush1.bf16.msra.mxu1 %v7553_v26  ;;  %v7731_v25 = vld [vmem:[%s11375_s0 + $0x36] ss:$25 sps:$4 sm:$0xff]  }
  0x4c   :  { %5083 = vmatprep.subr.bf16.mxu0 %v7558_v27  ;;  %5616 = vmatprep.subr.bf16.mxu1 %v7561_v28  ;;  %v7640_v26 = vld [vmem:[%s11376_s1 + $0x420] ss:$16 sps:$4 sm:$0xff]   ;;  %v9158_v27 = vrot.slane %v7730_v24, %v8869_v52  ;;  %v9161_v28 = vrot.slane %v7731_v25, %v8869_v52 }
  0x4d   :  { %v7724_v25 = vld [vmem:[%s11376_s1 + $0x5e0] ss:$16 sps:$4 sm:$0xff]  }
  0x4e   :  { %v894_v24 = vcombine.low %v9158_v27, %v9161_v28 }
  0x4f   :  { %5084 = vmatpush1.bf16.msra.mxu0 %v7556_v29  ;;  %5617 = vmatpush1.bf16.msra.mxu1 %v7559_v30  ;;  %v7643_v29 = vld [vmem:[%s11376_s1 + $0x428] ss:$16 sps:$4 sm:$0xff]   ;;  %v7648_v30 = vld [vmem:[%s11376_s1 + $0x444] ss:$16 sps:$4 sm:$0xff]  }
  0x50   :  { %5085 = vmatprep.subr.bf16.mxu0 %v7564_v31  ;;  %5618 = vmatprep.subr.bf16.mxu1 %v7567_v32  ;;  %v7651_v31 = vld [vmem:[%s11376_s1 + $0x44c] ss:$16 sps:$4 sm:$0xff]   ;;  %v895_v32 = vcombine.high %v9158_v27, %v9161_v28  ;;  %v9350_v28 = vrot.slane %v894_v24, %v8869_v52 }
  0x51   :  { %v7737_v27 = vld [vmem:[%s11376_s1 + $0x60c] ss:$16 sps:$4 sm:$0xff]  }
  0x52   :  { %v7821_v24 = vld [vmem:[%s11376_s1 + $0x7cc] ss:$16 sps:$4 sm:$0xff]  }
  0x53   :  { %5086 = vmatpush1.bf16.msra.mxu0 %v7562_v33  ;;  %5619 = vmatpush1.bf16.msra.mxu1 %v7565_v34  ;;  %v7646_v33 = vld [vmem:[%s11376_s1 + $0x440] ss:$16 sps:$4 sm:$0xff]   ;;  %v9178_v34 = vrot.slane %v895_v32, %v8869_v52  ;;  %v7740_v32 = vld [vmem:[%s11376_s1 + $0x624] ss:$16 sps:$4 sm:$0xff]  }
  0x54   :  { %5087 = vmatprep.subr.bf16.mxu0 %v7570_v35  ;;  %5620 = vmatprep.subr.bf16.mxu1 %v7573_v36  ;;  %v7649_v35 = vld [vmem:[%s11376_s1 + $0x448] ss:$16 sps:$4 sm:$0xff]   ;;  %v7654_v36 = vld [vmem:[%s11376_s1 + $0x464] ss:$16 sps:$4 sm:$0xff]  }
  0x57   :  { %5088 = vmatpush1.bf16.msra.mxu0 %v7568_v37  ;;  %5621 = vmatpush1.bf16.msra.mxu1 %v7571_v38  ;;  %v7657_v37 = vld [vmem:[%s11376_s1 + $0x46c] ss:$16 sps:$4 sm:$0xff]   ;;  %v7652_v38 = vld [vmem:[%s11376_s1 + $0x460] ss:$16 sps:$4 sm:$0xff]  }
  0x58   :  { %5089 = vmatprep.subr.bf16.mxu0 %v7576_v39  ;;  %5622 = vmatprep.subr.bf16.mxu1 %v7579_v40  ;;  %v7655_v39 = vld [vmem:[%s11376_s1 + $0x468] ss:$16 sps:$4 sm:$0xff]   ;;  %v7660_v40 = vld [vmem:[%s11376_s1 + $0x484] ss:$16 sps:$4 sm:$0xff]  }
  0x5b   :  { %5090 = vmatpush1.bf16.msra.mxu0 %v7574_v41  ;;  %5623 = vmatpush1.bf16.msra.mxu1 %v7577_v42  ;;  %v7663_v41 = vld [vmem:[%s11376_s1 + $0x48c] ss:$16 sps:$4 sm:$0xff]   ;;  %v7658_v42 = vld [vmem:[%s11376_s1 + $0x480] ss:$16 sps:$4 sm:$0xff]  }
  0x5c   :  { %5091 = vmatprep.subr.bf16.mxu0 %v7582_v43  ;;  %5624 = vmatprep.subr.bf16.mxu1 %v7585_v44  ;;  %v7661_v43 = vld [vmem:[%s11376_s1 + $0x488] ss:$16 sps:$4 sm:$0xff]   ;;  %v7666_v44 = vld [vmem:[%s11376_s1 + $0x4a4] ss:$16 sps:$4 sm:$0xff]  }
  0x5f   :  { %5092 = vmatpush1.bf16.msra.mxu0 %v7580_v46  ;;  %5625 = vmatpush1.bf16.msra.mxu1 %v7583_v47  ;;  %v7669_v46 = vld [vmem:[%s11376_s1 + $0x4ac] ss:$16 sps:$4 sm:$0xff]   ;;  %v7664_v47 = vld [vmem:[%s11376_s1 + $0x4a0] ss:$16 sps:$4 sm:$0xff]  }
  0x60   :  { %5093 = vmatprep.subr.bf16.mxu0 %v7588_v48  ;;  %5626 = vmatprep.subr.bf16.mxu1 %v7591_v49  ;;  %v7667_v48 = vld [vmem:[%s11376_s1 + $0x4a8] ss:$16 sps:$4 sm:$0xff]   ;;  %v7672_v49 = vld [vmem:[%s11376_s1 + $0x4c4] ss:$16 sps:$4 sm:$0xff]  }
  0x63   :  { %5094 = vmatpush1.bf16.msra.mxu0 %v7586_v50  ;;  %5627 = vmatpush1.bf16.msra.mxu1 %v7589_v51  ;;  %v7675_v50 = vld [vmem:[%s11376_s1 + $0x4cc] ss:$16 sps:$4 sm:$0xff]   ;;  %v7670_v51 = vld [vmem:[%s11376_s1 + $0x4c0] ss:$16 sps:$4 sm:$0xff]  }
  0x64   :  { %5095 = vmatprep.subr.bf16.mxu0 %v7594_v53  ;;  %5628 = vmatprep.subr.bf16.mxu1 %v7597_v54  ;;  %v7673_v53 = vld [vmem:[%s11376_s1 + $0x4c8] ss:$16 sps:$4 sm:$0xff]   ;;  %v7678_v54 = vld [vmem:[%s11376_s1 + $0x4e4] ss:$16 sps:$4 sm:$0xff]  }
  0x67   :  { %5096 = vmatpush1.bf16.msra.mxu0 %v7592_v55  ;;  %5629 = vmatpush1.bf16.msra.mxu1 %v7595_v56  ;;  %v7681_v55 = vld [vmem:[%s11376_s1 + $0x4ec] ss:$16 sps:$4 sm:$0xff]   ;;  %v7676_v56 = vld [vmem:[%s11376_s1 + $0x4e0] ss:$16 sps:$4 sm:$0xff]  }
  0x68   :  { %5097 = vmatprep.subr.bf16.mxu0 %v7600_v57  ;;  %5630 = vmatprep.subr.bf16.mxu1 %v7603_v58  ;;  %v7679_v57 = vld [vmem:[%s11376_s1 + $0x4e8] ss:$16 sps:$4 sm:$0xff]   ;;  %v7684_v58 = vld [vmem:[%s11376_s1 + $0x504] ss:$16 sps:$4 sm:$0xff]  }
  0x6b   :  { %5098 = vmatpush1.bf16.msra.mxu0 %v7598_v59  ;;  %5631 = vmatpush1.bf16.msra.mxu1 %v7601_v60  ;;  %v7687_v59 = vld [vmem:[%s11376_s1 + $0x50c] ss:$16 sps:$4 sm:$0xff]   ;;  %v7682_v60 = vld [vmem:[%s11376_s1 + $0x500] ss:$16 sps:$4 sm:$0xff]  }
  0x6c   :  { %5099 = vmatprep.subr.bf16.mxu0 %v7606_v61  ;;  %5632 = vmatprep.subr.bf16.mxu1 %v7609_v62  ;;  %v7685_v61 = vld [vmem:[%s11376_s1 + $0x508] ss:$16 sps:$4 sm:$0xff]   ;;  %v7690_v62 = vld [vmem:[%s11376_s1 + $0x524] ss:$16 sps:$4 sm:$0xff]  }
  0x6f   :  { %5100 = vmatpush1.bf16.msra.mxu0 %v7604_v63  ;;  %5633 = vmatpush1.bf16.msra.mxu1 %v7607_v0  ;;  %v7693_v63 = vld [vmem:[%s11376_s1 + $0x52c] ss:$16 sps:$4 sm:$0xff]   ;;  %v7688_v0 = vld [vmem:[%s11376_s1 + $0x520] ss:$16 sps:$4 sm:$0xff]  }
  0x70   :  { %5101 = vmatprep.subr.bf16.mxu0 %v7612_v1  ;;  %5634 = vmatprep.subr.bf16.mxu1 %v7615_v2  ;;  %v7691_v1 = vld [vmem:[%s11376_s1 + $0x528] ss:$16 sps:$4 sm:$0xff]   ;;  %v7696_v2 = vld [vmem:[%s11376_s1 + $0x544] ss:$16 sps:$4 sm:$0xff]  }
  0x73   :  { %5102 = vmatpush1.bf16.msra.mxu0 %v7610_v3  ;;  %5635 = vmatpush1.bf16.msra.mxu1 %v7613_v4  ;;  %v7699_v3 = vld [vmem:[%s11376_s1 + $0x54c] ss:$16 sps:$4 sm:$0xff]   ;;  %v7694_v4 = vld [vmem:[%s11376_s1 + $0x540] ss:$16 sps:$4 sm:$0xff]  }
  0x74   :  { %5103 = vmatprep.subr.bf16.mxu0 %v7618_v5  ;;  %5636 = vmatprep.subr.bf16.mxu1 %v7621_v6  ;;  %v7697_v5 = vld [vmem:[%s11376_s1 + $0x548] ss:$16 sps:$4 sm:$0xff]   ;;  %v7702_v6 = vld [vmem:[%s11376_s1 + $0x564] ss:$16 sps:$4 sm:$0xff]  }
  0x77   :  { %5104 = vmatpush1.bf16.msra.mxu0 %v7616_v7  ;;  %5637 = vmatpush1.bf16.msra.mxu1 %v7619_v8  ;;  %v7705_v7 = vld [vmem:[%s11376_s1 + $0x56c] ss:$16 sps:$4 sm:$0xff]   ;;  %v7700_v8 = vld [vmem:[%s11376_s1 + $0x560] ss:$16 sps:$4 sm:$0xff]  }
  0x78   :  { %5105 = vmatprep.subr.bf16.mxu0 %v7624_v9  ;;  %5638 = vmatprep.subr.bf16.mxu1 %v7627_v10  ;;  %v7703_v9 = vld [vmem:[%s11376_s1 + $0x568] ss:$16 sps:$4 sm:$0xff]   ;;  %v7708_v10 = vld [vmem:[%s11376_s1 + $0x584] ss:$16 sps:$4 sm:$0xff]  }
  0x7b   :  { %5106 = vmatpush1.bf16.msra.mxu0 %v7622_v11  ;;  %5639 = vmatpush1.bf16.msra.mxu1 %v7625_v12  ;;  %v7711_v11 = vld [vmem:[%s11376_s1 + $0x58c] ss:$16 sps:$4 sm:$0xff]   ;;  %v7706_v12 = vld [vmem:[%s11376_s1 + $0x580] ss:$16 sps:$4 sm:$0xff]  }
  0x7c   :  { %5107 = vmatprep.subr.bf16.mxu0 %v7630_v13  ;;  %5640 = vmatprep.subr.bf16.mxu1 %v7633_v14  ;;  %v7709_v13 = vld [vmem:[%s11376_s1 + $0x588] ss:$16 sps:$4 sm:$0xff]   ;;  %v7714_v14 = vld [vmem:[%s11376_s1 + $0x5a4] ss:$16 sps:$4 sm:$0xff]  }
  0x7f   :  { %5108 = vmatpush1.bf16.msra.mxu0 %v7628_v16  ;;  %5641 = vmatpush1.bf16.msra.mxu1 %v7631_v17  ;;  %v7717_v16 = vld [vmem:[%s11376_s1 + $0x5ac] ss:$16 sps:$4 sm:$0xff]   ;;  %v7712_v17 = vld [vmem:[%s11376_s1 + $0x5a0] ss:$16 sps:$4 sm:$0xff]  }
  0x80   :  { %5118 = vmatprep.subr.bf16.mxu0 %v7636_v18  ;;  %5651 = vmatprep.subr.bf16.mxu1 %v7639_v19  ;;  %v7715_v18 = vld [vmem:[%s11376_s1 + $0x5a8] ss:$16 sps:$4 sm:$0xff]   ;;  %v7720_v19 = vld [vmem:[%s11376_s1 + $0x5c4] ss:$16 sps:$4 sm:$0xff]  }
  0x82   :  { %5110 = vmatmul.mubr.bf16.vlgmr.msra.gmra.mrb[0].mxu0 %v924_v20  ;;  %5643 = vmatmul.mubr.bf16.vlgmr.msra.gmra.mrb[0].mxu1 %v924_v20  ;;  %v7723_v20 = vld [vmem:[%s11376_s1 + $0x5cc] ss:$16 sps:$4 sm:$0xff]  }
  0x83   :  { %5119 = vmatpush1.bf16.msra.mxu0 %v7634_v21  ;;  %5652 = vmatpush1.bf16.msra.mxu1 %v7637_v22  ;;  %v7718_v21 = vld [vmem:[%s11376_s1 + $0x5c0] ss:$16 sps:$4 sm:$0xff]   ;;  %v7721_v22 = vld [vmem:[%s11376_s1 + $0x5c8] ss:$16 sps:$4 sm:$0xff]  }
  0x84   :  { %5120 = vmatprep.subr.bf16.mxu0 %v7642_v23  ;;  %5653 = vmatprep.subr.bf16.mxu1 %v7645_v15  ;;  %v7726_v23 = vld [vmem:[%s11376_s1 + $0x5e4] ss:$16 sps:$4 sm:$0xff]   ;;  %v7729_v15 = vld [vmem:[%s11376_s1 + $0x5ec] ss:$16 sps:$4 sm:$0xff]  }
  0x85   :  { %5150 = vmatprep.mubr.bf16.mxu0 %v9178_v34  ;;  %5683 = vmatprep.mubr.bf16.mxu1 %v9178_v34 }
  0x87   :  { %5121 = vmatpush1.bf16.msra.mxu0 %v7640_v26  ;;  %5654 = vmatpush1.bf16.msra.mxu1 %v7643_v29  ;;  %v7727_v26 = vld [vmem:[%s11376_s1 + $0x5e8] ss:$16 sps:$4 sm:$0xff]   ;;  %v7734_v29 = vld [vmem:[%s11376_s1 + $0x604] ss:$16 sps:$4 sm:$0xff]  }
  0x88   :  { %5122 = vmatprep.subr.bf16.mxu0 %v7648_v30  ;;  %5655 = vmatprep.subr.bf16.mxu1 %v7651_v31  ;;  %v7732_v30 = vld [vmem:[%s11376_s1 + $0x600] ss:$16 sps:$4 sm:$0xff]   ;;  %v7735_v31 = vld [vmem:[%s11376_s1 + $0x608] ss:$16 sps:$4 sm:$0xff]  }
  0x8b   :  { %5123 = vmatpush1.bf16.msra.mxu0 %v7646_v33  ;;  %5656 = vmatpush1.bf16.msra.mxu1 %v7649_v35  ;;  %v7743_v33 = vld [vmem:[%s11376_s1 + $0x62c] ss:$16 sps:$4 sm:$0xff]   ;;  %v927_v35 = vcombine.high %v9178_v34, %v9178_v34 }
  0x8c   :  { %5124 = vmatprep.subr.bf16.mxu0 %v7654_v36  ;;  %5657 = vmatprep.subr.bf16.mxu1 %v7657_v37  ;;  %v7738_v36 = vld [vmem:[%s11376_s1 + $0x620] ss:$16 sps:$4 sm:$0xff]   ;;  %v7741_v37 = vld [vmem:[%s11376_s1 + $0x628] ss:$16 sps:$4 sm:$0xff]   ;;  %v7749_v34 = vld [vmem:[%s11376_s1 + $0x64c] ss:$16 sps:$4 sm:$0xff]  }
  0x8f   :  { %5125 = vmatpush1.bf16.msra.mxu0 %v7652_v38  ;;  %5658 = vmatpush1.bf16.msra.mxu1 %v7655_v39  ;;  %v7746_v38 = vld [vmem:[%s11376_s1 + $0x644] ss:$16 sps:$4 sm:$0xff]   ;;  %v7744_v39 = vld [vmem:[%s11376_s1 + $0x640] ss:$16 sps:$4 sm:$0xff]  }
  0x90   :  { %5126 = vmatprep.subr.bf16.mxu0 %v7660_v40  ;;  %5659 = vmatprep.subr.bf16.mxu1 %v7663_v41  ;;  %v7747_v40 = vld [vmem:[%s11376_s1 + $0x648] ss:$16 sps:$4 sm:$0xff]   ;;  %v7752_v41 = vld [vmem:[%s11376_s1 + $0x664] ss:$16 sps:$4 sm:$0xff]  }
  0x93   :  { %5127 = vmatpush1.bf16.msra.mxu0 %v7658_v42  ;;  %5660 = vmatpush1.bf16.msra.mxu1 %v7661_v43  ;;  %v7755_v42 = vld [vmem:[%s11376_s1 + $0x66c] ss:$16 sps:$4 sm:$0xff]   ;;  %v7750_v43 = vld [vmem:[%s11376_s1 + $0x660] ss:$16 sps:$4 sm:$0xff]  }
  0x94   :  { %5128 = vmatprep.subr.bf16.mxu0 %v7666_v44  ;;  %5661 = vmatprep.subr.bf16.mxu1 %v7669_v46  ;;  %v7753_v44 = vld [vmem:[%s11376_s1 + $0x668] ss:$16 sps:$4 sm:$0xff]   ;;  %v7758_v46 = vld [vmem:[%s11376_s1 + $0x684] ss:$16 sps:$4 sm:$0xff]  }
  0x97   :  { %5129 = vmatpush1.bf16.msra.mxu0 %v7664_v47  ;;  %5662 = vmatpush1.bf16.msra.mxu1 %v7667_v48  ;;  %v7761_v47 = vld [vmem:[%s11376_s1 + $0x68c] ss:$16 sps:$4 sm:$0xff]   ;;  %v7756_v48 = vld [vmem:[%s11376_s1 + $0x680] ss:$16 sps:$4 sm:$0xff]  }
  0x98   :  { %5130 = vmatprep.subr.bf16.mxu0 %v7672_v49  ;;  %5663 = vmatprep.subr.bf16.mxu1 %v7675_v50  ;;  %v7759_v49 = vld [vmem:[%s11376_s1 + $0x688] ss:$16 sps:$4 sm:$0xff]   ;;  %v7764_v50 = vld [vmem:[%s11376_s1 + $0x6a4] ss:$16 sps:$4 sm:$0xff]  }
  0x9b   :  { %5131 = vmatpush1.bf16.msra.mxu0 %v7670_v51  ;;  %5664 = vmatpush1.bf16.msra.mxu1 %v7673_v53  ;;  %v7767_v51 = vld [vmem:[%s11376_s1 + $0x6ac] ss:$16 sps:$4 sm:$0xff]   ;;  %v7762_v53 = vld [vmem:[%s11376_s1 + $0x6a0] ss:$16 sps:$4 sm:$0xff]  }
  0x9c   :  { %5132 = vmatprep.subr.bf16.mxu0 %v7678_v54  ;;  %5665 = vmatprep.subr.bf16.mxu1 %v7681_v55  ;;  %v7765_v54 = vld [vmem:[%s11376_s1 + $0x6a8] ss:$16 sps:$4 sm:$0xff]   ;;  %v7770_v55 = vld [vmem:[%s11376_s1 + $0x6c4] ss:$16 sps:$4 sm:$0xff]  }
  0x9f   :  { %5133 = vmatpush1.bf16.msra.mxu0 %v7676_v56  ;;  %5666 = vmatpush1.bf16.msra.mxu1 %v7679_v57  ;;  %v7773_v56 = vld [vmem:[%s11376_s1 + $0x6cc] ss:$16 sps:$4 sm:$0xff]   ;;  %v7768_v57 = vld [vmem:[%s11376_s1 + $0x6c0] ss:$16 sps:$4 sm:$0xff]  }
  0xa0   :  { %5134 = vmatprep.subr.bf16.mxu0 %v7684_v58  ;;  %5667 = vmatprep.subr.bf16.mxu1 %v7687_v59  ;;  %v7771_v58 = vld [vmem:[%s11376_s1 + $0x6c8] ss:$16 sps:$4 sm:$0xff]   ;;  %v7776_v59 = vld [vmem:[%s11376_s1 + $0x6e4] ss:$16 sps:$4 sm:$0xff]  }
  0xa3   :  { %5135 = vmatpush1.bf16.msra.mxu0 %v7682_v60  ;;  %5668 = vmatpush1.bf16.msra.mxu1 %v7685_v61  ;;  %v7779_v60 = vld [vmem:[%s11376_s1 + $0x6ec] ss:$16 sps:$4 sm:$0xff]   ;;  %v7774_v61 = vld [vmem:[%s11376_s1 + $0x6e0] ss:$16 sps:$4 sm:$0xff]  }
  0xa4   :  { %5136 = vmatprep.subr.bf16.mxu0 %v7690_v62  ;;  %5669 = vmatprep.subr.bf16.mxu1 %v7693_v63  ;;  %v7777_v62 = vld [vmem:[%s11376_s1 + $0x6e8] ss:$16 sps:$4 sm:$0xff]   ;;  %v7782_v63 = vld [vmem:[%s11376_s1 + $0x704] ss:$16 sps:$4 sm:$0xff]  }
  0xa7   :  { %5137 = vmatpush1.bf16.msra.mxu0 %v7688_v0  ;;  %5670 = vmatpush1.bf16.msra.mxu1 %v7691_v1  ;;  %v7785_v0 = vld [vmem:[%s11376_s1 + $0x70c] ss:$16 sps:$4 sm:$0xff]   ;;  %v7780_v1 = vld [vmem:[%s11376_s1 + $0x700] ss:$16 sps:$4 sm:$0xff]  }
  0xa8   :  { %5138 = vmatprep.subr.bf16.mxu0 %v7696_v2  ;;  %5671 = vmatprep.subr.bf16.mxu1 %v7699_v3  ;;  %v7783_v2 = vld [vmem:[%s11376_s1 + $0x708] ss:$16 sps:$4 sm:$0xff]   ;;  %v7788_v3 = vld [vmem:[%s11376_s1 + $0x724] ss:$16 sps:$4 sm:$0xff]  }
  0xab   :  { %5139 = vmatpush1.bf16.msra.mxu0 %v7694_v4  ;;  %5672 = vmatpush1.bf16.msra.mxu1 %v7697_v5  ;;  %v7791_v4 = vld [vmem:[%s11376_s1 + $0x72c] ss:$16 sps:$4 sm:$0xff]   ;;  %v7786_v5 = vld [vmem:[%s11376_s1 + $0x720] ss:$16 sps:$4 sm:$0xff]  }
  0xac   :  { %5140 = vmatprep.subr.bf16.mxu0 %v7702_v6  ;;  %5673 = vmatprep.subr.bf16.mxu1 %v7705_v7  ;;  %v7789_v6 = vld [vmem:[%s11376_s1 + $0x728] ss:$16 sps:$4 sm:$0xff]   ;;  %v7794_v7 = vld [vmem:[%s11376_s1 + $0x744] ss:$16 sps:$4 sm:$0xff]  }
  0xaf   :  { %5141 = vmatpush1.bf16.msra.mxu0 %v7700_v8  ;;  %5674 = vmatpush1.bf16.msra.mxu1 %v7703_v9  ;;  %v7797_v8 = vld [vmem:[%s11376_s1 + $0x74c] ss:$16 sps:$4 sm:$0xff]   ;;  %v7792_v9 = vld [vmem:[%s11376_s1 + $0x740] ss:$16 sps:$4 sm:$0xff]  }
  0xb0   :  { %5142 = vmatprep.subr.bf16.mxu0 %v7708_v10  ;;  %5675 = vmatprep.subr.bf16.mxu1 %v7711_v11  ;;  %v7795_v10 = vld [vmem:[%s11376_s1 + $0x748] ss:$16 sps:$4 sm:$0xff]   ;;  %v7800_v11 = vld [vmem:[%s11376_s1 + $0x764] ss:$16 sps:$4 sm:$0xff]  }
  0xb3   :  { %5143 = vmatpush1.bf16.msra.mxu0 %v7706_v12  ;;  %5676 = vmatpush1.bf16.msra.mxu1 %v7709_v13  ;;  %v7803_v12 = vld [vmem:[%s11376_s1 + $0x76c] ss:$16 sps:$4 sm:$0xff]   ;;  %v7798_v13 = vld [vmem:[%s11376_s1 + $0x760] ss:$16 sps:$4 sm:$0xff]  }
  0xb4   :  { %5144 = vmatprep.subr.bf16.mxu0 %v7714_v14  ;;  %5677 = vmatprep.subr.bf16.mxu1 %v7717_v16  ;;  %v7801_v14 = vld [vmem:[%s11376_s1 + $0x768] ss:$16 sps:$4 sm:$0xff]   ;;  %v7806_v16 = vld [vmem:[%s11376_s1 + $0x784] ss:$16 sps:$4 sm:$0xff]  }
  0xb7   :  { %5145 = vmatpush1.bf16.msra.mxu0 %v7712_v17  ;;  %5678 = vmatpush1.bf16.msra.mxu1 %v7715_v18  ;;  %v7809_v17 = vld [vmem:[%s11376_s1 + $0x78c] ss:$16 sps:$4 sm:$0xff]   ;;  %v7804_v18 = vld [vmem:[%s11376_s1 + $0x780] ss:$16 sps:$4 sm:$0xff]  }
  0xb8   :  { %5146 = vmatprep.subr.bf16.mxu0 %v7720_v19  ;;  %5679 = vmatprep.subr.bf16.mxu1 %v7723_v20  ;;  %v7807_v19 = vld [vmem:[%s11376_s1 + $0x788] ss:$16 sps:$4 sm:$0xff]   ;;  %v7812_v20 = vld [vmem:[%s11376_s1 + $0x7a4] ss:$16 sps:$4 sm:$0xff]  }
  0xbb   :  { %5147 = vmatpush1.bf16.msra.mxu0 %v7718_v21  ;;  %5680 = vmatpush1.bf16.msra.mxu1 %v7721_v22  ;;  %v7815_v21 = vld [vmem:[%s11376_s1 + $0x7ac] ss:$16 sps:$4 sm:$0xff]   ;;  %v7810_v22 = vld [vmem:[%s11376_s1 + $0x7a0] ss:$16 sps:$4 sm:$0xff]  }
  0xbc   :  { %5148 = vmatprep.subr.bf16.mxu0 %v7726_v23  ;;  %5681 = vmatprep.subr.bf16.mxu1 %v7729_v15  ;;  %v7813_v23 = vld [vmem:[%s11376_s1 + $0x7a8] ss:$16 sps:$4 sm:$0xff]   ;;  %v7818_v15 = vld [vmem:[%s11376_s1 + $0x7c4] ss:$16 sps:$4 sm:$0xff]  }
  0xbf   :  { %5149 = vmatpush1.bf16.msra.mxu0 %v7724_v25  ;;  %5682 = vmatpush1.bf16.msra.mxu1 %v7727_v26  ;;  %v7924_v25 = vld [vmem:[%s11375_s0 + $0x8] ss:$25 sps:$4 sm:$0xff]   ;;  %v7926_v26 = vld [vmem:[%s11375_s0 + $0x3a] ss:$25 sps:$4 sm:$0xff]  }
  0xc0   :  { %5159 = vmatprep.subr.bf16.mxu0 %v7734_v29  ;;  %5692 = vmatprep.subr.bf16.mxu1 %v7737_v27  ;;  %v7816_v29 = vld [vmem:[%s11376_s1 + $0x7c0] ss:$16 sps:$4 sm:$0xff]   ;;  %v7819_v27 = vld [vmem:[%s11376_s1 + $0x7c8] ss:$16 sps:$4 sm:$0xff]  }
  0xc2   :  { %5151 = vmatmul.mubr.bf16.vlgmr.msra.gmra.mrb[0].mxu0 %v9350_v28  ;;  %5684 = vmatmul.mubr.bf16.vlgmr.msra.gmra.mrb[0].mxu1 %v9350_v28 }
  0xc3   :  { %5160 = vmatpush1.bf16.msra.mxu0 %v7732_v30  ;;  %5693 = vmatpush1.bf16.msra.mxu1 %v7735_v31  ;;  %v7824_v30 = vld [vmem:[%s11376_s1 + $0x7e4] ss:$16 sps:$4 sm:$0xff]   ;;  %v7827_v31 = vld [vmem:[%s11376_s1 + $0x7ec] ss:$16 sps:$4 sm:$0xff]  }
  0xc4   :  { %5161 = vmatprep.subr.bf16.mxu0 %v7740_v32  ;;  %5694 = vmatprep.subr.bf16.mxu1 %v7743_v33  ;;  %v9543_v32 = vrot.slane %v7924_v25, %v8869_v52  ;;  %v9546_v33 = vrot.slane %v7926_v26, %v8869_v52  ;;  %v7900_v25 = vld [vmem:[%s11376_s1 + $0x980] ss:$16 sps:$4 sm:$0xff]   ;;  %v7905_v26 = vld [vmem:[%s11376_s1 + $0x98c] ss:$16 sps:$4 sm:$0xff]  }
  0xc5   :  { %5191 = vmatprep.mubr.bf16.mxu0 %v927_v35  ;;  %5724 = vmatprep.mubr.bf16.mxu1 %v927_v35  ;;  %v7822_v35 = vld [vmem:[%s11376_s1 + $0x7e0] ss:$16 sps:$4 sm:$0xff]  }
  0xc7   :  { %5162 = vmatpush1.bf16.msra.mxu0 %v7738_v36  ;;  %5695 = vmatpush1.bf16.msra.mxu1 %v7741_v37  ;;  %v7825_v36 = vld [vmem:[%s11376_s1 + $0x7e8] ss:$16 sps:$4 sm:$0xff]   ;;  %v7830_v37 = vld [vmem:[%s11376_s1 + $0x804] ss:$16 sps:$4 sm:$0xff]  }
  0xc8   :  { %5163 = vmatprep.subr.bf16.mxu0 %v7746_v38  ;;  %5696 = vmatprep.subr.bf16.mxu1 %v7749_v34  ;;  %v7833_v38 = vld [vmem:[%s11376_s1 + $0x80c] ss:$16 sps:$4 sm:$0xff]   ;;  %v961_v34 = vcombine.high %v9543_v32, %v9546_v33 }
  0xcb   :  { %5164 = vmatpush1.bf16.msra.mxu0 %v7744_v39  ;;  %5697 = vmatpush1.bf16.msra.mxu1 %v7747_v40  ;;  %v925_v39 = vcombine.high %v9350_v28, %v9350_v28  ;;  %v7828_v40 = vld [vmem:[%s11376_s1 + $0x800] ss:$16 sps:$4 sm:$0xff]   ;;  %v7839_v28 = vld [vmem:[%s11376_s1 + $0x82c] ss:$16 sps:$4 sm:$0xff]  }
  0xcc   :  { %5165 = vmatprep.subr.bf16.mxu0 %v7752_v41  ;;  %5698 = vmatprep.subr.bf16.mxu1 %v7755_v42  ;;  %v7831_v41 = vld [vmem:[%s11376_s1 + $0x808] ss:$16 sps:$4 sm:$0xff]   ;;  %v7836_v42 = vld [vmem:[%s11376_s1 + $0x824] ss:$16 sps:$4 sm:$0xff]  }
  0xcf   :  { %5166 = vmatpush1.bf16.msra.mxu0 %v7750_v43  ;;  %5699 = vmatpush1.bf16.msra.mxu1 %v7753_v44  ;;  %v9577_v43 = vrot.slane %v961_v34, %v8869_v52  ;;  %v7834_v44 = vld [vmem:[%s11376_s1 + $0x820] ss:$16 sps:$4 sm:$0xff]   ;;  %v7915_v34 = vld [vmem:[%s11376_s1 + $0x9c8] ss:$16 sps:$4 sm:$0xff]  }
  0xd0   :  { %5167 = vmatprep.subr.bf16.mxu0 %v7758_v46  ;;  %5700 = vmatprep.subr.bf16.mxu1 %v7761_v47  ;;  %v7837_v46 = vld [vmem:[%s11376_s1 + $0x828] ss:$16 sps:$4 sm:$0xff]   ;;  %v7842_v47 = vld [vmem:[%s11376_s1 + $0x844] ss:$16 sps:$4 sm:$0xff]  }
  0xd3   :  { %5168 = vmatpush1.bf16.msra.mxu0 %v7756_v48  ;;  %5701 = vmatpush1.bf16.msra.mxu1 %v7759_v49  ;;  %v7845_v48 = vld [vmem:[%s11376_s1 + $0x84c] ss:$16 sps:$4 sm:$0xff]   ;;  %v7840_v49 = vld [vmem:[%s11376_s1 + $0x840] ss:$16 sps:$4 sm:$0xff]  }
  0xd4   :  { %5169 = vmatprep.subr.bf16.mxu0 %v7764_v50  ;;  %5702 = vmatprep.subr.bf16.mxu1 %v7767_v51  ;;  %v7843_v50 = vld [vmem:[%s11376_s1 + $0x848] ss:$16 sps:$4 sm:$0xff]   ;;  %v7848_v51 = vld [vmem:[%s11376_s1 + $0x864] ss:$16 sps:$4 sm:$0xff]  }
  0xd7   :  { %5170 = vmatpush1.bf16.msra.mxu0 %v7762_v53  ;;  %5703 = vmatpush1.bf16.msra.mxu1 %v7765_v54  ;;  %v7851_v53 = vld [vmem:[%s11376_s1 + $0x86c] ss:$16 sps:$4 sm:$0xff]   ;;  %v7846_v54 = vld [vmem:[%s11376_s1 + $0x860] ss:$16 sps:$4 sm:$0xff]  }
  0xd8   :  { %5171 = vmatprep.subr.bf16.mxu0 %v7770_v55  ;;  %5704 = vmatprep.subr.bf16.mxu1 %v7773_v56  ;;  %v7849_v55 = vld [vmem:[%s11376_s1 + $0x868] ss:$16 sps:$4 sm:$0xff]   ;;  %v7854_v56 = vld [vmem:[%s11376_s1 + $0x884] ss:$16 sps:$4 sm:$0xff]  }
  0xdb   :  { %5172 = vmatpush1.bf16.msra.mxu0 %v7768_v57  ;;  %5705 = vmatpush1.bf16.msra.mxu1 %v7771_v58  ;;  %v7857_v57 = vld [vmem:[%s11376_s1 + $0x88c] ss:$16 sps:$4 sm:$0xff]   ;;  %v7852_v58 = vld [vmem:[%s11376_s1 + $0x880] ss:$16 sps:$4 sm:$0xff]  }
  0xdc   :  { %5173 = vmatprep.subr.bf16.mxu0 %v7776_v59  ;;  %5706 = vmatprep.subr.bf16.mxu1 %v7779_v60  ;;  %v7855_v59 = vld [vmem:[%s11376_s1 + $0x888] ss:$16 sps:$4 sm:$0xff]   ;;  %v7860_v60 = vld [vmem:[%s11376_s1 + $0x8a4] ss:$16 sps:$4 sm:$0xff]  }
  0xdf   :  { %5174 = vmatpush1.bf16.msra.mxu0 %v7774_v61  ;;  %5707 = vmatpush1.bf16.msra.mxu1 %v7777_v62  ;;  %v7858_v61 = vld [vmem:[%s11376_s1 + $0x8a0] ss:$16 sps:$4 sm:$0xff]   ;;  %v7863_v62 = vld [vmem:[%s11376_s1 + $0x8ac] ss:$16 sps:$4 sm:$0xff]  }
  0xe0   :  { %5175 = vmatprep.subr.bf16.mxu0 %v7782_v63  ;;  %5708 = vmatprep.subr.bf16.mxu1 %v7785_v0  ;;  %v7861_v63 = vld [vmem:[%s11376_s1 + $0x8a8] ss:$16 sps:$4 sm:$0xff]   ;;  %v7866_v0 = vld [vmem:[%s11376_s1 + $0x8c4] ss:$16 sps:$4 sm:$0xff]  }
  0xe3   :  { %5176 = vmatpush1.bf16.msra.mxu0 %v7780_v1  ;;  %5709 = vmatpush1.bf16.msra.mxu1 %v7783_v2  ;;  %v7864_v1 = vld [vmem:[%s11376_s1 + $0x8c0] ss:$16 sps:$4 sm:$0xff]   ;;  %v7869_v2 = vld [vmem:[%s11376_s1 + $0x8cc] ss:$16 sps:$4 sm:$0xff]  }
  0xe4   :  { %5177 = vmatprep.subr.bf16.mxu0 %v7788_v3  ;;  %5710 = vmatprep.subr.bf16.mxu1 %v7791_v4  ;;  %v7867_v3 = vld [vmem:[%s11376_s1 + $0x8c8] ss:$16 sps:$4 sm:$0xff]   ;;  %v7872_v4 = vld [vmem:[%s11376_s1 + $0x8e4] ss:$16 sps:$4 sm:$0xff]  }
  0xe7   :  { %5178 = vmatpush1.bf16.msra.mxu0 %v7786_v5  ;;  %5711 = vmatpush1.bf16.msra.mxu1 %v7789_v6  ;;  %v7870_v5 = vld [vmem:[%s11376_s1 + $0x8e0] ss:$16 sps:$4 sm:$0xff]   ;;  %v7875_v6 = vld [vmem:[%s11376_s1 + $0x8ec] ss:$16 sps:$4 sm:$0xff]  }
  0xe8   :  { %5179 = vmatprep.subr.bf16.mxu0 %v7794_v7  ;;  %5712 = vmatprep.subr.bf16.mxu1 %v7797_v8  ;;  %v7873_v7 = vld [vmem:[%s11376_s1 + $0x8e8] ss:$16 sps:$4 sm:$0xff]   ;;  %v7878_v8 = vld [vmem:[%s11376_s1 + $0x904] ss:$16 sps:$4 sm:$0xff]  }
  0xeb   :  { %5180 = vmatpush1.bf16.msra.mxu0 %v7792_v9  ;;  %5713 = vmatpush1.bf16.msra.mxu1 %v7795_v10  ;;  %v7876_v9 = vld [vmem:[%s11376_s1 + $0x900] ss:$16 sps:$4 sm:$0xff]   ;;  %v7881_v10 = vld [vmem:[%s11376_s1 + $0x90c] ss:$16 sps:$4 sm:$0xff]  }
  0xec   :  { %5181 = vmatprep.subr.bf16.mxu0 %v7800_v11  ;;  %5714 = vmatprep.subr.bf16.mxu1 %v7803_v12  ;;  %v7879_v11 = vld [vmem:[%s11376_s1 + $0x908] ss:$16 sps:$4 sm:$0xff]   ;;  %v7884_v12 = vld [vmem:[%s11376_s1 + $0x924] ss:$16 sps:$4 sm:$0xff]  }
  0xef   :  { %5182 = vmatpush1.bf16.msra.mxu0 %v7798_v13  ;;  %5715 = vmatpush1.bf16.msra.mxu1 %v7801_v14  ;;  %v7882_v13 = vld [vmem:[%s11376_s1 + $0x920] ss:$16 sps:$4 sm:$0xff]   ;;  %v7887_v14 = vld [vmem:[%s11376_s1 + $0x92c] ss:$16 sps:$4 sm:$0xff]  }
  0xf0   :  { %5183 = vmatprep.subr.bf16.mxu0 %v7806_v16  ;;  %5716 = vmatprep.subr.bf16.mxu1 %v7809_v17  ;;  %v7885_v16 = vld [vmem:[%s11376_s1 + $0x928] ss:$16 sps:$4 sm:$0xff]   ;;  %v7890_v17 = vld [vmem:[%s11376_s1 + $0x944] ss:$16 sps:$4 sm:$0xff]  }
  0xf3   :  { %5184 = vmatpush1.bf16.msra.mxu0 %v7804_v18  ;;  %5717 = vmatpush1.bf16.msra.mxu1 %v7807_v19  ;;  %v7888_v18 = vld [vmem:[%s11376_s1 + $0x940] ss:$16 sps:$4 sm:$0xff]   ;;  %v7893_v19 = vld [vmem:[%s11376_s1 + $0x94c] ss:$16 sps:$4 sm:$0xff]  }
  0xf4   :  { %5185 = vmatprep.subr.bf16.mxu0 %v7812_v20  ;;  %5718 = vmatprep.subr.bf16.mxu1 %v7815_v21  ;;  %v7891_v20 = vld [vmem:[%s11376_s1 + $0x948] ss:$16 sps:$4 sm:$0xff]   ;;  %v7896_v21 = vld [vmem:[%s11376_s1 + $0x964] ss:$16 sps:$4 sm:$0xff]  }
  0xf7   :  { %5186 = vmatpush1.bf16.msra.mxu0 %v7810_v22  ;;  %5719 = vmatpush1.bf16.msra.mxu1 %v7813_v23  ;;  %v7894_v22 = vld [vmem:[%s11376_s1 + $0x960] ss:$16 sps:$4 sm:$0xff]   ;;  %v7899_v23 = vld [vmem:[%s11376_s1 + $0x96c] ss:$16 sps:$4 sm:$0xff]  }
  0xf8   :  { %5187 = vmatprep.subr.bf16.mxu0 %v7818_v15  ;;  %5720 = vmatprep.subr.bf16.mxu1 %v7821_v24  ;;  %v7897_v15 = vld [vmem:[%s11376_s1 + $0x968] ss:$16 sps:$4 sm:$0xff]   ;;  %v7902_v24 = vld [vmem:[%s11376_s1 + $0x984] ss:$16 sps:$4 sm:$0xff]  }
  0xfb   :  { %5188 = vmatpush1.bf16.msra.mxu0 %v7816_v29  ;;  %5721 = vmatpush1.bf16.msra.mxu1 %v7819_v27  ;;  %v7903_v29 = vld [vmem:[%s11376_s1 + $0x988] ss:$16 sps:$4 sm:$0xff]   ;;  %v7908_v27 = vld [vmem:[%s11376_s1 + $0x9a4] ss:$16 sps:$4 sm:$0xff]  }
  0xfc   :  { %5189 = vmatprep.subr.bf16.mxu0 %v7824_v30  ;;  %5722 = vmatprep.subr.bf16.mxu1 %v7827_v31  ;;  %v7906_v30 = vld [vmem:[%s11376_s1 + $0x9a0] ss:$16 sps:$4 sm:$0xff]   ;;  %v7911_v31 = vld [vmem:[%s11376_s1 + $0x9ac] ss:$16 sps:$4 sm:$0xff]  }
  0xff   :  { %5190 = vmatpush1.bf16.msra.mxu0 %v7822_v35  ;;  %5723 = vmatpush1.bf16.msra.mxu1 %v7825_v36  ;;  %v7909_v35 = vld [vmem:[%s11376_s1 + $0x9a8] ss:$16 sps:$4 sm:$0xff]   ;;  %v7914_v36 = vld [vmem:[%s11376_s1 + $0x9c4] ss:$16 sps:$4 sm:$0xff]  }
 0x100   :  { %5200 = vmatprep.subr.bf16.mxu0 %v7830_v37  ;;  %5733 = vmatprep.subr.bf16.mxu1 %v7833_v38  ;;  %v7912_v37 = vld [vmem:[%s11376_s1 + $0x9c0] ss:$16 sps:$4 sm:$0xff]   ;;  %v7917_v38 = vld [vmem:[%s11376_s1 + $0x9cc] ss:$16 sps:$4 sm:$0xff]  }
 0x102   :  { %5192 = vmatmul.mubr.bf16.vlgmr.msra.gmra.mrb[0].mxu0 %v925_v39  ;;  %5725 = vmatmul.mubr.bf16.vlgmr.msra.gmra.mrb[0].mxu1 %v925_v39  ;;  %v7920_v39 = vld [vmem:[%s11376_s1 + $0x9e4] ss:$16 sps:$4 sm:$0xff]  }
 0x103   :  { %5201 = vmatpush1.bf16.msra.mxu0 %v7828_v40  ;;  %5734 = vmatpush1.bf16.msra.mxu1 %v7831_v41  ;;  %v7923_v40 = vld [vmem:[%s11376_s1 + $0x9ec] ss:$16 sps:$4 sm:$0xff]   ;;  %v960_v41 = vcombine.low %v9543_v32, %v9546_v33  ;;  %v7928_v32 = vld [vmem:[%s11376_s1 + $0xa00] ss:$16 sps:$4 sm:$0xff]  }
 0x104   :  { %5202 = vmatprep.subr.bf16.mxu0 %v7836_v42  ;;  %5735 = vmatprep.subr.bf16.mxu1 %v7839_v28  ;;  %v7918_v42 = vld [vmem:[%s11376_s1 + $0x9e0] ss:$16 sps:$4 sm:$0xff]   ;;  %v7921_v28 = vld [vmem:[%s11376_s1 + $0x9e8] ss:$16 sps:$4 sm:$0xff]   ;;  %v7933_v33 = vld [vmem:[%s11376_s1 + $0xa0c] ss:$16 sps:$4 sm:$0xff]  }
 0x105   :  { %5232 = vmatprep.mubr.bf16.mxu0 %v9577_v43  ;;  %5765 = vmatprep.mubr.bf16.mxu1 %v9577_v43 }
 0x107   :  { %5203 = vmatpush1.bf16.msra.mxu0 %v7834_v44  ;;  %5736 = vmatpush1.bf16.msra.mxu1 %v7837_v46  ;;  %v7930_v44 = vld [vmem:[%s11376_s1 + $0xa04] ss:$16 sps:$4 sm:$0xff]   ;;  %v9767_v46 = vrot.slane %v960_v41, %v8869_v52  ;;  %v8017_v41 = vld [vmem:[%s11376_s1 + $0xbcc] ss:$16 sps:$4 sm:$0xff]  }
 0x108   :  { %5204 = vmatprep.subr.bf16.mxu0 %v7842_v47  ;;  %5737 = vmatprep.subr.bf16.mxu1 %v7845_v48  ;;  %v7931_v47 = vld [vmem:[%s11376_s1 + $0xa08] ss:$16 sps:$4 sm:$0xff]   ;;  %v7936_v48 = vld [vmem:[%s11376_s1 + $0xa24] ss:$16 sps:$4 sm:$0xff]  }
 0x10b   :  { %5205 = vmatpush1.bf16.msra.mxu0 %v7840_v49  ;;  %5738 = vmatpush1.bf16.msra.mxu1 %v7843_v50  ;;  %v7934_v49 = vld [vmem:[%s11376_s1 + $0xa20] ss:$16 sps:$4 sm:$0xff]   ;;  %v7939_v50 = vld [vmem:[%s11376_s1 + $0xa2c] ss:$16 sps:$4 sm:$0xff]  }
 0x10c   :  { %5206 = vmatprep.subr.bf16.mxu0 %v7848_v51  ;;  %5739 = vmatprep.subr.bf16.mxu1 %v7851_v53  ;;  %v994_v51 = vcombine.high %v9577_v43, %v9577_v43  ;;  %v7937_v53 = vld [vmem:[%s11376_s1 + $0xa28] ss:$16 sps:$4 sm:$0xff]   ;;  %v7940_v43 = vld [vmem:[%s11376_s1 + $0xa40] ss:$16 sps:$4 sm:$0xff]  }
 0x10f   :  { %5207 = vmatpush1.bf16.msra.mxu0 %v7846_v54  ;;  %5740 = vmatpush1.bf16.msra.mxu1 %v7849_v55  ;;  %v7942_v54 = vld [vmem:[%s11376_s1 + $0xa44] ss:$16 sps:$4 sm:$0xff]   ;;  %v7945_v55 = vld [vmem:[%s11376_s1 + $0xa4c] ss:$16 sps:$4 sm:$0xff]  }
 0x110   :  { %5208 = vmatprep.subr.bf16.mxu0 %v7854_v56  ;;  %5741 = vmatprep.subr.bf16.mxu1 %v7857_v57  ;;  %v7943_v56 = vld [vmem:[%s11376_s1 + $0xa48] ss:$16 sps:$4 sm:$0xff]   ;;  %v7948_v57 = vld [vmem:[%s11376_s1 + $0xa64] ss:$16 sps:$4 sm:$0xff]  }
 0x113   :  { %5209 = vmatpush1.bf16.msra.mxu0 %v7852_v58  ;;  %5742 = vmatpush1.bf16.msra.mxu1 %v7855_v59  ;;  %v7946_v58 = vld [vmem:[%s11376_s1 + $0xa60] ss:$16 sps:$4 sm:$0xff]   ;;  %v7951_v59 = vld [vmem:[%s11376_s1 + $0xa6c] ss:$16 sps:$4 sm:$0xff]  }
 0x114   :  { %5210 = vmatprep.subr.bf16.mxu0 %v7860_v60  ;;  %5743 = vmatprep.subr.bf16.mxu1 %v7863_v62  ;;  %v7949_v60 = vld [vmem:[%s11376_s1 + $0xa68] ss:$16 sps:$4 sm:$0xff]   ;;  %v7952_v62 = vld [vmem:[%s11376_s1 + $0xa80] ss:$16 sps:$4 sm:$0xff]  }
 0x117   :  { %5211 = vmatpush1.bf16.msra.mxu0 %v7858_v61  ;;  %5744 = vmatpush1.bf16.msra.mxu1 %v7861_v63  ;;  %v7954_v61 = vld [vmem:[%s11376_s1 + $0xa84] ss:$16 sps:$4 sm:$0xff]   ;;  %v7957_v63 = vld [vmem:[%s11376_s1 + $0xa8c] ss:$16 sps:$4 sm:$0xff]  }
 0x118   :  { %5212 = vmatprep.subr.bf16.mxu0 %v7866_v0  ;;  %5745 = vmatprep.subr.bf16.mxu1 %v7869_v2  ;;  %v7955_v0 = vld [vmem:[%s11376_s1 + $0xa88] ss:$16 sps:$4 sm:$0xff]   ;;  %v7958_v2 = vld [vmem:[%s11376_s1 + $0xaa0] ss:$16 sps:$4 sm:$0xff]  }
 0x11b   :  { %5213 = vmatpush1.bf16.msra.mxu0 %v7864_v1  ;;  %5746 = vmatpush1.bf16.msra.mxu1 %v7867_v3  ;;  %v7960_v1 = vld [vmem:[%s11376_s1 + $0xaa4] ss:$16 sps:$4 sm:$0xff]   ;;  %v7963_v3 = vld [vmem:[%s11376_s1 + $0xaac] ss:$16 sps:$4 sm:$0xff]  }
 0x11c   :  { %5214 = vmatprep.subr.bf16.mxu0 %v7872_v4  ;;  %5747 = vmatprep.subr.bf16.mxu1 %v7875_v6  ;;  %v7961_v4 = vld [vmem:[%s11376_s1 + $0xaa8] ss:$16 sps:$4 sm:$0xff]   ;;  %v7964_v6 = vld [vmem:[%s11376_s1 + $0xac0] ss:$16 sps:$4 sm:$0xff]  }
 0x11f   :  { %5215 = vmatpush1.bf16.msra.mxu0 %v7870_v5  ;;  %5748 = vmatpush1.bf16.msra.mxu1 %v7873_v7  ;;  %v7966_v5 = vld [vmem:[%s11376_s1 + $0xac4] ss:$16 sps:$4 sm:$0xff]   ;;  %v7969_v7 = vld [vmem:[%s11376_s1 + $0xacc] ss:$16 sps:$4 sm:$0xff]  }
 0x120   :  { %5216 = vmatprep.subr.bf16.mxu0 %v7878_v8  ;;  %5749 = vmatprep.subr.bf16.mxu1 %v7881_v10  ;;  %v7967_v8 = vld [vmem:[%s11376_s1 + $0xac8] ss:$16 sps:$4 sm:$0xff]   ;;  %v7970_v10 = vld [vmem:[%s11376_s1 + $0xae0] ss:$16 sps:$4 sm:$0xff]  }
 0x123   :  { %5217 = vmatpush1.bf16.msra.mxu0 %v7876_v9  ;;  %5750 = vmatpush1.bf16.msra.mxu1 %v7879_v11  ;;  %v7972_v9 = vld [vmem:[%s11376_s1 + $0xae4] ss:$16 sps:$4 sm:$0xff]   ;;  %v7975_v11 = vld [vmem:[%s11376_s1 + $0xaec] ss:$16 sps:$4 sm:$0xff]  }
 0x124   :  { %5218 = vmatprep.subr.bf16.mxu0 %v7884_v12  ;;  %5751 = vmatprep.subr.bf16.mxu1 %v7887_v14  ;;  %v7973_v12 = vld [vmem:[%s11376_s1 + $0xae8] ss:$16 sps:$4 sm:$0xff]   ;;  %v7976_v14 = vld [vmem:[%s11376_s1 + $0xb00] ss:$16 sps:$4 sm:$0xff]  }
 0x127   :  { %5219 = vmatpush1.bf16.msra.mxu0 %v7882_v13  ;;  %5752 = vmatpush1.bf16.msra.mxu1 %v7885_v16  ;;  %v7978_v13 = vld [vmem:[%s11376_s1 + $0xb04] ss:$16 sps:$4 sm:$0xff]   ;;  %v7981_v16 = vld [vmem:[%s11376_s1 + $0xb0c] ss:$16 sps:$4 sm:$0xff]  }
 0x128   :  { %5220 = vmatprep.subr.bf16.mxu0 %v7890_v17  ;;  %5753 = vmatprep.subr.bf16.mxu1 %v7893_v19  ;;  %v7979_v17 = vld [vmem:[%s11376_s1 + $0xb08] ss:$16 sps:$4 sm:$0xff]   ;;  %v7982_v19 = vld [vmem:[%s11376_s1 + $0xb20] ss:$16 sps:$4 sm:$0xff]  }
 0x12b   :  { %5221 = vmatpush1.bf16.msra.mxu0 %v7888_v18  ;;  %5754 = vmatpush1.bf16.msra.mxu1 %v7891_v20  ;;  %v7984_v18 = vld [vmem:[%s11376_s1 + $0xb24] ss:$16 sps:$4 sm:$0xff]   ;;  %v7987_v20 = vld [vmem:[%s11376_s1 + $0xb2c] ss:$16 sps:$4 sm:$0xff]  }
 0x12c   :  { %5222 = vmatprep.subr.bf16.mxu0 %v7896_v21  ;;  %5755 = vmatprep.subr.bf16.mxu1 %v7899_v23  ;;  %v7985_v21 = vld [vmem:[%s11376_s1 + $0xb28] ss:$16 sps:$4 sm:$0xff]   ;;  %v7988_v23 = vld [vmem:[%s11376_s1 + $0xb40] ss:$16 sps:$4 sm:$0xff]  }
 0x12f   :  { %5223 = vmatpush1.bf16.msra.mxu0 %v7894_v22  ;;  %5756 = vmatpush1.bf16.msra.mxu1 %v7897_v15  ;;  %v7990_v22 = vld [vmem:[%s11376_s1 + $0xb44] ss:$16 sps:$4 sm:$0xff]   ;;  %v7993_v15 = vld [vmem:[%s11376_s1 + $0xb4c] ss:$16 sps:$4 sm:$0xff]  }
 0x130   :  { %5224 = vmatprep.subr.bf16.mxu0 %v7902_v24  ;;  %5757 = vmatprep.subr.bf16.mxu1 %v7905_v26  ;;  %v7991_v24 = vld [vmem:[%s11376_s1 + $0xb48] ss:$16 sps:$4 sm:$0xff]   ;;  %v7994_v26 = vld [vmem:[%s11376_s1 + $0xb60] ss:$16 sps:$4 sm:$0xff]  }
 0x133   :  { %5225 = vmatpush1.bf16.msra.mxu0 %v7900_v25  ;;  %5758 = vmatpush1.bf16.msra.mxu1 %v7903_v29  ;;  %v7996_v25 = vld [vmem:[%s11376_s1 + $0xb64] ss:$16 sps:$4 sm:$0xff]   ;;  %v7999_v29 = vld [vmem:[%s11376_s1 + $0xb6c] ss:$16 sps:$4 sm:$0xff]  }
 0x134   :  { %5226 = vmatprep.subr.bf16.mxu0 %v7908_v27  ;;  %5759 = vmatprep.subr.bf16.mxu1 %v7911_v31  ;;  %v7997_v27 = vld [vmem:[%s11376_s1 + $0xb68] ss:$16 sps:$4 sm:$0xff]   ;;  %v8000_v31 = vld [vmem:[%s11376_s1 + $0xb80] ss:$16 sps:$4 sm:$0xff]  }
 0x137   :  { %5227 = vmatpush1.bf16.msra.mxu0 %v7906_v30  ;;  %5760 = vmatpush1.bf16.msra.mxu1 %v7909_v35  ;;  %v8002_v30 = vld [vmem:[%s11376_s1 + $0xb84] ss:$16 sps:$4 sm:$0xff]   ;;  %v8005_v35 = vld [vmem:[%s11376_s1 + $0xb8c] ss:$16 sps:$4 sm:$0xff]  }
 0x138   :  { %5228 = vmatprep.subr.bf16.mxu0 %v7914_v36  ;;  %5761 = vmatprep.subr.bf16.mxu1 %v7917_v38  ;;  %v8003_v36 = vld [vmem:[%s11376_s1 + $0xb88] ss:$16 sps:$4 sm:$0xff]   ;;  %v8006_v38 = vld [vmem:[%s11376_s1 + $0xba0] ss:$16 sps:$4 sm:$0xff]  }
 0x13b   :  { %5229 = vmatpush1.bf16.msra.mxu0 %v7912_v37  ;;  %5762 = vmatpush1.bf16.msra.mxu1 %v7915_v34  ;;  %v8008_v37 = vld [vmem:[%s11376_s1 + $0xba4] ss:$16 sps:$4 sm:$0xff]   ;;  %v8011_v34 = vld [vmem:[%s11376_s1 + $0xbac] ss:$16 sps:$4 sm:$0xff]  }
 0x13c   :  { %5230 = vmatprep.subr.bf16.mxu0 %v7920_v39  ;;  %5763 = vmatprep.subr.bf16.mxu1 %v7923_v40  ;;  %v8009_v39 = vld [vmem:[%s11376_s1 + $0xba8] ss:$16 sps:$4 sm:$0xff]   ;;  %v8014_v40 = vld [vmem:[%s11376_s1 + $0xbc4] ss:$16 sps:$4 sm:$0xff]  }
 0x13f   :  { %5231 = vmatpush1.bf16.msra.mxu0 %v7918_v42  ;;  %5764 = vmatpush1.bf16.msra.mxu1 %v7921_v28  ;;  %v8120_v42 = vld [vmem:[%s11375_s0 + $0xc] ss:$25 sps:$4 sm:$0xff]   ;;  %v8012_v28 = vld [vmem:[%s11376_s1 + $0xbc0] ss:$16 sps:$4 sm:$0xff]  }
 0x140   :  { %5241 = vmatprep.subr.bf16.mxu0 %v7930_v44  ;;  %5774 = vmatprep.subr.bf16.mxu1 %v7933_v33  ;;  %v8121_v44 = vld [vmem:[%s11375_s0 + $0x3e] ss:$25 sps:$4 sm:$0xff]  }
 0x141   :  { %v8020_v33 = vld [vmem:[%s11376_s1 + $0xbe4] ss:$16 sps:$4 sm:$0xff]  }
 0x142   :  { %5233 = vmatmul.mubr.bf16.vlgmr.msra.gmra.mrb[0].mxu0 %v9767_v46  ;;  %5766 = vmatmul.mubr.bf16.vlgmr.msra.gmra.mrb[0].mxu1 %v9767_v46 }
 0x143   :  { %5242 = vmatpush1.bf16.msra.mxu0 %v7928_v32  ;;  %5775 = vmatpush1.bf16.msra.mxu1 %v7931_v47  ;;  %v8015_v32 = vld [vmem:[%s11376_s1 + $0xbc8] ss:$16 sps:$4 sm:$0xff]   ;;  %v8018_v47 = vld [vmem:[%s11376_s1 + $0xbe0] ss:$16 sps:$4 sm:$0xff]  }
 0x144   :  { %5243 = vmatprep.subr.bf16.mxu0 %v7936_v48  ;;  %5776 = vmatprep.subr.bf16.mxu1 %v7939_v50  ;;  %v8023_v48 = vld [vmem:[%s11376_s1 + $0xbec] ss:$16 sps:$4 sm:$0xff]   ;;  %v9963_v50 = vrot.slane %v8121_v44, %v8869_v52  ;;  %v8099_v44 = vld [vmem:[%s11376_s1 + $0xd88] ss:$16 sps:$4 sm:$0xff]  }
 0x145   :  { %5273 = vmatprep.mubr.bf16.mxu0 %v994_v51  ;;  %5806 = vmatprep.mubr.bf16.mxu1 %v994_v51  ;;  %v8021_v51 = vld [vmem:[%s11376_s1 + $0xbe8] ss:$16 sps:$4 sm:$0xff]  }
 0x147   :  { %5244 = vmatpush1.bf16.msra.mxu0 %v7934_v49  ;;  %5777 = vmatpush1.bf16.msra.mxu1 %v7937_v53  ;;  %v9960_v49 = vrot.slane %v8120_v42, %v8869_v52  ;;  %v8026_v53 = vld [vmem:[%s11376_s1 + $0xc04] ss:$16 sps:$4 sm:$0xff]   ;;  %v8096_v42 = vld [vmem:[%s11376_s1 + $0xd80] ss:$16 sps:$4 sm:$0xff]  }
 0x148   :  { %5245 = vmatprep.subr.bf16.mxu0 %v7942_v54  ;;  %5778 = vmatprep.subr.bf16.mxu1 %v7945_v55  ;;  %v8024_v54 = vld [vmem:[%s11376_s1 + $0xc00] ss:$16 sps:$4 sm:$0xff]  }
 0x149   :  { %v963_v55 = vcombine.high %v9960_v49, %v9963_v50 }
 0x14b   :  { %5246 = vmatpush1.bf16.msra.mxu0 %v7940_v43  ;;  %5779 = vmatpush1.bf16.msra.mxu1 %v7943_v56  ;;  %v8029_v43 = vld [vmem:[%s11376_s1 + $0xc0c] ss:$16 sps:$4 sm:$0xff]   ;;  %v992_v56 = vcombine.high %v9767_v46, %v9767_v46 }
 0x14c   :  { %5247 = vmatprep.subr.bf16.mxu0 %v7948_v57  ;;  %5780 = vmatprep.subr.bf16.mxu1 %v7951_v59  ;;  %v8027_v57 = vld [vmem:[%s11376_s1 + $0xc08] ss:$16 sps:$4 sm:$0xff]   ;;  %v8030_v59 = vld [vmem:[%s11376_s1 + $0xc20] ss:$16 sps:$4 sm:$0xff]   ;;  %v8035_v46 = vld [vmem:[%s11376_s1 + $0xc2c] ss:$16 sps:$4 sm:$0xff]  }
 0x14f   :  { %5248 = vmatpush1.bf16.msra.mxu0 %v7946_v58  ;;  %5781 = vmatpush1.bf16.msra.mxu1 %v7949_v60  ;;  %v8032_v58 = vld [vmem:[%s11376_s1 + $0xc24] ss:$16 sps:$4 sm:$0xff]   ;;  %v9994_v60 = vrot.slane %v963_v55, %v8869_v52 }
 0x150   :  { %5249 = vmatprep.subr.bf16.mxu0 %v7954_v61  ;;  %5782 = vmatprep.subr.bf16.mxu1 %v7957_v63  ;;  %v8033_v61 = vld [vmem:[%s11376_s1 + $0xc28] ss:$16 sps:$4 sm:$0xff]   ;;  %v8036_v63 = vld [vmem:[%s11376_s1 + $0xc40] ss:$16 sps:$4 sm:$0xff]   ;;  %v8116_v55 = vld [vmem:[%s11376_s1 + $0xde4] ss:$16 sps:$4 sm:$0xff]  }
 0x153   :  { %5250 = vmatpush1.bf16.msra.mxu0 %v7952_v62  ;;  %5783 = vmatpush1.bf16.msra.mxu1 %v7955_v0  ;;  %v8038_v62 = vld [vmem:[%s11376_s1 + $0xc44] ss:$16 sps:$4 sm:$0xff]   ;;  %v8041_v0 = vld [vmem:[%s11376_s1 + $0xc4c] ss:$16 sps:$4 sm:$0xff]  }
 0x154   :  { %5251 = vmatprep.subr.bf16.mxu0 %v7960_v1  ;;  %5784 = vmatprep.subr.bf16.mxu1 %v7963_v3  ;;  %v8039_v1 = vld [vmem:[%s11376_s1 + $0xc48] ss:$16 sps:$4 sm:$0xff]   ;;  %v8042_v3 = vld [vmem:[%s11376_s1 + $0xc60] ss:$16 sps:$4 sm:$0xff]  }
 0x157   :  { %5252 = vmatpush1.bf16.msra.mxu0 %v7958_v2  ;;  %5785 = vmatpush1.bf16.msra.mxu1 %v7961_v4  ;;  %v8044_v2 = vld [vmem:[%s11376_s1 + $0xc64] ss:$16 sps:$4 sm:$0xff]   ;;  %v8047_v4 = vld [vmem:[%s11376_s1 + $0xc6c] ss:$16 sps:$4 sm:$0xff]  }
 0x158   :  { %5253 = vmatprep.subr.bf16.mxu0 %v7966_v5  ;;  %5786 = vmatprep.subr.bf16.mxu1 %v7969_v7  ;;  %v8045_v5 = vld [vmem:[%s11376_s1 + $0xc68] ss:$16 sps:$4 sm:$0xff]   ;;  %v8048_v7 = vld [vmem:[%s11376_s1 + $0xc80] ss:$16 sps:$4 sm:$0xff]  }
 0x15b   :  { %5254 = vmatpush1.bf16.msra.mxu0 %v7964_v6  ;;  %5787 = vmatpush1.bf16.msra.mxu1 %v7967_v8  ;;  %v8050_v6 = vld [vmem:[%s11376_s1 + $0xc84] ss:$16 sps:$4 sm:$0xff]   ;;  %v8053_v8 = vld [vmem:[%s11376_s1 + $0xc8c] ss:$16 sps:$4 sm:$0xff]  }
 0x15c   :  { %5255 = vmatprep.subr.bf16.mxu0 %v7972_v9  ;;  %5788 = vmatprep.subr.bf16.mxu1 %v7975_v11  ;;  %v8051_v9 = vld [vmem:[%s11376_s1 + $0xc88] ss:$16 sps:$4 sm:$0xff]   ;;  %v8054_v11 = vld [vmem:[%s11376_s1 + $0xca0] ss:$16 sps:$4 sm:$0xff]  }
 0x15f   :  { %5256 = vmatpush1.bf16.msra.mxu0 %v7970_v10  ;;  %5789 = vmatpush1.bf16.msra.mxu1 %v7973_v12  ;;  %v8056_v10 = vld [vmem:[%s11376_s1 + $0xca4] ss:$16 sps:$4 sm:$0xff]   ;;  %v8059_v12 = vld [vmem:[%s11376_s1 + $0xcac] ss:$16 sps:$4 sm:$0xff]  }
 0x160   :  { %5257 = vmatprep.subr.bf16.mxu0 %v7978_v13  ;;  %5790 = vmatprep.subr.bf16.mxu1 %v7981_v16  ;;  %v8057_v13 = vld [vmem:[%s11376_s1 + $0xca8] ss:$16 sps:$4 sm:$0xff]   ;;  %v8060_v16 = vld [vmem:[%s11376_s1 + $0xcc0] ss:$16 sps:$4 sm:$0xff]  }
 0x163   :  { %5258 = vmatpush1.bf16.msra.mxu0 %v7976_v14  ;;  %5791 = vmatpush1.bf16.msra.mxu1 %v7979_v17  ;;  %v8062_v14 = vld [vmem:[%s11376_s1 + $0xcc4] ss:$16 sps:$4 sm:$0xff]   ;;  %v8065_v17 = vld [vmem:[%s11376_s1 + $0xccc] ss:$16 sps:$4 sm:$0xff]  }
 0x164   :  { %5259 = vmatprep.subr.bf16.mxu0 %v7984_v18  ;;  %5792 = vmatprep.subr.bf16.mxu1 %v7987_v20  ;;  %v8063_v18 = vld [vmem:[%s11376_s1 + $0xcc8] ss:$16 sps:$4 sm:$0xff]   ;;  %v8066_v20 = vld [vmem:[%s11376_s1 + $0xce0] ss:$16 sps:$4 sm:$0xff]  }
 0x167   :  { %5260 = vmatpush1.bf16.msra.mxu0 %v7982_v19  ;;  %5793 = vmatpush1.bf16.msra.mxu1 %v7985_v21  ;;  %v8068_v19 = vld [vmem:[%s11376_s1 + $0xce4] ss:$16 sps:$4 sm:$0xff]   ;;  %v8071_v21 = vld [vmem:[%s11376_s1 + $0xcec] ss:$16 sps:$4 sm:$0xff]  }
 0x168   :  { %5261 = vmatprep.subr.bf16.mxu0 %v7990_v22  ;;  %5794 = vmatprep.subr.bf16.mxu1 %v7993_v15  ;;  %v8069_v22 = vld [vmem:[%s11376_s1 + $0xce8] ss:$16 sps:$4 sm:$0xff]   ;;  %v8072_v15 = vld [vmem:[%s11376_s1 + $0xd00] ss:$16 sps:$4 sm:$0xff]  }
 0x16b   :  { %5262 = vmatpush1.bf16.msra.mxu0 %v7988_v23  ;;  %5795 = vmatpush1.bf16.msra.mxu1 %v7991_v24  ;;  %v8074_v23 = vld [vmem:[%s11376_s1 + $0xd04] ss:$16 sps:$4 sm:$0xff]   ;;  %v8077_v24 = vld [vmem:[%s11376_s1 + $0xd0c] ss:$16 sps:$4 sm:$0xff]  }
 0x16c   :  { %5263 = vmatprep.subr.bf16.mxu0 %v7996_v25  ;;  %5796 = vmatprep.subr.bf16.mxu1 %v7999_v29  ;;  %v8075_v25 = vld [vmem:[%s11376_s1 + $0xd08] ss:$16 sps:$4 sm:$0xff]   ;;  %v8078_v29 = vld [vmem:[%s11376_s1 + $0xd20] ss:$16 sps:$4 sm:$0xff]  }
 0x16f   :  { %5264 = vmatpush1.bf16.msra.mxu0 %v7994_v26  ;;  %5797 = vmatpush1.bf16.msra.mxu1 %v7997_v27  ;;  %v8080_v26 = vld [vmem:[%s11376_s1 + $0xd24] ss:$16 sps:$4 sm:$0xff]   ;;  %v8083_v27 = vld [vmem:[%s11376_s1 + $0xd2c] ss:$16 sps:$4 sm:$0xff]  }
 0x170   :  { %5265 = vmatprep.subr.bf16.mxu0 %v8002_v30  ;;  %5798 = vmatprep.subr.bf16.mxu1 %v8005_v35  ;;  %v8081_v30 = vld [vmem:[%s11376_s1 + $0xd28] ss:$16 sps:$4 sm:$0xff]   ;;  %v8084_v35 = vld [vmem:[%s11376_s1 + $0xd40] ss:$16 sps:$4 sm:$0xff]  }
 0x173   :  { %5266 = vmatpush1.bf16.msra.mxu0 %v8000_v31  ;;  %5799 = vmatpush1.bf16.msra.mxu1 %v8003_v36  ;;  %v8086_v31 = vld [vmem:[%s11376_s1 + $0xd44] ss:$16 sps:$4 sm:$0xff]   ;;  %v8089_v36 = vld [vmem:[%s11376_s1 + $0xd4c] ss:$16 sps:$4 sm:$0xff]  }
 0x174   :  { %5267 = vmatprep.subr.bf16.mxu0 %v8008_v37  ;;  %5800 = vmatprep.subr.bf16.mxu1 %v8011_v34  ;;  %v8087_v37 = vld [vmem:[%s11376_s1 + $0xd48] ss:$16 sps:$4 sm:$0xff]   ;;  %v8090_v34 = vld [vmem:[%s11376_s1 + $0xd60] ss:$16 sps:$4 sm:$0xff]  }
 0x177   :  { %5268 = vmatpush1.bf16.msra.mxu0 %v8006_v38  ;;  %5801 = vmatpush1.bf16.msra.mxu1 %v8009_v39  ;;  %v8092_v38 = vld [vmem:[%s11376_s1 + $0xd64] ss:$16 sps:$4 sm:$0xff]   ;;  %v8095_v39 = vld [vmem:[%s11376_s1 + $0xd6c] ss:$16 sps:$4 sm:$0xff]  }
 0x178   :  { %5269 = vmatprep.subr.bf16.mxu0 %v8014_v40  ;;  %5802 = vmatprep.subr.bf16.mxu1 %v8017_v41  ;;  %v8093_v40 = vld [vmem:[%s11376_s1 + $0xd68] ss:$16 sps:$4 sm:$0xff]   ;;  %v8098_v41 = vld [vmem:[%s11376_s1 + $0xd84] ss:$16 sps:$4 sm:$0xff]  }
 0x17b   :  { %5270 = vmatpush1.bf16.msra.mxu0 %v8012_v28  ;;  %5803 = vmatpush1.bf16.msra.mxu1 %v8015_v32  ;;  %v8101_v28 = vld [vmem:[%s11376_s1 + $0xd8c] ss:$16 sps:$4 sm:$0xff]   ;;  %v8104_v32 = vld [vmem:[%s11376_s1 + $0xda4] ss:$16 sps:$4 sm:$0xff]  }
 0x17c   :  { %5271 = vmatprep.subr.bf16.mxu0 %v8020_v33  ;;  %5804 = vmatprep.subr.bf16.mxu1 %v8023_v48  ;;  %v8102_v33 = vld [vmem:[%s11376_s1 + $0xda0] ss:$16 sps:$4 sm:$0xff]   ;;  %v8105_v48 = vld [vmem:[%s11376_s1 + $0xda8] ss:$16 sps:$4 sm:$0xff]  }
 0x17f   :  { %5272 = vmatpush1.bf16.msra.mxu0 %v8018_v47  ;;  %5805 = vmatpush1.bf16.msra.mxu1 %v8021_v51  ;;  %v8107_v47 = vld [vmem:[%s11376_s1 + $0xdac] ss:$16 sps:$4 sm:$0xff]   ;;  %v8110_v51 = vld [vmem:[%s11376_s1 + $0xdc4] ss:$16 sps:$4 sm:$0xff]  }
 0x180   :  { %5282 = vmatprep.subr.bf16.mxu0 %v8026_v53  ;;  %5815 = vmatprep.subr.bf16.mxu1 %v8029_v43  ;;  %v8108_v53 = vld [vmem:[%s11376_s1 + $0xdc0] ss:$16 sps:$4 sm:$0xff]   ;;  %v8111_v43 = vld [vmem:[%s11376_s1 + $0xdc8] ss:$16 sps:$4 sm:$0xff]  }
 0x182   :  { %5274 = vmatmul.mubr.bf16.vlgmr.msra.gmra.mrb[0].mxu0 %v992_v56  ;;  %5807 = vmatmul.mubr.bf16.vlgmr.msra.gmra.mrb[0].mxu1 %v992_v56  ;;  %v8119_v56 = vld [vmem:[%s11376_s1 + $0xdec] ss:$16 sps:$4 sm:$0xff]  }
 0x183   :  { %5283 = vmatpush1.bf16.msra.mxu0 %v8024_v54  ;;  %5816 = vmatpush1.bf16.msra.mxu1 %v8027_v57  ;;  %v8113_v54 = vld [vmem:[%s11376_s1 + $0xdcc] ss:$16 sps:$4 sm:$0xff]   ;;  %v962_v57 = vcombine.low %v9960_v49, %v9963_v50  ;;  %v8122_v49 = vld [vmem:[%s11376_s1 + $0xe00] ss:$16 sps:$4 sm:$0xff]  }
 0x184   :  { %5284 = vmatprep.subr.bf16.mxu0 %v8032_v58  ;;  %5817 = vmatprep.subr.bf16.mxu1 %v8035_v46  ;;  %v8114_v58 = vld [vmem:[%s11376_s1 + $0xde0] ss:$16 sps:$4 sm:$0xff]   ;;  %v8124_v46 = vld [vmem:[%s11376_s1 + $0xe04] ss:$16 sps:$4 sm:$0xff]   ;;  %v8127_v50 = vld [vmem:[%s11376_s1 + $0xe0c] ss:$16 sps:$4 sm:$0xff]  }
 0x185   :  { %5314 = vmatprep.mubr.bf16.mxu0 %v9994_v60  ;;  %5847 = vmatprep.mubr.bf16.mxu1 %v9994_v60 }
 0x187   :  { %5285 = vmatpush1.bf16.msra.mxu0 %v8030_v59  ;;  %5818 = vmatpush1.bf16.msra.mxu1 %v8033_v61  ;;  %v8117_v59 = vld [vmem:[%s11376_s1 + $0xde8] ss:$16 sps:$4 sm:$0xff]   ;;  %v10181_v61 = vrot.slane %v962_v57, %v8869_v52  ;;  %v8211_v57 = vld [vmem:[%s11376_s1 + $0xfcc] ss:$16 sps:$4 sm:$0xff]  }
 0x188   :  { %5286 = vmatprep.subr.bf16.mxu0 %v8038_v62  ;;  %5819 = vmatprep.subr.bf16.mxu1 %v8041_v0  ;;  %v8125_v62 = vld [vmem:[%s11376_s1 + $0xe08] ss:$16 sps:$4 sm:$0xff]   ;;  %v8128_v0 = vld [vmem:[%s11376_s1 + $0xe20] ss:$16 sps:$4 sm:$0xff]  }
 0x18b   :  { %5287 = vmatpush1.bf16.msra.mxu0 %v8036_v63  ;;  %5820 = vmatpush1.bf16.msra.mxu1 %v8039_v1  ;;  %v8130_v63 = vld [vmem:[%s11376_s1 + $0xe24] ss:$16 sps:$4 sm:$0xff]   ;;  %v8133_v1 = vld [vmem:[%s11376_s1 + $0xe2c] ss:$16 sps:$4 sm:$0xff]  }
 0x18c   :  { %5288 = vmatprep.subr.bf16.mxu0 %v8044_v2  ;;  %5821 = vmatprep.subr.bf16.mxu1 %v8047_v4  ;;  %v995_v2 = vcombine.high %v9994_v60, %v9994_v60  ;;  %v8136_v4 = vld [vmem:[%s11376_s1 + $0xe44] ss:$16 sps:$4 sm:$0xff]   ;;  %v8134_v60 = vld [vmem:[%s11376_s1 + $0xe40] ss:$16 sps:$4 sm:$0xff]  }
 0x18f   :  { %5289 = vmatpush1.bf16.msra.mxu0 %v8042_v3  ;;  %5822 = vmatpush1.bf16.msra.mxu1 %v8045_v5  ;;  %v8131_v3 = vld [vmem:[%s11376_s1 + $0xe28] ss:$16 sps:$4 sm:$0xff]   ;;  %v8139_v5 = vld [vmem:[%s11376_s1 + $0xe4c] ss:$16 sps:$4 sm:$0xff]  }
 0x190   :  { %5290 = vmatprep.subr.bf16.mxu0 %v8050_v6  ;;  %5823 = vmatprep.subr.bf16.mxu1 %v8053_v8  ;;  %v8137_v6 = vld [vmem:[%s11376_s1 + $0xe48] ss:$16 sps:$4 sm:$0xff]   ;;  %v8140_v8 = vld [vmem:[%s11376_s1 + $0xe60] ss:$16 sps:$4 sm:$0xff]  }
 0x193   :  { %5291 = vmatpush1.bf16.msra.mxu0 %v8048_v7  ;;  %5824 = vmatpush1.bf16.msra.mxu1 %v8051_v9  ;;  %v8142_v7 = vld [vmem:[%s11376_s1 + $0xe64] ss:$16 sps:$4 sm:$0xff]   ;;  %v8145_v9 = vld [vmem:[%s11376_s1 + $0xe6c] ss:$16 sps:$4 sm:$0xff]  }
 0x194   :  { %5292 = vmatprep.subr.bf16.mxu0 %v8056_v10  ;;  %5825 = vmatprep.subr.bf16.mxu1 %v8059_v12  ;;  %v8143_v10 = vld [vmem:[%s11376_s1 + $0xe68] ss:$16 sps:$4 sm:$0xff]   ;;  %v8146_v12 = vld [vmem:[%s11376_s1 + $0xe80] ss:$16 sps:$4 sm:$0xff]  }
 0x197   :  { %5293 = vmatpush1.bf16.msra.mxu0 %v8054_v11  ;;  %5826 = vmatpush1.bf16.msra.mxu1 %v8057_v13  ;;  %v8148_v11 = vld [vmem:[%s11376_s1 + $0xe84] ss:$16 sps:$4 sm:$0xff]   ;;  %v8151_v13 = vld [vmem:[%s11376_s1 + $0xe8c] ss:$16 sps:$4 sm:$0xff]  }
 0x198   :  { %5294 = vmatprep.subr.bf16.mxu0 %v8062_v14  ;;  %5827 = vmatprep.subr.bf16.mxu1 %v8065_v17  ;;  %v8149_v14 = vld [vmem:[%s11376_s1 + $0xe88] ss:$16 sps:$4 sm:$0xff]   ;;  %v8152_v17 = vld [vmem:[%s11376_s1 + $0xea0] ss:$16 sps:$4 sm:$0xff]  }
 0x19b   :  { %5295 = vmatpush1.bf16.msra.mxu0 %v8060_v16  ;;  %5828 = vmatpush1.bf16.msra.mxu1 %v8063_v18  ;;  %v8154_v16 = vld [vmem:[%s11376_s1 + $0xea4] ss:$16 sps:$4 sm:$0xff]   ;;  %v8157_v18 = vld [vmem:[%s11376_s1 + $0xeac] ss:$16 sps:$4 sm:$0xff]  }
 0x19c   :  { %5296 = vmatprep.subr.bf16.mxu0 %v8068_v19  ;;  %5829 = vmatprep.subr.bf16.mxu1 %v8071_v21  ;;  %v8155_v19 = vld [vmem:[%s11376_s1 + $0xea8] ss:$16 sps:$4 sm:$0xff]   ;;  %v8158_v21 = vld [vmem:[%s11376_s1 + $0xec0] ss:$16 sps:$4 sm:$0xff]  }
 0x19f   :  { %5297 = vmatpush1.bf16.msra.mxu0 %v8066_v20  ;;  %5830 = vmatpush1.bf16.msra.mxu1 %v8069_v22  ;;  %v8160_v20 = vld [vmem:[%s11376_s1 + $0xec4] ss:$16 sps:$4 sm:$0xff]   ;;  %v8163_v22 = vld [vmem:[%s11376_s1 + $0xecc] ss:$16 sps:$4 sm:$0xff]  }
 0x1a0   :  { %5298 = vmatprep.subr.bf16.mxu0 %v8074_v23  ;;  %5831 = vmatprep.subr.bf16.mxu1 %v8077_v24  ;;  %v8161_v23 = vld [vmem:[%s11376_s1 + $0xec8] ss:$16 sps:$4 sm:$0xff]   ;;  %v8164_v24 = vld [vmem:[%s11376_s1 + $0xee0] ss:$16 sps:$4 sm:$0xff]  }
 0x1a3   :  { %5299 = vmatpush1.bf16.msra.mxu0 %v8072_v15  ;;  %5832 = vmatpush1.bf16.msra.mxu1 %v8075_v25  ;;  %v8166_v15 = vld [vmem:[%s11376_s1 + $0xee4] ss:$16 sps:$4 sm:$0xff]   ;;  %v8169_v25 = vld [vmem:[%s11376_s1 + $0xeec] ss:$16 sps:$4 sm:$0xff]  }
 0x1a4   :  { %5300 = vmatprep.subr.bf16.mxu0 %v8080_v26  ;;  %5833 = vmatprep.subr.bf16.mxu1 %v8083_v27  ;;  %v8167_v26 = vld [vmem:[%s11376_s1 + $0xee8] ss:$16 sps:$4 sm:$0xff]   ;;  %v8170_v27 = vld [vmem:[%s11376_s1 + $0xf00] ss:$16 sps:$4 sm:$0xff]  }
 0x1a7   :  { %5301 = vmatpush1.bf16.msra.mxu0 %v8078_v29  ;;  %5834 = vmatpush1.bf16.msra.mxu1 %v8081_v30  ;;  %v8172_v29 = vld [vmem:[%s11376_s1 + $0xf04] ss:$16 sps:$4 sm:$0xff]   ;;  %v8175_v30 = vld [vmem:[%s11376_s1 + $0xf0c] ss:$16 sps:$4 sm:$0xff]  }
 0x1a8   :  { %5302 = vmatprep.subr.bf16.mxu0 %v8086_v31  ;;  %5835 = vmatprep.subr.bf16.mxu1 %v8089_v36  ;;  %v8173_v31 = vld [vmem:[%s11376_s1 + $0xf08] ss:$16 sps:$4 sm:$0xff]   ;;  %v8176_v36 = vld [vmem:[%s11376_s1 + $0xf20] ss:$16 sps:$4 sm:$0xff]  }
 0x1ab   :  { %5303 = vmatpush1.bf16.msra.mxu0 %v8084_v35  ;;  %5836 = vmatpush1.bf16.msra.mxu1 %v8087_v37  ;;  %v8178_v35 = vld [vmem:[%s11376_s1 + $0xf24] ss:$16 sps:$4 sm:$0xff]   ;;  %v8181_v37 = vld [vmem:[%s11376_s1 + $0xf2c] ss:$16 sps:$4 sm:$0xff]  }
 0x1ac   :  { %5304 = vmatprep.subr.bf16.mxu0 %v8092_v38  ;;  %5837 = vmatprep.subr.bf16.mxu1 %v8095_v39  ;;  %v8179_v38 = vld [vmem:[%s11376_s1 + $0xf28] ss:$16 sps:$4 sm:$0xff]   ;;  %v8182_v39 = vld [vmem:[%s11376_s1 + $0xf40] ss:$16 sps:$4 sm:$0xff]  }
 0x1af   :  { %5305 = vmatpush1.bf16.msra.mxu0 %v8090_v34  ;;  %5838 = vmatpush1.bf16.msra.mxu1 %v8093_v40  ;;  %v8184_v34 = vld [vmem:[%s11376_s1 + $0xf44] ss:$16 sps:$4 sm:$0xff]   ;;  %v8187_v40 = vld [vmem:[%s11376_s1 + $0xf4c] ss:$16 sps:$4 sm:$0xff]  }
 0x1b0   :  { %5306 = vmatprep.subr.bf16.mxu0 %v8098_v41  ;;  %5839 = vmatprep.subr.bf16.mxu1 %v8101_v28  ;;  %v8185_v41 = vld [vmem:[%s11376_s1 + $0xf48] ss:$16 sps:$4 sm:$0xff]   ;;  %v8188_v28 = vld [vmem:[%s11376_s1 + $0xf60] ss:$16 sps:$4 sm:$0xff]  }
 0x1b3   :  { %5307 = vmatpush1.bf16.msra.mxu0 %v8096_v42  ;;  %5840 = vmatpush1.bf16.msra.mxu1 %v8099_v44  ;;  %v8190_v42 = vld [vmem:[%s11376_s1 + $0xf64] ss:$16 sps:$4 sm:$0xff]   ;;  %v8193_v44 = vld [vmem:[%s11376_s1 + $0xf6c] ss:$16 sps:$4 sm:$0xff]  }
 0x1b4   :  { %5308 = vmatprep.subr.bf16.mxu0 %v8104_v32  ;;  %5841 = vmatprep.subr.bf16.mxu1 %v8107_v47  ;;  %v8191_v32 = vld [vmem:[%s11376_s1 + $0xf68] ss:$16 sps:$4 sm:$0xff]   ;;  %v8194_v47 = vld [vmem:[%s11376_s1 + $0xf80] ss:$16 sps:$4 sm:$0xff]  }
 0x1b7   :  { %5309 = vmatpush1.bf16.msra.mxu0 %v8102_v33  ;;  %5842 = vmatpush1.bf16.msra.mxu1 %v8105_v48  ;;  %v8196_v33 = vld [vmem:[%s11376_s1 + $0xf84] ss:$16 sps:$4 sm:$0xff]   ;;  %v8199_v48 = vld [vmem:[%s11376_s1 + $0xf8c] ss:$16 sps:$4 sm:$0xff]  }
 0x1b8   :  { %5310 = vmatprep.subr.bf16.mxu0 %v8110_v51  ;;  %5843 = vmatprep.subr.bf16.mxu1 %v8113_v54  ;;  %v8197_v51 = vld [vmem:[%s11376_s1 + $0xf88] ss:$16 sps:$4 sm:$0xff]   ;;  %v8200_v54 = vld [vmem:[%s11376_s1 + $0xfa0] ss:$16 sps:$4 sm:$0xff]  }
 0x1bb   :  { %5311 = vmatpush1.bf16.msra.mxu0 %v8108_v53  ;;  %5844 = vmatpush1.bf16.msra.mxu1 %v8111_v43  ;;  %v8202_v53 = vld [vmem:[%s11376_s1 + $0xfa4] ss:$16 sps:$4 sm:$0xff]   ;;  %v8205_v43 = vld [vmem:[%s11376_s1 + $0xfac] ss:$16 sps:$4 sm:$0xff]  }
 0x1bc   :  { %5312 = vmatprep.subr.bf16.mxu0 %v8116_v55  ;;  %5845 = vmatprep.subr.bf16.mxu1 %v8119_v56  ;;  %v8203_v55 = vld [vmem:[%s11376_s1 + $0xfa8] ss:$16 sps:$4 sm:$0xff]   ;;  %v8208_v56 = vld [vmem:[%s11376_s1 + $0xfc4] ss:$16 sps:$4 sm:$0xff]  }
 0x1bf   :  { %5313 = vmatpush1.bf16.msra.mxu0 %v8114_v58  ;;  %5846 = vmatpush1.bf16.msra.mxu1 %v8117_v59  ;;  %v8314_v58 = vld [vmem:[%s11375_s0 + $0x10] ss:$25 sps:$4 sm:$0xff]   ;;  %v8316_v59 = vld [vmem:[%s11375_s0 + $0x42] ss:$25 sps:$4 sm:$0xff]  }
 0x1c0   :  { %5323 = vmatprep.subr.bf16.mxu0 %v8124_v46  ;;  %5856 = vmatprep.subr.bf16.mxu1 %v8127_v50  ;;  %v8206_v46 = vld [vmem:[%s11376_s1 + $0xfc0] ss:$16 sps:$4 sm:$0xff]   ;;  %v8214_v50 = vld [vmem:[%s11376_s1 + $0xfe4] ss:$16 sps:$4 sm:$0xff]  }
 0x1c2   :  { %5315 = vmatmul.mubr.bf16.vlgmr.msra.gmra.mrb[0].mxu0 %v10181_v61  ;;  %5848 = vmatmul.mubr.bf16.vlgmr.msra.gmra.mrb[0].mxu1 %v10181_v61 }
 0x1c3   :  { %5324 = vmatpush1.bf16.msra.mxu0 %v8122_v49  ;;  %5857 = vmatpush1.bf16.msra.mxu1 %v8125_v62  ;;  %v8209_v49 = vld [vmem:[%s11376_s1 + $0xfc8] ss:$16 sps:$4 sm:$0xff]   ;;  %v8217_v62 = vld [vmem:[%s11376_s1 + $0xfec] ss:$16 sps:$4 sm:$0xff]  }
 0x1c4   :  { %5325 = vmatprep.subr.bf16.mxu0 %v8130_v63  ;;  %5858 = vmatprep.subr.bf16.mxu1 %v8133_v1  ;;  %v10371_v63 = vrot.slane %v8314_v58, %v8869_v52  ;;  %v8212_v1 = vld [vmem:[%s11376_s1 + $0xfe0] ss:$16 sps:$4 sm:$0xff]   ;;  %v8295_v58 = vld [vmem:[%s11376_s1 + $0x118c] ss:$16 sps:$4 sm:$0xff]  }
 0x1c5   :  { %5355 = vmatprep.mubr.bf16.mxu0 %v995_v2  ;;  %5888 = vmatprep.mubr.bf16.mxu1 %v995_v2  ;;  %v8215_v2 = vld [vmem:[%s11376_s1 + $0xfe8] ss:$16 sps:$4 sm:$0xff]  }
 0x1c7   :  { %5326 = vmatpush1.bf16.msra.mxu0 %v8128_v0  ;;  %5859 = vmatpush1.bf16.msra.mxu1 %v8131_v3  ;;  %v10374_v0 = vrot.slane %v8316_v59, %v8869_v52  ;;  %v8220_v3 = vld [vmem:[%s11376_s1 + $0x1004] ss:$16 sps:$4 sm:$0xff]   ;;  %v8290_v59 = vld [vmem:[%s11376_s1 + $0x1180] ss:$16 sps:$4 sm:$0xff]  }
 0x1c8   :  { %5327 = vmatprep.subr.bf16.mxu0 %v8136_v4  ;;  %5860 = vmatprep.subr.bf16.mxu1 %v8139_v5  ;;  %v8223_v4 = vld [vmem:[%s11376_s1 + $0x100c] ss:$16 sps:$4 sm:$0xff]   ;;  %v993_v5 = vcombine.high %v10181_v61, %v10181_v61 }
 0x1c9   :  { %v8229_v61 = vld [vmem:[%s11376_s1 + $0x102c] ss:$16 sps:$4 sm:$0xff]  }
 0x1cb   :  { %5328 = vmatpush1.bf16.msra.mxu0 %v8134_v60  ;;  %5861 = vmatpush1.bf16.msra.mxu1 %v8137_v6  ;;  %v1029_v60 = vcombine.high %v10371_v63, %v10374_v0  ;;  %v8218_v6 = vld [vmem:[%s11376_s1 + $0x1000] ss:$16 sps:$4 sm:$0xff]  }
 0x1cc   :  { %5329 = vmatprep.subr.bf16.mxu0 %v8142_v7  ;;  %5862 = vmatprep.subr.bf16.mxu1 %v8145_v9  ;;  %v8221_v7 = vld [vmem:[%s11376_s1 + $0x1008] ss:$16 sps:$4 sm:$0xff]  }
 0x1cd   :  { %v10405_v9 = vrot.slane %v1029_v60, %v8869_v52  ;;  %v8305_v60 = vld [vmem:[%s11376_s1 + $0x11c8] ss:$16 sps:$4 sm:$0xff]  }
 0x1cf   :  { %5330 = vmatpush1.bf16.msra.mxu0 %v8140_v8  ;;  %5863 = vmatpush1.bf16.msra.mxu1 %v8143_v10  ;;  %v8226_v8 = vld [vmem:[%s11376_s1 + $0x1024] ss:$16 sps:$4 sm:$0xff]   ;;  %v8224_v10 = vld [vmem:[%s11376_s1 + $0x1020] ss:$16 sps:$4 sm:$0xff]  }
 0x1d0   :  { %5331 = vmatprep.subr.bf16.mxu0 %v8148_v11  ;;  %5864 = vmatprep.subr.bf16.mxu1 %v8151_v13  ;;  %v8227_v11 = vld [vmem:[%s11376_s1 + $0x1028] ss:$16 sps:$4 sm:$0xff]   ;;  %v8235_v13 = vld [vmem:[%s11376_s1 + $0x104c] ss:$16 sps:$4 sm:$0xff]  }
 0x1d3   :  { %5332 = vmatpush1.bf16.msra.mxu0 %v8146_v12  ;;  %5865 = vmatpush1.bf16.msra.mxu1 %v8149_v14  ;;  %v8232_v12 = vld [vmem:[%s11376_s1 + $0x1044] ss:$16 sps:$4 sm:$0xff]   ;;  %v8230_v14 = vld [vmem:[%s11376_s1 + $0x1040] ss:$16 sps:$4 sm:$0xff]  }
 0x1d4   :  { %5333 = vmatprep.subr.bf16.mxu0 %v8154_v16  ;;  %5866 = vmatprep.subr.bf16.mxu1 %v8157_v18  ;;  %v8233_v16 = vld [vmem:[%s11376_s1 + $0x1048] ss:$16 sps:$4 sm:$0xff]   ;;  %v8241_v18 = vld [vmem:[%s11376_s1 + $0x106c] ss:$16 sps:$4 sm:$0xff]  }
 0x1d7   :  { %5334 = vmatpush1.bf16.msra.mxu0 %v8152_v17  ;;  %5867 = vmatpush1.bf16.msra.mxu1 %v8155_v19  ;;  %v8238_v17 = vld [vmem:[%s11376_s1 + $0x1064] ss:$16 sps:$4 sm:$0xff]   ;;  %v8236_v19 = vld [vmem:[%s11376_s1 + $0x1060] ss:$16 sps:$4 sm:$0xff]  }
 0x1d8   :  { %5335 = vmatprep.subr.bf16.mxu0 %v8160_v20  ;;  %5868 = vmatprep.subr.bf16.mxu1 %v8163_v22  ;;  %v8239_v20 = vld [vmem:[%s11376_s1 + $0x1068] ss:$16 sps:$4 sm:$0xff]   ;;  %v8247_v22 = vld [vmem:[%s11376_s1 + $0x108c] ss:$16 sps:$4 sm:$0xff]  }
 0x1db   :  { %5336 = vmatpush1.bf16.msra.mxu0 %v8158_v21  ;;  %5869 = vmatpush1.bf16.msra.mxu1 %v8161_v23  ;;  %v8244_v21 = vld [vmem:[%s11376_s1 + $0x1084] ss:$16 sps:$4 sm:$0xff]   ;;  %v8242_v23 = vld [vmem:[%s11376_s1 + $0x1080] ss:$16 sps:$4 sm:$0xff]  }
 0x1dc   :  { %5337 = vmatprep.subr.bf16.mxu0 %v8166_v15  ;;  %5870 = vmatprep.subr.bf16.mxu1 %v8169_v25  ;;  %v8245_v15 = vld [vmem:[%s11376_s1 + $0x1088] ss:$16 sps:$4 sm:$0xff]   ;;  %v8253_v25 = vld [vmem:[%s11376_s1 + $0x10ac] ss:$16 sps:$4 sm:$0xff]  }
 0x1df   :  { %5338 = vmatpush1.bf16.msra.mxu0 %v8164_v24  ;;  %5871 = vmatpush1.bf16.msra.mxu1 %v8167_v26  ;;  %v8250_v24 = vld [vmem:[%s11376_s1 + $0x10a4] ss:$16 sps:$4 sm:$0xff]   ;;  %v8248_v26 = vld [vmem:[%s11376_s1 + $0x10a0] ss:$16 sps:$4 sm:$0xff]  }
 0x1e0   :  { %5339 = vmatprep.subr.bf16.mxu0 %v8172_v29  ;;  %5872 = vmatprep.subr.bf16.mxu1 %v8175_v30  ;;  %v8251_v29 = vld [vmem:[%s11376_s1 + $0x10a8] ss:$16 sps:$4 sm:$0xff]   ;;  %v8259_v30 = vld [vmem:[%s11376_s1 + $0x10cc] ss:$16 sps:$4 sm:$0xff]  }
 0x1e3   :  { %5340 = vmatpush1.bf16.msra.mxu0 %v8170_v27  ;;  %5873 = vmatpush1.bf16.msra.mxu1 %v8173_v31  ;;  %v8256_v27 = vld [vmem:[%s11376_s1 + $0x10c4] ss:$16 sps:$4 sm:$0xff]   ;;  %v8254_v31 = vld [vmem:[%s11376_s1 + $0x10c0] ss:$16 sps:$4 sm:$0xff]  }
 0x1e4   :  { %5341 = vmatprep.subr.bf16.mxu0 %v8178_v35  ;;  %5874 = vmatprep.subr.bf16.mxu1 %v8181_v37  ;;  %v8257_v35 = vld [vmem:[%s11376_s1 + $0x10c8] ss:$16 sps:$4 sm:$0xff]   ;;  %v8265_v37 = vld [vmem:[%s11376_s1 + $0x10ec] ss:$16 sps:$4 sm:$0xff]  }
 0x1e7   :  { %5342 = vmatpush1.bf16.msra.mxu0 %v8176_v36  ;;  %5875 = vmatpush1.bf16.msra.mxu1 %v8179_v38  ;;  %v8262_v36 = vld [vmem:[%s11376_s1 + $0x10e4] ss:$16 sps:$4 sm:$0xff]   ;;  %v8260_v38 = vld [vmem:[%s11376_s1 + $0x10e0] ss:$16 sps:$4 sm:$0xff]  }
 0x1e8   :  { %5343 = vmatprep.subr.bf16.mxu0 %v8184_v34  ;;  %5876 = vmatprep.subr.bf16.mxu1 %v8187_v40  ;;  %v8263_v34 = vld [vmem:[%s11376_s1 + $0x10e8] ss:$16 sps:$4 sm:$0xff]   ;;  %v8271_v40 = vld [vmem:[%s11376_s1 + $0x110c] ss:$16 sps:$4 sm:$0xff]  }
 0x1eb   :  { %5344 = vmatpush1.bf16.msra.mxu0 %v8182_v39  ;;  %5877 = vmatpush1.bf16.msra.mxu1 %v8185_v41  ;;  %v8268_v39 = vld [vmem:[%s11376_s1 + $0x1104] ss:$16 sps:$4 sm:$0xff]   ;;  %v8266_v41 = vld [vmem:[%s11376_s1 + $0x1100] ss:$16 sps:$4 sm:$0xff]  }
 0x1ec   :  { %5345 = vmatprep.subr.bf16.mxu0 %v8190_v42  ;;  %5878 = vmatprep.subr.bf16.mxu1 %v8193_v44  ;;  %v8269_v42 = vld [vmem:[%s11376_s1 + $0x1108] ss:$16 sps:$4 sm:$0xff]   ;;  %v8277_v44 = vld [vmem:[%s11376_s1 + $0x112c] ss:$16 sps:$4 sm:$0xff]  }
 0x1ef   :  { %5346 = vmatpush1.bf16.msra.mxu0 %v8188_v28  ;;  %5879 = vmatpush1.bf16.msra.mxu1 %v8191_v32  ;;  %v8274_v28 = vld [vmem:[%s11376_s1 + $0x1124] ss:$16 sps:$4 sm:$0xff]   ;;  %v8272_v32 = vld [vmem:[%s11376_s1 + $0x1120] ss:$16 sps:$4 sm:$0xff]  }
 0x1f0   :  { %5347 = vmatprep.subr.bf16.mxu0 %v8196_v33  ;;  %5880 = vmatprep.subr.bf16.mxu1 %v8199_v48  ;;  %v8275_v33 = vld [vmem:[%s11376_s1 + $0x1128] ss:$16 sps:$4 sm:$0xff]   ;;  %v8283_v48 = vld [vmem:[%s11376_s1 + $0x114c] ss:$16 sps:$4 sm:$0xff]  }
 0x1f3   :  { %5348 = vmatpush1.bf16.msra.mxu0 %v8194_v47  ;;  %5881 = vmatpush1.bf16.msra.mxu1 %v8197_v51  ;;  %v8280_v47 = vld [vmem:[%s11376_s1 + $0x1144] ss:$16 sps:$4 sm:$0xff]   ;;  %v8278_v51 = vld [vmem:[%s11376_s1 + $0x1140] ss:$16 sps:$4 sm:$0xff]  }
 0x1f4   :  { %5349 = vmatprep.subr.bf16.mxu0 %v8202_v53  ;;  %5882 = vmatprep.subr.bf16.mxu1 %v8205_v43  ;;  %v8281_v53 = vld [vmem:[%s11376_s1 + $0x1148] ss:$16 sps:$4 sm:$0xff]   ;;  %v8289_v43 = vld [vmem:[%s11376_s1 + $0x116c] ss:$16 sps:$4 sm:$0xff]  }
 0x1f7   :  { %5350 = vmatpush1.bf16.msra.mxu0 %v8200_v54  ;;  %5883 = vmatpush1.bf16.msra.mxu1 %v8203_v55  ;;  %v8286_v54 = vld [vmem:[%s11376_s1 + $0x1164] ss:$16 sps:$4 sm:$0xff]   ;;  %v8284_v55 = vld [vmem:[%s11376_s1 + $0x1160] ss:$16 sps:$4 sm:$0xff]  }
 0x1f8   :  { %5351 = vmatprep.subr.bf16.mxu0 %v8208_v56  ;;  %5884 = vmatprep.subr.bf16.mxu1 %v8211_v57  ;;  %v8287_v56 = vld [vmem:[%s11376_s1 + $0x1168] ss:$16 sps:$4 sm:$0xff]   ;;  %v8292_v57 = vld [vmem:[%s11376_s1 + $0x1184] ss:$16 sps:$4 sm:$0xff]  }
 0x1fb   :  { %5352 = vmatpush1.bf16.msra.mxu0 %v8206_v46  ;;  %5885 = vmatpush1.bf16.msra.mxu1 %v8209_v49  ;;  %v8293_v46 = vld [vmem:[%s11376_s1 + $0x1188] ss:$16 sps:$4 sm:$0xff]   ;;  %v8298_v49 = vld [vmem:[%s11376_s1 + $0x11a4] ss:$16 sps:$4 sm:$0xff]  }
 0x1fc   :  { %5353 = vmatprep.subr.bf16.mxu0 %v8214_v50  ;;  %5886 = vmatprep.subr.bf16.mxu1 %v8217_v62  ;;  %v8301_v50 = vld [vmem:[%s11376_s1 + $0x11ac] ss:$16 sps:$4 sm:$0xff]   ;;  %v8296_v62 = vld [vmem:[%s11376_s1 + $0x11a0] ss:$16 sps:$4 sm:$0xff]  }
 0x1ff   :  { %5354 = vmatpush1.bf16.msra.mxu0 %v8212_v1  ;;  %5887 = vmatpush1.bf16.msra.mxu1 %v8215_v2  ;;  %v8299_v1 = vld [vmem:[%s11376_s1 + $0x11a8] ss:$16 sps:$4 sm:$0xff]   ;;  %v8304_v2 = vld [vmem:[%s11376_s1 + $0x11c4] ss:$16 sps:$4 sm:$0xff]  }
 0x200   :  { %5364 = vmatprep.subr.bf16.mxu0 %v8220_v3  ;;  %5897 = vmatprep.subr.bf16.mxu1 %v8223_v4  ;;  %v8307_v3 = vld [vmem:[%s11376_s1 + $0x11cc] ss:$16 sps:$4 sm:$0xff]   ;;  %v8302_v4 = vld [vmem:[%s11376_s1 + $0x11c0] ss:$16 sps:$4 sm:$0xff]  }
 0x202   :  { %5356 = vmatmul.mubr.bf16.vlgmr.msra.gmra.mrb[0].mxu0 %v993_v5  ;;  %5889 = vmatmul.mubr.bf16.vlgmr.msra.gmra.mrb[0].mxu1 %v993_v5  ;;  %v8310_v5 = vld [vmem:[%s11376_s1 + $0x11e4] ss:$16 sps:$4 sm:$0xff]  }
 0x203   :  { %5365 = vmatpush1.bf16.msra.mxu0 %v8218_v6  ;;  %5898 = vmatpush1.bf16.msra.mxu1 %v8221_v7  ;;  %v8313_v6 = vld [vmem:[%s11376_s1 + $0x11ec] ss:$16 sps:$4 sm:$0xff]   ;;  %v1028_v7 = vcombine.low %v10371_v63, %v10374_v0 }
 0x204   :  { %5366 = vmatprep.subr.bf16.mxu0 %v8226_v8  ;;  %5899 = vmatprep.subr.bf16.mxu1 %v8229_v61  ;;  %v8308_v8 = vld [vmem:[%s11376_s1 + $0x11e0] ss:$16 sps:$4 sm:$0xff]   ;;  %v8311_v61 = vld [vmem:[%s11376_s1 + $0x11e8] ss:$16 sps:$4 sm:$0xff]   ;;  %v8323_v63 = vld [vmem:[%s11376_s1 + $0x120c] ss:$16 sps:$4 sm:$0xff]  }
 0x205   :  { %5396 = vmatprep.mubr.bf16.mxu0 %v10405_v9  ;;  %5929 = vmatprep.mubr.bf16.mxu1 %v10405_v9  ;;  %v10592_v0 = vrot.slane %v1028_v7, %v8869_v52  ;;  %v8407_v7 = vld [vmem:[%s11376_s1 + $0x13cc] ss:$16 sps:$4 sm:$0xff]  }
 0x207   :  { %5367 = vmatpush1.bf16.msra.mxu0 %v8224_v10  ;;  %5900 = vmatpush1.bf16.msra.mxu1 %v8227_v11  ;;  %v8320_v10 = vld [vmem:[%s11376_s1 + $0x1204] ss:$16 sps:$4 sm:$0xff]   ;;  %v8318_v11 = vld [vmem:[%s11376_s1 + $0x1200] ss:$16 sps:$4 sm:$0xff]  }
 0x208   :  { %5368 = vmatprep.subr.bf16.mxu0 %v8232_v12  ;;  %5901 = vmatprep.subr.bf16.mxu1 %v8235_v13  ;;  %v8321_v12 = vld [vmem:[%s11376_s1 + $0x1208] ss:$16 sps:$4 sm:$0xff]   ;;  %v8326_v13 = vld [vmem:[%s11376_s1 + $0x1224] ss:$16 sps:$4 sm:$0xff]  }
 0x20b   :  { %5369 = vmatpush1.bf16.msra.mxu0 %v8230_v14  ;;  %5902 = vmatpush1.bf16.msra.mxu1 %v8233_v16  ;;  %v8329_v14 = vld [vmem:[%s11376_s1 + $0x122c] ss:$16 sps:$4 sm:$0xff]   ;;  %v1062_v16 = vcombine.high %v10405_v9, %v10405_v9 }
 0x20c   :  { %5370 = vmatprep.subr.bf16.mxu0 %v8238_v17  ;;  %5903 = vmatprep.subr.bf16.mxu1 %v8241_v18  ;;  %v8324_v17 = vld [vmem:[%s11376_s1 + $0x1220] ss:$16 sps:$4 sm:$0xff]   ;;  %v8327_v18 = vld [vmem:[%s11376_s1 + $0x1228] ss:$16 sps:$4 sm:$0xff]   ;;  %v8335_v9 = vld [vmem:[%s11376_s1 + $0x124c] ss:$16 sps:$4 sm:$0xff]  }
 0x20f   :  { %5371 = vmatpush1.bf16.msra.mxu0 %v8236_v19  ;;  %5904 = vmatpush1.bf16.msra.mxu1 %v8239_v20  ;;  %v8332_v19 = vld [vmem:[%s11376_s1 + $0x1244] ss:$16 sps:$4 sm:$0xff]   ;;  %v8330_v20 = vld [vmem:[%s11376_s1 + $0x1240] ss:$16 sps:$4 sm:$0xff]  }
 0x210   :  { %5372 = vmatprep.subr.bf16.mxu0 %v8244_v21  ;;  %5905 = vmatprep.subr.bf16.mxu1 %v8247_v22  ;;  %v8333_v21 = vld [vmem:[%s11376_s1 + $0x1248] ss:$16 sps:$4 sm:$0xff]   ;;  %v8338_v22 = vld [vmem:[%s11376_s1 + $0x1264] ss:$16 sps:$4 sm:$0xff]  }
 0x213   :  { %5373 = vmatpush1.bf16.msra.mxu0 %v8242_v23  ;;  %5906 = vmatpush1.bf16.msra.mxu1 %v8245_v15  ;;  %v8341_v23 = vld [vmem:[%s11376_s1 + $0x126c] ss:$16 sps:$4 sm:$0xff]   ;;  %v8336_v15 = vld [vmem:[%s11376_s1 + $0x1260] ss:$16 sps:$4 sm:$0xff]  }
 0x214   :  { %5374 = vmatprep.subr.bf16.mxu0 %v8250_v24  ;;  %5907 = vmatprep.subr.bf16.mxu1 %v8253_v25  ;;  %v8339_v24 = vld [vmem:[%s11376_s1 + $0x1268] ss:$16 sps:$4 sm:$0xff]   ;;  %v8344_v25 = vld [vmem:[%s11376_s1 + $0x1284] ss:$16 sps:$4 sm:$0xff]  }
 0x217   :  { %5375 = vmatpush1.bf16.msra.mxu0 %v8248_v26  ;;  %5908 = vmatpush1.bf16.msra.mxu1 %v8251_v29  ;;  %v8347_v26 = vld [vmem:[%s11376_s1 + $0x128c] ss:$16 sps:$4 sm:$0xff]   ;;  %v8342_v29 = vld [vmem:[%s11376_s1 + $0x1280] ss:$16 sps:$4 sm:$0xff]  }
 0x218   :  { %5376 = vmatprep.subr.bf16.mxu0 %v8256_v27  ;;  %5909 = vmatprep.subr.bf16.mxu1 %v8259_v30  ;;  %v8345_v27 = vld [vmem:[%s11376_s1 + $0x1288] ss:$16 sps:$4 sm:$0xff]   ;;  %v8350_v30 = vld [vmem:[%s11376_s1 + $0x12a4] ss:$16 sps:$4 sm:$0xff]  }
 0x21b   :  { %5377 = vmatpush1.bf16.msra.mxu0 %v8254_v31  ;;  %5910 = vmatpush1.bf16.msra.mxu1 %v8257_v35  ;;  %v8353_v31 = vld [vmem:[%s11376_s1 + $0x12ac] ss:$16 sps:$4 sm:$0xff]   ;;  %v8348_v35 = vld [vmem:[%s11376_s1 + $0x12a0] ss:$16 sps:$4 sm:$0xff]  }
 0x21c   :  { %5378 = vmatprep.subr.bf16.mxu0 %v8262_v36  ;;  %5911 = vmatprep.subr.bf16.mxu1 %v8265_v37  ;;  %v8351_v36 = vld [vmem:[%s11376_s1 + $0x12a8] ss:$16 sps:$4 sm:$0xff]   ;;  %v8356_v37 = vld [vmem:[%s11376_s1 + $0x12c4] ss:$16 sps:$4 sm:$0xff]  }
 0x21f   :  { %5379 = vmatpush1.bf16.msra.mxu0 %v8260_v38  ;;  %5912 = vmatpush1.bf16.msra.mxu1 %v8263_v34  ;;  %v8359_v38 = vld [vmem:[%s11376_s1 + $0x12cc] ss:$16 sps:$4 sm:$0xff]   ;;  %v8354_v34 = vld [vmem:[%s11376_s1 + $0x12c0] ss:$16 sps:$4 sm:$0xff]  }
 0x220   :  { %5380 = vmatprep.subr.bf16.mxu0 %v8268_v39  ;;  %5913 = vmatprep.subr.bf16.mxu1 %v8271_v40  ;;  %v8357_v39 = vld [vmem:[%s11376_s1 + $0x12c8] ss:$16 sps:$4 sm:$0xff]   ;;  %v8362_v40 = vld [vmem:[%s11376_s1 + $0x12e4] ss:$16 sps:$4 sm:$0xff]  }
 0x223   :  { %5381 = vmatpush1.bf16.msra.mxu0 %v8266_v41  ;;  %5914 = vmatpush1.bf16.msra.mxu1 %v8269_v42  ;;  %v8365_v41 = vld [vmem:[%s11376_s1 + $0x12ec] ss:$16 sps:$4 sm:$0xff]   ;;  %v8360_v42 = vld [vmem:[%s11376_s1 + $0x12e0] ss:$16 sps:$4 sm:$0xff]  }
 0x224   :  { %5382 = vmatprep.subr.bf16.mxu0 %v8274_v28  ;;  %5915 = vmatprep.subr.bf16.mxu1 %v8277_v44  ;;  %v8363_v28 = vld [vmem:[%s11376_s1 + $0x12e8] ss:$16 sps:$4 sm:$0xff]   ;;  %v8368_v44 = vld [vmem:[%s11376_s1 + $0x1304] ss:$16 sps:$4 sm:$0xff]  }
 0x227   :  { %5383 = vmatpush1.bf16.msra.mxu0 %v8272_v32  ;;  %5916 = vmatpush1.bf16.msra.mxu1 %v8275_v33  ;;  %v8371_v32 = vld [vmem:[%s11376_s1 + $0x130c] ss:$16 sps:$4 sm:$0xff]   ;;  %v8366_v33 = vld [vmem:[%s11376_s1 + $0x1300] ss:$16 sps:$4 sm:$0xff]  }
 0x228   :  { %5384 = vmatprep.subr.bf16.mxu0 %v8280_v47  ;;  %5917 = vmatprep.subr.bf16.mxu1 %v8283_v48  ;;  %v8369_v47 = vld [vmem:[%s11376_s1 + $0x1308] ss:$16 sps:$4 sm:$0xff]   ;;  %v8374_v48 = vld [vmem:[%s11376_s1 + $0x1324] ss:$16 sps:$4 sm:$0xff]  }
 0x22b   :  { %5385 = vmatpush1.bf16.msra.mxu0 %v8278_v51  ;;  %5918 = vmatpush1.bf16.msra.mxu1 %v8281_v53  ;;  %v8377_v51 = vld [vmem:[%s11376_s1 + $0x132c] ss:$16 sps:$4 sm:$0xff]   ;;  %v8372_v53 = vld [vmem:[%s11376_s1 + $0x1320] ss:$16 sps:$4 sm:$0xff]  }
 0x22c   :  { %5386 = vmatprep.subr.bf16.mxu0 %v8286_v54  ;;  %5919 = vmatprep.subr.bf16.mxu1 %v8289_v43  ;;  %v8375_v54 = vld [vmem:[%s11376_s1 + $0x1328] ss:$16 sps:$4 sm:$0xff]   ;;  %v8380_v43 = vld [vmem:[%s11376_s1 + $0x1344] ss:$16 sps:$4 sm:$0xff]  }
 0x22f   :  { %5387 = vmatpush1.bf16.msra.mxu0 %v8284_v55  ;;  %5920 = vmatpush1.bf16.msra.mxu1 %v8287_v56  ;;  %v8383_v55 = vld [vmem:[%s11376_s1 + $0x134c] ss:$16 sps:$4 sm:$0xff]   ;;  %v8378_v56 = vld [vmem:[%s11376_s1 + $0x1340] ss:$16 sps:$4 sm:$0xff]  }
 0x230   :  { %5388 = vmatprep.subr.bf16.mxu0 %v8292_v57  ;;  %5921 = vmatprep.subr.bf16.mxu1 %v8295_v58  ;;  %v8381_v57 = vld [vmem:[%s11376_s1 + $0x1348] ss:$16 sps:$4 sm:$0xff]   ;;  %v8386_v58 = vld [vmem:[%s11376_s1 + $0x1364] ss:$16 sps:$4 sm:$0xff]  }
 0x233   :  { %5389 = vmatpush1.bf16.msra.mxu0 %v8290_v59  ;;  %5922 = vmatpush1.bf16.msra.mxu1 %v8293_v46  ;;  %v8389_v59 = vld [vmem:[%s11376_s1 + $0x136c] ss:$16 sps:$4 sm:$0xff]   ;;  %v8384_v46 = vld [vmem:[%s11376_s1 + $0x1360] ss:$16 sps:$4 sm:$0xff]  }
 0x234   :  { %5390 = vmatprep.subr.bf16.mxu0 %v8298_v49  ;;  %5923 = vmatprep.subr.bf16.mxu1 %v8301_v50  ;;  %v8387_v49 = vld [vmem:[%s11376_s1 + $0x1368] ss:$16 sps:$4 sm:$0xff]   ;;  %v8392_v50 = vld [vmem:[%s11376_s1 + $0x1384] ss:$16 sps:$4 sm:$0xff]  }
 0x237   :  { %5391 = vmatpush1.bf16.msra.mxu0 %v8296_v62  ;;  %5924 = vmatpush1.bf16.msra.mxu1 %v8299_v1  ;;  %v8395_v62 = vld [vmem:[%s11376_s1 + $0x138c] ss:$16 sps:$4 sm:$0xff]   ;;  %v8390_v1 = vld [vmem:[%s11376_s1 + $0x1380] ss:$16 sps:$4 sm:$0xff]  }
 0x238   :  { %5392 = vmatprep.subr.bf16.mxu0 %v8304_v2  ;;  %5925 = vmatprep.subr.bf16.mxu1 %v8307_v3  ;;  %v8393_v2 = vld [vmem:[%s11376_s1 + $0x1388] ss:$16 sps:$4 sm:$0xff]   ;;  %v8398_v3 = vld [vmem:[%s11376_s1 + $0x13a4] ss:$16 sps:$4 sm:$0xff]  }
 0x23b   :  { %5393 = vmatpush1.bf16.msra.mxu0 %v8302_v4  ;;  %5926 = vmatpush1.bf16.msra.mxu1 %v8305_v60  ;;  %v8401_v4 = vld [vmem:[%s11376_s1 + $0x13ac] ss:$16 sps:$4 sm:$0xff]   ;;  %v8396_v60 = vld [vmem:[%s11376_s1 + $0x13a0] ss:$16 sps:$4 sm:$0xff]  }
 0x23c   :  { %5394 = vmatprep.subr.bf16.mxu0 %v8310_v5  ;;  %5927 = vmatprep.subr.bf16.mxu1 %v8313_v6  ;;  %v8399_v5 = vld [vmem:[%s11376_s1 + $0x13a8] ss:$16 sps:$4 sm:$0xff]   ;;  %v8404_v6 = vld [vmem:[%s11376_s1 + $0x13c4] ss:$16 sps:$4 sm:$0xff]  }
 0x23f   :  { %5395 = vmatpush1.bf16.msra.mxu0 %v8308_v8  ;;  %5928 = vmatpush1.bf16.msra.mxu1 %v8311_v61  ;;  %v8510_v8 = vld [vmem:[%s11375_s0 + $0x14] ss:$25 sps:$4 sm:$0xff]   ;;  %v8511_v61 = vld [vmem:[%s11375_s0 + $0x46] ss:$25 sps:$4 sm:$0xff]  }
 0x240   :  { %5405 = vmatprep.subr.bf16.mxu0 %v8320_v10  ;;  %5938 = vmatprep.subr.bf16.mxu1 %v8323_v63  ;;  %v8402_v10 = vld [vmem:[%s11376_s1 + $0x13c0] ss:$16 sps:$4 sm:$0xff]   ;;  %v8405_v63 = vld [vmem:[%s11376_s1 + $0x13c8] ss:$16 sps:$4 sm:$0xff]  }
 0x242   :  { %5397 = vmatmul.mubr.bf16.vlgmr.msra.gmra.mrb[0].mxu0 %v10592_v0  ;;  %5930 = vmatmul.mubr.bf16.vlgmr.msra.gmra.mrb[0].mxu1 %v10592_v0 }
 0x243   :  { %5406 = vmatpush1.bf16.msra.mxu0 %v8318_v11  ;;  %5939 = vmatpush1.bf16.msra.mxu1 %v8321_v12  ;;  %v8410_v11 = vld [vmem:[%s11376_s1 + $0x13e4] ss:$16 sps:$4 sm:$0xff]   ;;  %v8413_v12 = vld [vmem:[%s11376_s1 + $0x13ec] ss:$16 sps:$4 sm:$0xff]  }
 0x244   :  { %5407 = vmatprep.subr.bf16.mxu0 %v8326_v13  ;;  %5940 = vmatprep.subr.bf16.mxu1 %v8329_v14  ;;  %v10785_v13 = vrot.slane %v8510_v8, %v8869_v52  ;;  %v10788_v14 = vrot.slane %v8511_v61, %v8869_v52  ;;  %v8491_v8 = vld [vmem:[%s11376_s1 + $0x158c] ss:$16 sps:$4 sm:$0xff]   ;;  %v8486_v61 = vld [vmem:[%s11376_s1 + $0x1580] ss:$16 sps:$4 sm:$0xff]  }
 0x245   :  { %5437 = vmatprep.mubr.bf16.mxu0 %v1062_v16  ;;  %5970 = vmatprep.mubr.bf16.mxu1 %v1062_v16  ;;  %v8408_v16 = vld [vmem:[%s11376_s1 + $0x13e0] ss:$16 sps:$4 sm:$0xff]  }
 0x247   :  { %5408 = vmatpush1.bf16.msra.mxu0 %v8324_v17  ;;  %5941 = vmatpush1.bf16.msra.mxu1 %v8327_v18  ;;  %v8411_v17 = vld [vmem:[%s11376_s1 + $0x13e8] ss:$16 sps:$4 sm:$0xff]   ;;  %v8416_v18 = vld [vmem:[%s11376_s1 + $0x1404] ss:$16 sps:$4 sm:$0xff]  }
 0x248   :  { %5409 = vmatprep.subr.bf16.mxu0 %v8332_v19  ;;  %5942 = vmatprep.subr.bf16.mxu1 %v8335_v9  ;;  %v8419_v19 = vld [vmem:[%s11376_s1 + $0x140c] ss:$16 sps:$4 sm:$0xff]   ;;  %v1031_v9 = vcombine.high %v10785_v13, %v10788_v14 }
 0x24b   :  { %5410 = vmatpush1.bf16.msra.mxu0 %v8330_v20  ;;  %5943 = vmatpush1.bf16.msra.mxu1 %v8333_v21  ;;  %v1060_v20 = vcombine.high %v10592_v0, %v10592_v0  ;;  %v8414_v21 = vld [vmem:[%s11376_s1 + $0x1400] ss:$16 sps:$4 sm:$0xff]   ;;  %v8425_v0 = vld [vmem:[%s11376_s1 + $0x142c] ss:$16 sps:$4 sm:$0xff]  }
 0x24c   :  { %5411 = vmatprep.subr.bf16.mxu0 %v8338_v22  ;;  %5944 = vmatprep.subr.bf16.mxu1 %v8341_v23  ;;  %v8417_v22 = vld [vmem:[%s11376_s1 + $0x1408] ss:$16 sps:$4 sm:$0xff]   ;;  %v8422_v23 = vld [vmem:[%s11376_s1 + $0x1424] ss:$16 sps:$4 sm:$0xff]  }
 0x24f   :  { %5412 = vmatpush1.bf16.msra.mxu0 %v8336_v15  ;;  %5945 = vmatpush1.bf16.msra.mxu1 %v8339_v24  ;;  %v10819_v15 = vrot.slane %v1031_v9, %v8869_v52  ;;  %v8420_v24 = vld [vmem:[%s11376_s1 + $0x1420] ss:$16 sps:$4 sm:$0xff]   ;;  %v8501_v9 = vld [vmem:[%s11376_s1 + $0x15c8] ss:$16 sps:$4 sm:$0xff]  }
 0x250   :  { %5413 = vmatprep.subr.bf16.mxu0 %v8344_v25  ;;  %5946 = vmatprep.subr.bf16.mxu1 %v8347_v26  ;;  %v8423_v25 = vld [vmem:[%s11376_s1 + $0x1428] ss:$16 sps:$4 sm:$0xff]   ;;  %v8428_v26 = vld [vmem:[%s11376_s1 + $0x1444] ss:$16 sps:$4 sm:$0xff]  }
 0x253   :  { %5414 = vmatpush1.bf16.msra.mxu0 %v8342_v29  ;;  %5947 = vmatpush1.bf16.msra.mxu1 %v8345_v27  ;;  %v8431_v29 = vld [vmem:[%s11376_s1 + $0x144c] ss:$16 sps:$4 sm:$0xff]   ;;  %v8426_v27 = vld [vmem:[%s11376_s1 + $0x1440] ss:$16 sps:$4 sm:$0xff]  }
 0x254   :  { %5415 = vmatprep.subr.bf16.mxu0 %v8350_v30  ;;  %5948 = vmatprep.subr.bf16.mxu1 %v8353_v31  ;;  %v8429_v30 = vld [vmem:[%s11376_s1 + $0x1448] ss:$16 sps:$4 sm:$0xff]   ;;  %v8434_v31 = vld [vmem:[%s11376_s1 + $0x1464] ss:$16 sps:$4 sm:$0xff]  }
 0x257   :  { %5416 = vmatpush1.bf16.msra.mxu0 %v8348_v35  ;;  %5949 = vmatpush1.bf16.msra.mxu1 %v8351_v36  ;;  %v8437_v35 = vld [vmem:[%s11376_s1 + $0x146c] ss:$16 sps:$4 sm:$0xff]   ;;  %v8432_v36 = vld [vmem:[%s11376_s1 + $0x1460] ss:$16 sps:$4 sm:$0xff]  }
 0x258   :  { %5417 = vmatprep.subr.bf16.mxu0 %v8356_v37  ;;  %5950 = vmatprep.subr.bf16.mxu1 %v8359_v38  ;;  %v8435_v37 = vld [vmem:[%s11376_s1 + $0x1468] ss:$16 sps:$4 sm:$0xff]   ;;  %v8440_v38 = vld [vmem:[%s11376_s1 + $0x1484] ss:$16 sps:$4 sm:$0xff]  }
 0x25b   :  { %5418 = vmatpush1.bf16.msra.mxu0 %v8354_v34  ;;  %5951 = vmatpush1.bf16.msra.mxu1 %v8357_v39  ;;  %v8443_v34 = vld [vmem:[%s11376_s1 + $0x148c] ss:$16 sps:$4 sm:$0xff]   ;;  %v8438_v39 = vld [vmem:[%s11376_s1 + $0x1480] ss:$16 sps:$4 sm:$0xff]  }
 0x25c   :  { %5419 = vmatprep.subr.bf16.mxu0 %v8362_v40  ;;  %5952 = vmatprep.subr.bf16.mxu1 %v8365_v41  ;;  %v8441_v40 = vld [vmem:[%s11376_s1 + $0x1488] ss:$16 sps:$4 sm:$0xff]   ;;  %v8446_v41 = vld [vmem:[%s11376_s1 + $0x14a4] ss:$16 sps:$4 sm:$0xff]  }
 0x25f   :  { %5420 = vmatpush1.bf16.msra.mxu0 %v8360_v42  ;;  %5953 = vmatpush1.bf16.msra.mxu1 %v8363_v28  ;;  %v8449_v42 = vld [vmem:[%s11376_s1 + $0x14ac] ss:$16 sps:$4 sm:$0xff]   ;;  %v8444_v28 = vld [vmem:[%s11376_s1 + $0x14a0] ss:$16 sps:$4 sm:$0xff]  }
 0x260   :  { %5421 = vmatprep.subr.bf16.mxu0 %v8368_v44  ;;  %5954 = vmatprep.subr.bf16.mxu1 %v8371_v32  ;;  %v8447_v44 = vld [vmem:[%s11376_s1 + $0x14a8] ss:$16 sps:$4 sm:$0xff]   ;;  %v8452_v32 = vld [vmem:[%s11376_s1 + $0x14c4] ss:$16 sps:$4 sm:$0xff]  }
 0x263   :  { %5422 = vmatpush1.bf16.msra.mxu0 %v8366_v33  ;;  %5955 = vmatpush1.bf16.msra.mxu1 %v8369_v47  ;;  %v8455_v33 = vld [vmem:[%s11376_s1 + $0x14cc] ss:$16 sps:$4 sm:$0xff]   ;;  %v8450_v47 = vld [vmem:[%s11376_s1 + $0x14c0] ss:$16 sps:$4 sm:$0xff]  }
 0x264   :  { %5423 = vmatprep.subr.bf16.mxu0 %v8374_v48  ;;  %5956 = vmatprep.subr.bf16.mxu1 %v8377_v51  ;;  %v8453_v48 = vld [vmem:[%s11376_s1 + $0x14c8] ss:$16 sps:$4 sm:$0xff]   ;;  %v8458_v51 = vld [vmem:[%s11376_s1 + $0x14e4] ss:$16 sps:$4 sm:$0xff]  }
 0x267   :  { %5424 = vmatpush1.bf16.msra.mxu0 %v8372_v53  ;;  %5957 = vmatpush1.bf16.msra.mxu1 %v8375_v54  ;;  %v8461_v53 = vld [vmem:[%s11376_s1 + $0x14ec] ss:$16 sps:$4 sm:$0xff]   ;;  %v8456_v54 = vld [vmem:[%s11376_s1 + $0x14e0] ss:$16 sps:$4 sm:$0xff]  }
 0x268   :  { %5425 = vmatprep.subr.bf16.mxu0 %v8380_v43  ;;  %5958 = vmatprep.subr.bf16.mxu1 %v8383_v55  ;;  %v8459_v43 = vld [vmem:[%s11376_s1 + $0x14e8] ss:$16 sps:$4 sm:$0xff]   ;;  %v8464_v55 = vld [vmem:[%s11376_s1 + $0x1504] ss:$16 sps:$4 sm:$0xff]  }
 0x26b   :  { %5426 = vmatpush1.bf16.msra.mxu0 %v8378_v56  ;;  %5959 = vmatpush1.bf16.msra.mxu1 %v8381_v57  ;;  %v8467_v56 = vld [vmem:[%s11376_s1 + $0x150c] ss:$16 sps:$4 sm:$0xff]   ;;  %v8462_v57 = vld [vmem:[%s11376_s1 + $0x1500] ss:$16 sps:$4 sm:$0xff]  }
 0x26c   :  { %5427 = vmatprep.subr.bf16.mxu0 %v8386_v58  ;;  %5960 = vmatprep.subr.bf16.mxu1 %v8389_v59  ;;  %v8465_v58 = vld [vmem:[%s11376_s1 + $0x1508] ss:$16 sps:$4 sm:$0xff]   ;;  %v8470_v59 = vld [vmem:[%s11376_s1 + $0x1524] ss:$16 sps:$4 sm:$0xff]  }
 0x26f   :  { %5428 = vmatpush1.bf16.msra.mxu0 %v8384_v46  ;;  %5961 = vmatpush1.bf16.msra.mxu1 %v8387_v49  ;;  %v8473_v46 = vld [vmem:[%s11376_s1 + $0x152c] ss:$16 sps:$4 sm:$0xff]   ;;  %v8468_v49 = vld [vmem:[%s11376_s1 + $0x1520] ss:$16 sps:$4 sm:$0xff]  }
 0x270   :  { %5429 = vmatprep.subr.bf16.mxu0 %v8392_v50  ;;  %5962 = vmatprep.subr.bf16.mxu1 %v8395_v62  ;;  %v8471_v50 = vld [vmem:[%s11376_s1 + $0x1528] ss:$16 sps:$4 sm:$0xff]   ;;  %v8476_v62 = vld [vmem:[%s11376_s1 + $0x1544] ss:$16 sps:$4 sm:$0xff]  }
 0x273   :  { %5430 = vmatpush1.bf16.msra.mxu0 %v8390_v1  ;;  %5963 = vmatpush1.bf16.msra.mxu1 %v8393_v2  ;;  %v8479_v1 = vld [vmem:[%s11376_s1 + $0x154c] ss:$16 sps:$4 sm:$0xff]   ;;  %v8474_v2 = vld [vmem:[%s11376_s1 + $0x1540] ss:$16 sps:$4 sm:$0xff]  }
 0x274   :  { %5431 = vmatprep.subr.bf16.mxu0 %v8398_v3  ;;  %5964 = vmatprep.subr.bf16.mxu1 %v8401_v4  ;;  %v8477_v3 = vld [vmem:[%s11376_s1 + $0x1548] ss:$16 sps:$4 sm:$0xff]   ;;  %v8482_v4 = vld [vmem:[%s11376_s1 + $0x1564] ss:$16 sps:$4 sm:$0xff]  }
 0x277   :  { %5432 = vmatpush1.bf16.msra.mxu0 %v8396_v60  ;;  %5965 = vmatpush1.bf16.msra.mxu1 %v8399_v5  ;;  %v8485_v60 = vld [vmem:[%s11376_s1 + $0x156c] ss:$16 sps:$4 sm:$0xff]   ;;  %v8480_v5 = vld [vmem:[%s11376_s1 + $0x1560] ss:$16 sps:$4 sm:$0xff]  }
 0x278   :  { %5433 = vmatprep.subr.bf16.mxu0 %v8404_v6  ;;  %5966 = vmatprep.subr.bf16.mxu1 %v8407_v7  ;;  %v8483_v6 = vld [vmem:[%s11376_s1 + $0x1568] ss:$16 sps:$4 sm:$0xff]   ;;  %v8488_v7 = vld [vmem:[%s11376_s1 + $0x1584] ss:$16 sps:$4 sm:$0xff]  }
 0x27b   :  { %5434 = vmatpush1.bf16.msra.mxu0 %v8402_v10  ;;  %5967 = vmatpush1.bf16.msra.mxu1 %v8405_v63  ;;  %v8489_v10 = vld [vmem:[%s11376_s1 + $0x1588] ss:$16 sps:$4 sm:$0xff]   ;;  %v8494_v63 = vld [vmem:[%s11376_s1 + $0x15a4] ss:$16 sps:$4 sm:$0xff]  }
 0x27c   :  { %5435 = vmatprep.subr.bf16.mxu0 %v8410_v11  ;;  %5968 = vmatprep.subr.bf16.mxu1 %v8413_v12  ;;  %v8497_v11 = vld [vmem:[%s11376_s1 + $0x15ac] ss:$16 sps:$4 sm:$0xff]   ;;  %v8492_v12 = vld [vmem:[%s11376_s1 + $0x15a0] ss:$16 sps:$4 sm:$0xff]  }
 0x27f   :  { %5436 = vmatpush1.bf16.msra.mxu0 %v8408_v16  ;;  %5969 = vmatpush1.bf16.msra.mxu1 %v8411_v17  ;;  %v8495_v16 = vld [vmem:[%s11376_s1 + $0x15a8] ss:$16 sps:$4 sm:$0xff]   ;;  %v8500_v17 = vld [vmem:[%s11376_s1 + $0x15c4] ss:$16 sps:$4 sm:$0xff]  }
 0x280   :  { %5446 = vmatprep.subr.bf16.mxu0 %v8416_v18  ;;  %5979 = vmatprep.subr.bf16.mxu1 %v8419_v19  ;;  %v8503_v18 = vld [vmem:[%s11376_s1 + $0x15cc] ss:$16 sps:$4 sm:$0xff]   ;;  %v8498_v19 = vld [vmem:[%s11376_s1 + $0x15c0] ss:$16 sps:$4 sm:$0xff]  }
 0x282   :  { %5438 = vmatmul.mubr.bf16.vlgmr.msra.gmra.mrb[0].mxu0 %v1060_v20  ;;  %5971 = vmatmul.mubr.bf16.vlgmr.msra.gmra.mrb[0].mxu1 %v1060_v20  ;;  %v8506_v20 = vld [vmem:[%s11376_s1 + $0x15e4] ss:$16 sps:$4 sm:$0xff]  }
 0x283   :  { %5447 = vmatpush1.bf16.msra.mxu0 %v8414_v21  ;;  %5980 = vmatpush1.bf16.msra.mxu1 %v8417_v22  ;;  %v8509_v21 = vld [vmem:[%s11376_s1 + $0x15ec] ss:$16 sps:$4 sm:$0xff]   ;;  %v1030_v22 = vcombine.low %v10785_v13, %v10788_v14 }
 0x284   :  { %5448 = vmatprep.subr.bf16.mxu0 %v8422_v23  ;;  %5981 = vmatprep.subr.bf16.mxu1 %v8425_v0  ;;  %v8504_v23 = vld [vmem:[%s11376_s1 + $0x15e0] ss:$16 sps:$4 sm:$0xff]   ;;  %v8507_v0 = vld [vmem:[%s11376_s1 + $0x15e8] ss:$16 sps:$4 sm:$0xff]   ;;  %v8517_v13 = vld [vmem:[%s11376_s1 + $0x160c] ss:$16 sps:$4 sm:$0xff]  }
 0x285   :  { %5478 = vmatprep.mubr.bf16.mxu0 %v10819_v15  ;;  %6011 = vmatprep.mubr.bf16.mxu1 %v10819_v15  ;;  %v11006_v14 = vrot.slane %v1030_v22, %v8869_v52  ;;  %v8601_v22 = vld [vmem:[%s11376_s1 + $0x17cc] ss:$16 sps:$4 sm:$0xff]  }
 0x287   :  { %5449 = vmatpush1.bf16.msra.mxu0 %v8420_v24  ;;  %5982 = vmatpush1.bf16.msra.mxu1 %v8423_v25  ;;  %v8514_v24 = vld [vmem:[%s11376_s1 + $0x1604] ss:$16 sps:$4 sm:$0xff]   ;;  %v8512_v25 = vld [vmem:[%s11376_s1 + $0x1600] ss:$16 sps:$4 sm:$0xff]  }
 0x288   :  { %5450 = vmatprep.subr.bf16.mxu0 %v8428_v26  ;;  %5983 = vmatprep.subr.bf16.mxu1 %v8431_v29  ;;  %v8515_v26 = vld [vmem:[%s11376_s1 + $0x1608] ss:$16 sps:$4 sm:$0xff]   ;;  %v8520_v29 = vld [vmem:[%s11376_s1 + $0x1624] ss:$16 sps:$4 sm:$0xff]  }
 0x28b   :  { %5451 = vmatpush1.bf16.msra.mxu0 %v8426_v27  ;;  %5984 = vmatpush1.bf16.msra.mxu1 %v8429_v30  ;;  %v8523_v27 = vld [vmem:[%s11376_s1 + $0x162c] ss:$16 sps:$4 sm:$0xff]   ;;  %v1063_v30 = vcombine.high %v10819_v15, %v10819_v15 }
 0x28c   :  { %5452 = vmatprep.subr.bf16.mxu0 %v8434_v31  ;;  %5985 = vmatprep.subr.bf16.mxu1 %v8437_v35  ;;  %v8518_v31 = vld [vmem:[%s11376_s1 + $0x1620] ss:$16 sps:$4 sm:$0xff]   ;;  %v8521_v35 = vld [vmem:[%s11376_s1 + $0x1628] ss:$16 sps:$4 sm:$0xff]   ;;  %v8529_v15 = vld [vmem:[%s11376_s1 + $0x164c] ss:$16 sps:$4 sm:$0xff]  }
 0x28f   :  { %5453 = vmatpush1.bf16.msra.mxu0 %v8432_v36  ;;  %5986 = vmatpush1.bf16.msra.mxu1 %v8435_v37  ;;  %v8526_v36 = vld [vmem:[%s11376_s1 + $0x1644] ss:$16 sps:$4 sm:$0xff]   ;;  %v8524_v37 = vld [vmem:[%s11376_s1 + $0x1640] ss:$16 sps:$4 sm:$0xff]  }
 0x290   :  { %5454 = vmatprep.subr.bf16.mxu0 %v8440_v38  ;;  %5987 = vmatprep.subr.bf16.mxu1 %v8443_v34  ;;  %v8527_v38 = vld [vmem:[%s11376_s1 + $0x1648] ss:$16 sps:$4 sm:$0xff]   ;;  %v8532_v34 = vld [vmem:[%s11376_s1 + $0x1664] ss:$16 sps:$4 sm:$0xff]  }
 0x293   :  { %5455 = vmatpush1.bf16.msra.mxu0 %v8438_v39  ;;  %5988 = vmatpush1.bf16.msra.mxu1 %v8441_v40  ;;  %v8535_v39 = vld [vmem:[%s11376_s1 + $0x166c] ss:$16 sps:$4 sm:$0xff]   ;;  %v8530_v40 = vld [vmem:[%s11376_s1 + $0x1660] ss:$16 sps:$4 sm:$0xff]  }
 0x294   :  { %5456 = vmatprep.subr.bf16.mxu0 %v8446_v41  ;;  %5989 = vmatprep.subr.bf16.mxu1 %v8449_v42  ;;  %v8533_v41 = vld [vmem:[%s11376_s1 + $0x1668] ss:$16 sps:$4 sm:$0xff]   ;;  %v8538_v42 = vld [vmem:[%s11376_s1 + $0x1684] ss:$16 sps:$4 sm:$0xff]  }
 0x297   :  { %5457 = vmatpush1.bf16.msra.mxu0 %v8444_v28  ;;  %5990 = vmatpush1.bf16.msra.mxu1 %v8447_v44  ;;  %v8541_v28 = vld [vmem:[%s11376_s1 + $0x168c] ss:$16 sps:$4 sm:$0xff]   ;;  %v8536_v44 = vld [vmem:[%s11376_s1 + $0x1680] ss:$16 sps:$4 sm:$0xff]  }
 0x298   :  { %5458 = vmatprep.subr.bf16.mxu0 %v8452_v32  ;;  %5991 = vmatprep.subr.bf16.mxu1 %v8455_v33  ;;  %v8539_v32 = vld [vmem:[%s11376_s1 + $0x1688] ss:$16 sps:$4 sm:$0xff]   ;;  %v8544_v33 = vld [vmem:[%s11376_s1 + $0x16a4] ss:$16 sps:$4 sm:$0xff]  }
 0x29b   :  { %5459 = vmatpush1.bf16.msra.mxu0 %v8450_v47  ;;  %5992 = vmatpush1.bf16.msra.mxu1 %v8453_v48  ;;  %v8547_v47 = vld [vmem:[%s11376_s1 + $0x16ac] ss:$16 sps:$4 sm:$0xff]   ;;  %v8542_v48 = vld [vmem:[%s11376_s1 + $0x16a0] ss:$16 sps:$4 sm:$0xff]  }
 0x29c   :  { %5460 = vmatprep.subr.bf16.mxu0 %v8458_v51  ;;  %5993 = vmatprep.subr.bf16.mxu1 %v8461_v53  ;;  %v8545_v51 = vld [vmem:[%s11376_s1 + $0x16a8] ss:$16 sps:$4 sm:$0xff]   ;;  %v8550_v53 = vld [vmem:[%s11376_s1 + $0x16c4] ss:$16 sps:$4 sm:$0xff]  }
 0x29f   :  { %5461 = vmatpush1.bf16.msra.mxu0 %v8456_v54  ;;  %5994 = vmatpush1.bf16.msra.mxu1 %v8459_v43  ;;  %v8553_v54 = vld [vmem:[%s11376_s1 + $0x16cc] ss:$16 sps:$4 sm:$0xff]   ;;  %v8548_v43 = vld [vmem:[%s11376_s1 + $0x16c0] ss:$16 sps:$4 sm:$0xff]  }
 0x2a0   :  { %5462 = vmatprep.subr.bf16.mxu0 %v8464_v55  ;;  %5995 = vmatprep.subr.bf16.mxu1 %v8467_v56  ;;  %v8551_v55 = vld [vmem:[%s11376_s1 + $0x16c8] ss:$16 sps:$4 sm:$0xff]   ;;  %v8556_v56 = vld [vmem:[%s11376_s1 + $0x16e4] ss:$16 sps:$4 sm:$0xff]  }
 0x2a3   :  { %5463 = vmatpush1.bf16.msra.mxu0 %v8462_v57  ;;  %5996 = vmatpush1.bf16.msra.mxu1 %v8465_v58  ;;  %v8559_v57 = vld [vmem:[%s11376_s1 + $0x16ec] ss:$16 sps:$4 sm:$0xff]   ;;  %v8554_v58 = vld [vmem:[%s11376_s1 + $0x16e0] ss:$16 sps:$4 sm:$0xff]  }
 0x2a4   :  { %5464 = vmatprep.subr.bf16.mxu0 %v8470_v59  ;;  %5997 = vmatprep.subr.bf16.mxu1 %v8473_v46  ;;  %v8557_v59 = vld [vmem:[%s11376_s1 + $0x16e8] ss:$16 sps:$4 sm:$0xff]   ;;  %v8562_v46 = vld [vmem:[%s11376_s1 + $0x1704] ss:$16 sps:$4 sm:$0xff]  }
 0x2a7   :  { %5465 = vmatpush1.bf16.msra.mxu0 %v8468_v49  ;;  %5998 = vmatpush1.bf16.msra.mxu1 %v8471_v50  ;;  %v8565_v49 = vld [vmem:[%s11376_s1 + $0x170c] ss:$16 sps:$4 sm:$0xff]   ;;  %v8560_v50 = vld [vmem:[%s11376_s1 + $0x1700] ss:$16 sps:$4 sm:$0xff]  }
 0x2a8   :  { %5466 = vmatprep.subr.bf16.mxu0 %v8476_v62  ;;  %5999 = vmatprep.subr.bf16.mxu1 %v8479_v1  ;;  %v8563_v62 = vld [vmem:[%s11376_s1 + $0x1708] ss:$16 sps:$4 sm:$0xff]   ;;  %v8568_v1 = vld [vmem:[%s11376_s1 + $0x1724] ss:$16 sps:$4 sm:$0xff]  }
 0x2ab   :  { %5467 = vmatpush1.bf16.msra.mxu0 %v8474_v2  ;;  %6000 = vmatpush1.bf16.msra.mxu1 %v8477_v3  ;;  %v8571_v2 = vld [vmem:[%s11376_s1 + $0x172c] ss:$16 sps:$4 sm:$0xff]   ;;  %v8566_v3 = vld [vmem:[%s11376_s1 + $0x1720] ss:$16 sps:$4 sm:$0xff]  }
 0x2ac   :  { %5468 = vmatprep.subr.bf16.mxu0 %v8482_v4  ;;  %6001 = vmatprep.subr.bf16.mxu1 %v8485_v60  ;;  %v8569_v4 = vld [vmem:[%s11376_s1 + $0x1728] ss:$16 sps:$4 sm:$0xff]   ;;  %v8574_v60 = vld [vmem:[%s11376_s1 + $0x1744] ss:$16 sps:$4 sm:$0xff]  }
 0x2af   :  { %5469 = vmatpush1.bf16.msra.mxu0 %v8480_v5  ;;  %6002 = vmatpush1.bf16.msra.mxu1 %v8483_v6  ;;  %v8577_v5 = vld [vmem:[%s11376_s1 + $0x174c] ss:$16 sps:$4 sm:$0xff]   ;;  %v8572_v6 = vld [vmem:[%s11376_s1 + $0x1740] ss:$16 sps:$4 sm:$0xff]  }
 0x2b0   :  { %5470 = vmatprep.subr.bf16.mxu0 %v8488_v7  ;;  %6003 = vmatprep.subr.bf16.mxu1 %v8491_v8  ;;  %v8575_v7 = vld [vmem:[%s11376_s1 + $0x1748] ss:$16 sps:$4 sm:$0xff]   ;;  %v8580_v8 = vld [vmem:[%s11376_s1 + $0x1764] ss:$16 sps:$4 sm:$0xff]  }
 0x2b3   :  { %5471 = vmatpush1.bf16.msra.mxu0 %v8486_v61  ;;  %6004 = vmatpush1.bf16.msra.mxu1 %v8489_v10  ;;  %v8583_v61 = vld [vmem:[%s11376_s1 + $0x176c] ss:$16 sps:$4 sm:$0xff]   ;;  %v8578_v10 = vld [vmem:[%s11376_s1 + $0x1760] ss:$16 sps:$4 sm:$0xff]  }
 0x2b4   :  { %5472 = vmatprep.subr.bf16.mxu0 %v8494_v63  ;;  %6005 = vmatprep.subr.bf16.mxu1 %v8497_v11  ;;  %v8581_v63 = vld [vmem:[%s11376_s1 + $0x1768] ss:$16 sps:$4 sm:$0xff]   ;;  %v8586_v11 = vld [vmem:[%s11376_s1 + $0x1784] ss:$16 sps:$4 sm:$0xff]  }
 0x2b7   :  { %5473 = vmatpush1.bf16.msra.mxu0 %v8492_v12  ;;  %6006 = vmatpush1.bf16.msra.mxu1 %v8495_v16  ;;  %v8589_v12 = vld [vmem:[%s11376_s1 + $0x178c] ss:$16 sps:$4 sm:$0xff]   ;;  %v8584_v16 = vld [vmem:[%s11376_s1 + $0x1780] ss:$16 sps:$4 sm:$0xff]  }
 0x2b8   :  { %5474 = vmatprep.subr.bf16.mxu0 %v8500_v17  ;;  %6007 = vmatprep.subr.bf16.mxu1 %v8503_v18  ;;  %v8587_v17 = vld [vmem:[%s11376_s1 + $0x1788] ss:$16 sps:$4 sm:$0xff]   ;;  %v8592_v18 = vld [vmem:[%s11376_s1 + $0x17a4] ss:$16 sps:$4 sm:$0xff]  }
 0x2bb   :  { %5475 = vmatpush1.bf16.msra.mxu0 %v8498_v19  ;;  %6008 = vmatpush1.bf16.msra.mxu1 %v8501_v9  ;;  %v8595_v19 = vld [vmem:[%s11376_s1 + $0x17ac] ss:$16 sps:$4 sm:$0xff]   ;;  %v8590_v9 = vld [vmem:[%s11376_s1 + $0x17a0] ss:$16 sps:$4 sm:$0xff]  }
 0x2bc   :  { %5476 = vmatprep.subr.bf16.mxu0 %v8506_v20  ;;  %6009 = vmatprep.subr.bf16.mxu1 %v8509_v21  ;;  %v8593_v20 = vld [vmem:[%s11376_s1 + $0x17a8] ss:$16 sps:$4 sm:$0xff]   ;;  %v8598_v21 = vld [vmem:[%s11376_s1 + $0x17c4] ss:$16 sps:$4 sm:$0xff]  }
 0x2bf   :  { %5477 = vmatpush1.bf16.msra.mxu0 %v8504_v23  ;;  %6010 = vmatpush1.bf16.msra.mxu1 %v8507_v0  ;;  %v8596_v23 = vld [vmem:[%s11376_s1 + $0x17c0] ss:$16 sps:$4 sm:$0xff]   ;;  %v8599_v0 = vld [vmem:[%s11376_s1 + $0x17c8] ss:$16 sps:$4 sm:$0xff]  }
 0x2c0   :  { %5487 = vmatprep.subr.bf16.mxu0 %v8514_v24  ;;  %6020 = vmatprep.subr.bf16.mxu1 %v8517_v13  ;;  %v8604_v24 = vld [vmem:[%s11376_s1 + $0x17e4] ss:$16 sps:$4 sm:$0xff]   ;;  %v8607_v13 = vld [vmem:[%s11376_s1 + $0x17ec] ss:$16 sps:$4 sm:$0xff]  }
 0x2c2   :  { %5479 = vmatmul.mubr.bf16.vlgmr.msra.gmra.mrb[0].mxu0 %v11006_v14  ;;  %6012 = vmatmul.mubr.bf16.vlgmr.msra.gmra.mrb[0].mxu1 %v11006_v14 }
 0x2c3   :  { %5488 = vmatpush1.bf16.msra.mxu0 %v8512_v25  ;;  %6021 = vmatpush1.bf16.msra.mxu1 %v8515_v26  ;;  %v8602_v25 = vld [vmem:[%s11376_s1 + $0x17e0] ss:$16 sps:$4 sm:$0xff]   ;;  %v8605_v26 = vld [vmem:[%s11376_s1 + $0x17e8] ss:$16 sps:$4 sm:$0xff]  }
 0x2c4   :  { %5489 = vmatprep.subr.bf16.mxu0 %v8520_v29  ;;  %6022 = vmatprep.subr.bf16.mxu1 %v8523_v27  ;;  %v8610_v29 = vld [vmem:[%s11376_s1 + $0x1804] ss:$16 sps:$4 sm:$0xff]   ;;  %v8613_v27 = vld [vmem:[%s11376_s1 + $0x180c] ss:$16 sps:$4 sm:$0xff]  }
 0x2c5   :  { %5519 = vmatprep.mubr.bf16.mxu0 %v1063_v30  ;;  %6052 = vmatprep.mubr.bf16.mxu1 %v1063_v30  ;;  %v1061_v30 = vcombine.high %v11006_v14, %v11006_v14  ;;  %v8619_v14 = vld [vmem:[%s11376_s1 + $0x182c] ss:$16 sps:$4 sm:$0xff]  }
 0x2c7   :  { %5490 = vmatpush1.bf16.msra.mxu0 %v8518_v31  ;;  %6023 = vmatpush1.bf16.msra.mxu1 %v8521_v35  ;;  %v8608_v31 = vld [vmem:[%s11376_s1 + $0x1800] ss:$16 sps:$4 sm:$0xff]   ;;  %v8611_v35 = vld [vmem:[%s11376_s1 + $0x1808] ss:$16 sps:$4 sm:$0xff]  }
 0x2c8   :  { %5491 = vmatprep.subr.bf16.mxu0 %v8526_v36  ;;  %6024 = vmatprep.subr.bf16.mxu1 %v8529_v15  ;;  %v8616_v36 = vld [vmem:[%s11376_s1 + $0x1824] ss:$16 sps:$4 sm:$0xff]   ;;  %v8632_v15 = vld [vmem:[%s11375_s0 + $0x18] ss:$25 sps:$4 sm:$0x11]  }
 0x2cb   :  { %5492 = vmatpush1.bf16.msra.mxu0 %v8524_v37  ;;  %6025 = vmatpush1.bf16.msra.mxu1 %v8527_v38  ;;  %v8633_v37 = vld [vmem:[%s11375_s0 + $0x4a] ss:$25 sps:$4 sm:$0x11]  }
 0x2cc   :  { %5493 = vmatprep.subr.bf16.mxu0 %v8532_v34  ;;  %6026 = vmatprep.subr.bf16.mxu1 %v8535_v39  ;;  %v8614_v38 = vld [vmem:[%s11376_s1 + $0x1820] ss:$16 sps:$4 sm:$0xff]   ;;  %v8617_v34 = vld [vmem:[%s11376_s1 + $0x1828] ss:$16 sps:$4 sm:$0xff]   ;;  %v8622_v39 = vld [vmem:[%s11376_s1 + $0x1844] ss:$16 sps:$4 sm:$0xff]  }
 0x2cf   :  { %5494 = vmatpush1.bf16.msra.mxu0 %v8530_v40  ;;  %6027 = vmatpush1.bf16.msra.mxu1 %v8533_v41  ;;  %v8625_v40 = vld [vmem:[%s11376_s1 + $0x184c] ss:$16 sps:$4 sm:$0xff]   ;;  %v8691_v41 = vmov 0  }
 0x2d0   :  { %5495 = vmatprep.subr.bf16.mxu0 %v8538_v42  ;;  %6028 = vmatprep.subr.bf16.mxu1 %v8541_v28  ;;  %v1072_v42 = vrot.slane %v8632_v15, %v8869_v52  ;;  %v1079_v28 = vrot.slane %v8633_v37, %v8869_v52 }
 0x2d3   :  { %5496 = vmatpush1.bf16.msra.mxu0 %v8536_v44  ;;  %6029 = vmatpush1.bf16.msra.mxu1 %v8539_v32  ;;  %v8620_v44 = vld [vmem:[%s11376_s1 + $0x1840] ss:$16 sps:$4 sm:$0xff]   ;;  %v8623_v32 = vld [vmem:[%s11376_s1 + $0x1848] ss:$16 sps:$4 sm:$0xff]  }
 0x2d4   :  { %5497 = vmatprep.subr.bf16.mxu0 %v8544_v33  ;;  %6030 = vmatprep.subr.bf16.mxu1 %v8547_v47  ;;  %v8628_v33 = vld [vmem:[%s11376_s1 + $0x1864] ss:$16 sps:$4 sm:$0xff]   ;;  %v8631_v47 = vld [vmem:[%s11376_s1 + $0x186c] ss:$16 sps:$4 sm:$0xff]  }
 0x2d7   :  { %5498 = vmatpush1.bf16.msra.mxu0 %v8542_v48  ;;  %6031 = vmatpush1.bf16.msra.mxu1 %v8545_v51  ;;  %v1080_v48 = vcombine.low %v1072_v42, %v1079_v28  ;;  %v8626_v51 = vld [vmem:[%s11376_s1 + $0x1860] ss:$16 sps:$4 sm:$0xff]  }
 0x2d8   :  { %5499 = vmatprep.subr.bf16.mxu0 %v8550_v53  ;;  %6032 = vmatprep.subr.bf16.mxu1 %v8553_v54  ;;  %v8629_v53 = vld [vmem:[%s11376_s1 + $0x1868] ss:$16 sps:$4 sm:$0xff]   ;;  %v8634_v54 = vld [vmem:[%s11378_s3 + $0x40] sm:$0xff]  }
 0x2db   :  { %5500 = vmatpush1.bf16.msra.mxu0 %v8548_v43  ;;  %6033 = vmatpush1.bf16.msra.mxu1 %v8551_v55  ;;  %v8635_v43 = vld [vmem:[%s11378_s3 + $0xc0] sm:$0xff]   ;;  %v1087_v55 = vrot.slane %v1080_v48, %v8869_v52  ;;  %v8639_v52 = vld [vmem:[%s11378_s3 + $0xc8] sm:$0xff]  }
 0x2dc   :  { %5501 = vmatprep.subr.bf16.mxu0 %v8556_v56  ;;  %6034 = vmatprep.subr.bf16.mxu1 %v8559_v57  ;;  %v8636_v56 = vld [vmem:[%s11378_s3] sm:$0xff]  }
 0x2dd   :  { %v8637_v57 = vld [vmem:[%s11378_s3 + $0x80] sm:$0xff]  }
 0x2df   :  { %5502 = vmatpush1.bf16.msra.mxu0 %v8554_v58  ;;  %6035 = vmatpush1.bf16.msra.mxu1 %v8557_v59  ;;  %v8638_v58 = vld [vmem:[%s11378_s3 + $0x48] sm:$0xff]  }
 0x2e0   :  { %5503 = vmatprep.subr.bf16.mxu0 %v8562_v46  ;;  %6036 = vmatprep.subr.bf16.mxu1 %v8565_v49  ;;  %v8640_v59 = vld [vmem:[%s11378_s3 + $0x8] sm:$0xff]   ;;  %v8642_v49 = vld [vmem:[%s11378_s3 + $0x50] sm:$0xff]  }
 0x2e1   :  { %v8641_v46 = vld [vmem:[%s11378_s3 + $0x88] sm:$0xff]  }
 0x2e3   :  { %5504 = vmatpush1.bf16.msra.mxu0 %v8560_v50  ;;  %6037 = vmatpush1.bf16.msra.mxu1 %v8563_v62  ;;  %v8643_v50 = vld [vmem:[%s11378_s3 + $0xd0] sm:$0xff]  }
 0x2e4   :  { %5505 = vmatprep.subr.bf16.mxu0 %v8568_v1  ;;  %6038 = vmatprep.subr.bf16.mxu1 %v8571_v2  ;;  %v8644_v62 = vld [vmem:[%s11378_s3 + $0x10] sm:$0xff]   ;;  %v8646_v2 = vld [vmem:[%s11378_s3 + $0x58] sm:$0xff]  }
 0x2e5   :  { %v8645_v1 = vld [vmem:[%s11378_s3 + $0x90] sm:$0xff]  }
 0x2e7   :  { %5506 = vmatpush1.bf16.msra.mxu0 %v8566_v3  ;;  %6039 = vmatpush1.bf16.msra.mxu1 %v8569_v4  ;;  %v8647_v3 = vld [vmem:[%s11378_s3 + $0xd8] sm:$0xff]  }
 0x2e8   :  { %5507 = vmatprep.subr.bf16.mxu0 %v8574_v60  ;;  %6040 = vmatprep.subr.bf16.mxu1 %v8577_v5  ;;  %v8648_v4 = vld [vmem:[%s11378_s3 + $0x18] sm:$0xff]   ;;  %v8650_v5 = vld [vmem:[%s11378_s3 + $0x60] sm:$0xff]  }
 0x2e9   :  { %v8649_v60 = vld [vmem:[%s11378_s3 + $0x98] sm:$0xff]  }
 0x2eb   :  { %5508 = vmatpush1.bf16.msra.mxu0 %v8572_v6  ;;  %6041 = vmatpush1.bf16.msra.mxu1 %v8575_v7  ;;  %v8651_v6 = vld [vmem:[%s11378_s3 + $0xe0] sm:$0xff]  }
 0x2ec   :  { %5509 = vmatprep.subr.bf16.mxu0 %v8580_v8  ;;  %6042 = vmatprep.subr.bf16.mxu1 %v8583_v61  ;;  %v8652_v7 = vld [vmem:[%s11378_s3 + $0x20] sm:$0xff]   ;;  %v8654_v61 = vld [vmem:[%s11378_s3 + $0x68] sm:$0xff]  }
 0x2ed   :  { %v8653_v8 = vld [vmem:[%s11378_s3 + $0xa0] sm:$0xff]  }
 0x2ef   :  { %5510 = vmatpush1.bf16.msra.mxu0 %v8578_v10  ;;  %6043 = vmatpush1.bf16.msra.mxu1 %v8581_v63  ;;  %v8655_v10 = vld [vmem:[%s11378_s3 + $0xe8] sm:$0xff]  }
 0x2f0   :  { %5511 = vmatprep.subr.bf16.mxu0 %v8586_v11  ;;  %6044 = vmatprep.subr.bf16.mxu1 %v8589_v12  ;;  %v8656_v63 = vld [vmem:[%s11378_s3 + $0x28] sm:$0xff]   ;;  %v8658_v12 = vld [vmem:[%s11378_s3 + $0x70] sm:$0xff]  }
 0x2f1   :  { %v8657_v11 = vld [vmem:[%s11378_s3 + $0xa8] sm:$0xff]  }
 0x2f3   :  { %5512 = vmatpush1.bf16.msra.mxu0 %v8584_v16  ;;  %6045 = vmatpush1.bf16.msra.mxu1 %v8587_v17  ;;  %v8659_v16 = vld [vmem:[%s11378_s3 + $0xf0] sm:$0xff]  }
 0x2f4   :  { %5513 = vmatprep.subr.bf16.mxu0 %v8592_v18  ;;  %6046 = vmatprep.subr.bf16.mxu1 %v8595_v19  ;;  %v8660_v17 = vld [vmem:[%s11378_s3 + $0x30] sm:$0xff]   ;;  %v8662_v19 = vld [vmem:[%s11378_s3 + $0x78] sm:$0xff]  }
 0x2f5   :  { %v8661_v18 = vld [vmem:[%s11378_s3 + $0xb0] sm:$0xff]  }
 0x2f7   :  { %5514 = vmatpush1.bf16.msra.mxu0 %v8590_v9  ;;  %6047 = vmatpush1.bf16.msra.mxu1 %v8593_v20  ;;  %v8663_v9 = vld [vmem:[%s11378_s3 + $0xf8] sm:$0xff]  }
 0x2f8   :  { %5515 = vmatprep.subr.bf16.mxu0 %v8598_v21  ;;  %6048 = vmatprep.subr.bf16.mxu1 %v8601_v22  ;;  %v8664_v20 = vld [vmem:[%s11378_s3 + $0x38] sm:$0xff]   ;;  %v826_v22 = vsub.s32 0, %v8851_v45 }
 0x2f9   :  { %v8665_v21 = vld [vmem:[%s11378_s3 + $0xb8] sm:$0xff]  }
 0x2fb   :  { %5516 = vmatpush1.bf16.msra.mxu0 %v8596_v23  ;;  %6049 = vmatpush1.bf16.msra.mxu1 %v8599_v0  ;;  %v822_v23 = vld [vmem:[%s11377_s2] sm:$0xf]  ;;  %v834_v0 = vsub.s32 2, %v8851_v45 }
 0x2fc   :  { %5517 = vmatprep.subr.bf16.mxu0 %v8604_v24  ;;  %6050 = vmatprep.subr.bf16.mxu1 %v8607_v13  ;;  %v830_v24 = vsub.s32 1, %v8851_v45  ;;  %v838_v13 = vsub.s32 3, %v8851_v45 }
 0x2ff   :  { %5518 = vmatpush1.bf16.msra.mxu0 %v8602_v25  ;;  %6051 = vmatpush1.bf16.msra.mxu1 %v8605_v26  ;;  %v827_v25 = vrot.slane %v822_v23, %v826_v22  ;;  %v835_v26 = vrot.slane %v822_v23, %v834_v0 }
 0x300   :  { %5528 = vmatprep.subr.bf16.mxu0 %v8610_v29  ;;  %6061 = vmatprep.subr.bf16.mxu1 %v8613_v27  ;;  %v831_v29 = vrot.slane %v822_v23, %v830_v24  ;;  %v839_v27 = vrot.slane %v822_v23, %v838_v13 }
 0x302   :  { %5520 = vmatmul.mubr.bf16.vlgmr.msra.gmra.mrb[0].mxu0 %v1061_v30  ;;  %6053 = vmatmul.mubr.bf16.vlgmr.msra.gmra.mrb[0].mxu1 %v1061_v30 }
 0x303   :  { %5529 = vmatpush1.bf16.msra.mxu0 %v8608_v31  ;;  %6062 = vmatpush1.bf16.msra.mxu1 %v8611_v35 }
 0x304   :  { %5530 = vmatprep.subr.bf16.mxu0 %v8616_v36  ;;  %6063 = vmatprep.subr.bf16.mxu1 %v8619_v14 }
 0x305   :  { %5560 = vmatprep.mubr.bf16.mxu0 %v8691_v41  ;;  %6093 = vmatprep.mubr.bf16.mxu1 %v8691_v41 }
 0x307   :  { %5531 = vmatpush1.bf16.msra.mxu0 %v8614_v38  ;;  %6064 = vmatpush1.bf16.msra.mxu1 %v8617_v34 }
 0x308   :  { %5532 = vmatprep.subr.bf16.mxu0 %v8622_v39  ;;  %6065 = vmatprep.subr.bf16.mxu1 %v8625_v40 }
 0x30b   :  { %5533 = vmatpush1.bf16.msra.mxu0 %v8620_v44  ;;  %6066 = vmatpush1.bf16.msra.mxu1 %v8623_v32 }
 0x30c   :  { %5534 = vmatprep.subr.bf16.mxu0 %v8628_v33  ;;  %6067 = vmatprep.subr.bf16.mxu1 %v8631_v47 }
 0x30f   :  { %5535 = vmatpush1.bf16.msra.mxu0 %v8626_v51  ;;  %6068 = vmatpush1.bf16.msra.mxu1 %v8629_v53 }
 0x310   :  { %7289 = vmatprep.subr.bf16.mxu0 %v8634_v54  ;;  %7311 = vmatprep.subr.bf16.mxu1 %v8635_v43  ;;  %v7256_v54 = vld [vmem:[%s11379_s4] ss:$0 sm:$0xff] }
 0x312   :  { %7254 = vmatmul.mubr.msk.bf16.vlgmr.msra.gmra.mrb[0].mxu0 %vm5032_vm0, %v1087_v55  ;;  %7255 = vmatmul.mubr.msk.bf16.vlgmr.msra.gmra.mrb[0].mxu1 %vm5032_vm0, %v1087_v55 }
 0x313   :  { %7290 = vmatpush3.bf16.msra.mxu0 %v8636_v56  ;;  %7312 = vmatpush3.bf16.msra.mxu1 %v8637_v57 }
 0x314   :  { %7291 = vmatprep.subr.bf16.mxu0 %v8638_v58  ;;  %7313 = vmatprep.subr.bf16.mxu1 %v8639_v52 }
 0x317   :  { %7292 = vmatpush3.bf16.msra.mxu0 %v8640_v59  ;;  %7314 = vmatpush3.bf16.msra.mxu1 %v8641_v46 }
 0x318   :  { %7293 = vmatprep.subr.bf16.mxu0 %v8642_v49  ;;  %7315 = vmatprep.subr.bf16.mxu1 %v8643_v50 }
 0x31b   :  { %7294 = vmatpush3.bf16.msra.mxu0 %v8644_v62  ;;  %7316 = vmatpush3.bf16.msra.mxu1 %v8645_v1 }
 0x31c   :  { %7295 = vmatprep.subr.bf16.mxu0 %v8646_v2  ;;  %7317 = vmatprep.subr.bf16.mxu1 %v8647_v3 }
 0x31f   :  { %7296 = vmatpush3.bf16.msra.mxu0 %v8648_v4  ;;  %7318 = vmatpush3.bf16.msra.mxu1 %v8649_v60 }
 0x320   :  { %7297 = vmatprep.subr.bf16.mxu0 %v8650_v5  ;;  %7319 = vmatprep.subr.bf16.mxu1 %v8651_v6 }
 0x323   :  { %7298 = vmatpush3.bf16.msra.mxu0 %v8652_v7  ;;  %7320 = vmatpush3.bf16.msra.mxu1 %v8653_v8 }
 0x324   :  { %7299 = vmatprep.subr.bf16.mxu0 %v8654_v61  ;;  %7321 = vmatprep.subr.bf16.mxu1 %v8655_v10 }
 0x327   :  { %7300 = vmatpush3.bf16.msra.mxu0 %v8656_v63  ;;  %7322 = vmatpush3.bf16.msra.mxu1 %v8657_v11 }
 0x328   :  { %7301 = vmatprep.subr.bf16.mxu0 %v8658_v12  ;;  %7323 = vmatprep.subr.bf16.mxu1 %v8659_v16 }
 0x32b   :  { %7302 = vmatpush3.bf16.msra.mxu0 %v8660_v17  ;;  %7324 = vmatpush3.bf16.msra.mxu1 %v8661_v18 }
 0x32c   :  { %7303 = vmatprep.subr.bf16.mxu0 %v8662_v19  ;;  %7325 = vmatprep.subr.bf16.mxu1 %v8663_v9 }
 0x32f   :  { %7304 = vmatpush3.bf16.msra.mxu0 %v8664_v20  ;;  %7326 = vmatpush3.bf16.msra.mxu1 %v8665_v21 }
 0x3e5   :  { %v5562_v30 = vpop.f32.mrb[0].mxu0  ;;  %v6095_v35 = vpop.f32.mrb[0].mxu1 }
 0x3e6   :  { %v7333_v31 = vadd.f32 %v5562_v30, %v827_v25  ;;  %v5564_v36 = vpop.f32.mrb[1].mxu0  ;;  %v7335_v14 = vadd.f32 %v6095_v35, %v835_v26  ;;  %v6097_v37 = vpop.f32.mrb[1].mxu1 }
 0x3e7   :  { %v7334_v15 = vadd.f32 %v5564_v36, %v831_v29  ;;  %v5566_v38 = vpop.f32.mrb[2].mxu0  ;;  %v7336_v39 = vadd.f32 %v6097_v37, %v839_v27  ;;  %v6099_v40 = vpop.f32.mrb[2].mxu1 }
 0x3e8   :  { %v6102_v34 = vmax.f32 %v7333_v31, 0.0  ;;  %v5567_v41 = vpop.f32.mrb[3].mxu0  ;;  %v6104_v42 = vmax.f32 %v7335_v14, 0.0  ;;  %v6100_v44 = vpop.f32.mrb[3].mxu1 }
 0x3e9   :  { %v6103_v28 = vmax.f32 %v7334_v15, 0.0  ;;  %v6105_v45 = vmax.f32 %v7336_v39, 0.0 }
 0x3ea   :  { %v6106_v33 = vpack.c.bf16 %v6102_v34, %v6102_v34  ;;  %v6108_v48 = vpack.c.bf16 %v6104_v42, %v6104_v42 }
 0x3eb   :  { %v6107_v32 = vpack.c.bf16 %v6103_v28, %v6103_v28  ;;  %v6109_v47 = vpack.c.bf16 %v6105_v45, %v6105_v45 }
 0x3ed   :  { %6405 = vmatprep.mubr.bf16.mxu0 %v6107_v32  ;;  %6445 = vmatprep.mubr.bf16.mxu1 %v6109_v47 }
 0x3ee   :  { %6406 = vmatmul.mubr.bf16.vlgmr.msra.gmra.mrb[4].mxu0 %v6106_v33  ;;  %6446 = vmatmul.mubr.bf16.vlgmr.msra.gmra.mrb[4].mxu1 %v6108_v48 }
 0x4c1   :  { %v7305_v51 = vpop.f32.mrb[4].mxu0  ;;  %v7327_v53 = vpop.f32.mrb[4].mxu1 }
 0x4c2   :  { %v7306_v43 = vpop.f32.mrb[5].mxu0  ;;  %v7328_v56 = vpop.f32.mrb[5].mxu1 }
 0x4c3   :  { %v7307_v55 = vadd.f32 %v7306_v43, %v7305_v51  ;;  %v7308_v57 = vpop.f32.mrb[6].mxu0  ;;  %v7329_v58 = vadd.f32 %v7328_v56, %v7327_v53  ;;  %v7330_v52 = vpop.f32.mrb[6].mxu1 }
 0x4c4   :  { %v7309_v59 = vpop.f32.mrb[7].mxu0  ;;  %v7331_v49 = vpop.f32.mrb[7].mxu1 }
 0x4c5   :  { %v6408_v46 = vadd.f32 %v7307_v55, %v7256_v54 }
 0x4c7   :  { %v6448_v50 = vadd.f32 %v7329_v58, %v6408_v46 }
 0x4c9   :  { %6453 = vst [vmem:[#allocation2] sm:$0xff] %v6448_v50 }
 0x4ca   :  { %6458 = vsyncadd [#allocation3], 96  ;;  %s8692_s24 = smov [#allocation2]  }
 0x4cb   :  { %s6459_s25 = sshll.u32 %s8692_s24, 4  ;;  %s6460_s25 = int_to_ptr.vmem [resolvable:$true] %s6459_s25 }
 0x4cc   :  { %s8666_s26 = scalar_lea.vmem %s6460_s25, 32  ;;  %s8670_s0 = scalar_lea.vmem %s6460_s25, 128 }
 0x4cd   :  { %p8667_p0 = scmp.ne.s32.totalorder %s6460_s25, %s8666_s26  ;;  %p8671_p1 = scmp.lt.s32.totalorder %s6460_s25, %s6460_s25 }
 0x4ce   :  { %p8672_p2 = scmp.lt.s32.totalorder %s8670_s0, %s8666_s26 }
 0x4d0   :  { %p8673_p3 = por %p8672_p2, %p8671_p1 }
 0x4d2   :  { %p8674_p4 = pnand %p8673_p3, %p8667_p0 }
 0x4d4   :  { %8677 = shalt.err (!%p8674_p4)
}
 0x4d5   :  { %s8678_s28 = scalar_lea.hbm %s11380_s5, 32 }
 0x4d6   :  { %p8679_p5 = scmp.ne.s32.totalorder %s11380_s5, %s8678_s28  ;;  %p8682_p6 = scmp.lt.u32.totalorder %s8678_s28, %s11380_s5 }
 0x4d8   :  { %p8684_p7 = pnand %p8682_p6, %p8679_p5 }
 0x4da   :  { %8687 = shalt.err (!%p8684_p7)
}
 0x4db   :  { %s8693_s8 = smov 32   ;;  %s8694_s9 = smov 2  }
 0x4dc   :  { %6465 = dma.vmem_to_hbm [thread:$0]  %s6460_s25, 32, %s11380_s5, [#allocation3], %s8693_s8, %s8693_s8, %s8694_s9  }
 0x4dd   :  { %8688 = dma.done.wait [#allocation3], 128  }
 0x4de   :  { %8689 = vsyncadd [#allocation3], 4294967168 }
 0x4df   :  { %6469 = vsyncpa [#allocation3], 1 }

</bundles_post_ra>
